<compile_context>
chip_gen: v6e
topology: v6e:2x2x1
jax: 0.10.0
libtpu: 0.0.40
codegen_flags: <defaults>
</compile_context>

<pallas_src>
import jax
import jax.numpy as jnp
from jax.experimental import pallas as pl
from jax.experimental.pallas import tpu as pltpu

# ---- configuration consistent with the module ----
VOCAB = 65                 # len(chars) of the char-level corpus
VOCAB_PAD = 72             # embedding rows padded to a multiple of 8 (sublane-tidy)
VPAD = 128                 # lane-padded vocab for the lm_head (multiple of 128)
N_EMBD = 256
BLOCK_SIZE = 8             # T
N_LAYERS = 2
EPS = 1e-5


def _ln_seq(x, gamma, beta):
    """Reference LayerNorm: mean/var over axis=1 (sequence axis), unbiased variance."""
    T = x.shape[1]
    mean = jnp.mean(x, axis=1, keepdims=True)
    var = jnp.sum((x - mean) ** 2, axis=1, keepdims=True) / (T - 1)
    return gamma * ((x - mean) * jax.lax.rsqrt(var + EPS)) + beta


# ----------------------------- fused Pallas kernel -----------------------------

def gpt_fused_kernel(idx_ref,                     # SMEM  (B*T,) int32  (scalar prefetch)
                     tok_ref,                     # VMEM  (VOCAB_PAD, C) f32
                     ln_ref,                      # VMEM  (2*L+3, C) f32  [g0,b0,g1,b1,lnf_g,lnf_b,lm_b]
                     ffnb_ref,                    # VMEM  (L, 5C) f32     [b1 | b2]
                     w1_ref,                      # VMEM  (L, C, 4C) bf16
                     w2_ref,                      # VMEM  (L, 4C, C) bf16
                     lm_w_ref,                    # VMEM  (C, VPAD) bf16
                     out_ref,                     # VMEM  (B, T, VPAD) f32
                     x_scr):                      # VMEM scratch (B*T, C) f32
    B, T, _ = out_ref.shape
    BT, C = x_scr.shape

    # ---- token-embedding gather (idx in SMEM, table in VMEM) ----
    for r in range(BT):                                      # static unroll, B*T = 16
        x_scr[pl.ds(r, 1), :] = tok_ref[pl.ds(idx_ref[r], 1), :]

    x = x_scr[...].reshape(B, T, C)                           # (B, T, C) f32

    for l in range(N_LAYERS):                                 # static unroll (N_LAYERS = 2)
        # NOTE: the reference Block discards its attention branch, so the block
        #       output is exactly FFN(ln1(x)) + x.
        g = ln_ref[2 * l, :]
        b = ln_ref[2 * l + 1, :]
        ln1x = _ln_seq(x, g, b)                               # (B, T, C) f32
        a2d = ln1x.reshape(BT, C).astype(jnp.bfloat16)

        b1 = ffnb_ref[l, : 4 * C]                             # (4C,) f32
        b2 = ffnb_ref[l, 4 * C:]                              # (C,)  f32
        h1 = jnp.maximum(
            jnp.dot(a2d, w1_ref[l], preferred_element_type=jnp.float32) + b1,
            0.0)                                              # (B*T, 4C) f32
        y = jnp.dot(h1.astype(jnp.bfloat16), w2_ref[l],
                    preferred_element_type=jnp.float32) + b2  # (B*T, C) f32
        x = y.reshape(B, T, C) + x                            # residual

    # ---- final LayerNorm + lm_head (full T kept: forward returns all positions) ----
    lnf = _ln_seq(x, ln_ref[2 * N_LAYERS, :], ln_ref[2 * N_LAYERS + 1, :])
    lm_b = ln_ref[2 * N_LAYERS + 2, :VPAD]                    # (VPAD,) f32
    logits = jnp.dot(lnf.reshape(BT, C).astype(jnp.bfloat16), lm_w_ref[...],
                     preferred_element_type=jnp.float32) + lm_b
    out_ref[...] = logits.reshape(B, T, VPAD)                 # lane-dense 128-wide store


# --------------------------------- wrapper -------------------------------------

def _full_spec(shape):
    nd = len(shape)
    # index_map receives (grid index, *scalar_prefetch_refs)
    return pl.BlockSpec(shape, lambda i, idx_ref, _nd=nd: (0,) * _nd)


def _cost_estimate(B, T):
    m = B * T
    flops = (N_LAYERS * 2 * (2 * m * N_EMBD * 4 * N_EMBD)    # two FFN matmuls / layer
             + 2 * m * N_EMBD * VPAD)                         # lm_head
    bytes_accessed = (N_LAYERS * 2 * (N_EMBD * 4 * N_EMBD) * 2   # bf16 FFN weights
                      + N_EMBD * VPAD * 2                        # bf16 lm_head weight
                      + 4 * VOCAB_PAD * N_EMBD                   # f32 embedding table
                      + 4 * (m + m * VPAD))                      # idx in / logits out
    return pl.CostEstimate(flops=flops,
                           transcendentals=(N_LAYERS + 1) * B * N_EMBD,
                           bytes_accessed=bytes_accessed)


@jax.jit
def gpt_forward(idx, params):
    B, T = idx.shape
    BT = B * T
    ins = (params['tok_emb'], params['ln_pack'], params['ffn_b'],
           params['w1'], params['w2'], params['lm_w'])

    grid_spec = pltpu.PrefetchScalarGridSpec(
        num_scalar_prefetch=1,                               # idx -> SMEM
        grid=(1,),
        in_specs=[_full_spec(a.shape) for a in ins],
        out_specs=pl.BlockSpec((B, T, VPAD), lambda i, idx_ref: (0, 0, 0)),
        scratch_shapes=[pltpu.VMEM((BT, N_EMBD), jnp.float32)],
    )
    logits_pad = pl.pallas_call(
        gpt_fused_kernel,
        out_shape=jax.ShapeDtypeStruct((B, T, VPAD), jnp.float32),
        grid_spec=grid_spec,
        compiler_params=pltpu.CompilerParams(dimension_semantics=("arbitrary",)),
        cost_estimate=_cost_estimate(B, T),
    )(idx.reshape(BT).astype(jnp.int32), *ins)
    return logits_pad[:, :, :VOCAB]                          # drop vocab padding; loss is None


# ------------------------------- parameters ------------------------------------

def init_params(key):
    std = 0.02
    k_tok, k_w1, k_w2, k_lm = jax.random.split(key, 4)

    def nrm(k, shape):
        return std * jax.random.normal(k, shape, jnp.float32)

    # embedding table, rows padded 65 -> 72 (padding rows never indexed)
    tok_emb = jnp.zeros((VOCAB_PAD, N_EMBD), jnp.float32)
    tok_emb = tok_emb.at[:VOCAB].set(nrm(k_tok, (VOCAB, N_EMBD)))

    # packed LayerNorm params + lm_head bias:
    # rows [2l, 2l+1] = (gamma, beta) of block l's ln1; rows [2L, 2L+1] = ln_f;
    # row [2L+2] = lm_head bias padded to C (only first VPAD lanes used).
    ln_pack = jnp.zeros((2 * N_LAYERS + 3, N_EMBD), jnp.float32)
    for l in range(N_LAYERS):
        ln_pack = ln_pack.at[2 * l].set(1.0)                 # gamma = 1, beta = 0
    ln_pack = ln_pack.at[2 * N_LAYERS].set(1.0)              # ln_f gamma = 1
    # ln_f beta, lm_head bias are zero (reference init)

    # packed FFN biases: [b1 (4C) | b2 (C)] per layer, zero at init
    ffn_b = jnp.zeros((N_LAYERS, 5 * N_EMBD), jnp.float32)

    # lm_head weight padded with zero columns 65..127 so padded logits are exactly 0
    lm_w = jnp.zeros((N_EMBD, VPAD), jnp.float32)
    lm_w = lm_w.at[:, :VOCAB].set(nrm(k_lm, (N_EMBD, VOCAB)))

    return {
        'tok_emb': tok_emb,
        'ln_pack': ln_pack,
        'ffn_b': ffn_b,
        'w1': nrm(k_w1, (N_LAYERS, N_EMBD, 4 * N_EMBD)).astype(jnp.bfloat16),
        'w2': nrm(k_w2, (N_LAYERS, 4 * N_EMBD, N_EMBD)).astype(jnp.bfloat16),
        'lm_w': lm_w.astype(jnp.bfloat16),
    }


if __name__ == "__main__":
    key = jax.random.PRNGKey(0)
    pkey, ikey = jax.random.split(key)
    params = init_params(pkey)

    B, T = 2, BLOCK_SIZE
    idx = jax.random.randint(ikey, (B, T), 0, VOCAB, dtype=jnp.int32)

    logits = gpt_forward(idx, params)
    logits = jax.block_until_ready(logits)

    assert logits.shape == (B, T, VOCAB), logits.shape
    assert bool(jnp.all(jnp.isfinite(logits)))
    print("KERNEL_OK")
</pallas_src>

<mosaic_0001>
module attributes {stable_mosaic.version = 11 : i64} {
  func.func @gpt_fused_kernel(%arg0: i32, %arg1: memref<16xi32, #tpu.memory_space<smem>>, %arg2: memref<72x256xf32, #tpu.memory_space<vmem>>, %arg3: memref<7x256xf32, #tpu.memory_space<vmem>>, %arg4: memref<2x1280xf32, #tpu.memory_space<vmem>>, %arg5: memref<2x256x1024xbf16, #tpu.memory_space<vmem>>, %arg6: memref<2x1024x256xbf16, #tpu.memory_space<vmem>>, %arg7: memref<256x128xbf16, #tpu.memory_space<vmem>>, %arg8: memref<2x8x128xf32, #tpu.memory_space<vmem>>, %arg9: memref<16x256xf32, #tpu.memory_space<vmem>>) attributes {dimension_semantics = [#tpu.dimension_semantics<arbitrary>], iteration_bounds = array<i64: 1>, scalar_prefetch = 1 : i64, scratch_operands = 1 : i64, tpu.core_type = #tpu.core_type<tc>, window_params = [{pipeline_mode = #tpu.pipeline_mode<synchronous>, transform_indices = @transform_0, window_bounds = array<i64: 72, 256>}, {pipeline_mode = #tpu.pipeline_mode<synchronous>, transform_indices = @transform_1, window_bounds = array<i64: 7, 256>}, {pipeline_mode = #tpu.pipeline_mode<synchronous>, transform_indices = @transform_2, window_bounds = array<i64: 2, 1280>}, {pipeline_mode = #tpu.pipeline_mode<synchronous>, transform_indices = @transform_3, window_bounds = array<i64: 2, 256, 1024>}, {pipeline_mode = #tpu.pipeline_mode<synchronous>, transform_indices = @transform_4, window_bounds = array<i64: 2, 1024, 256>}, {pipeline_mode = #tpu.pipeline_mode<synchronous>, transform_indices = @transform_5, window_bounds = array<i64: 256, 128>}, {pipeline_mode = #tpu.pipeline_mode<synchronous>, transform_indices = @transform_6, window_bounds = array<i64: 2, 8, 128>}]} {
    %c0 = arith.constant 0 : index
    %0 = memref.load %arg1[%c0] : memref<16xi32, #tpu.memory_space<smem>>
    %1 = arith.index_cast %0 : i32 to index
    %c0_0 = arith.constant 0 : index
    %2 = vector.load %arg2[%1, %c0_0] : memref<72x256xf32, #tpu.memory_space<vmem>>, vector<1x256xf32>
    %c0_1 = arith.constant 0 : index
    %c0_2 = arith.constant 0 : index
    %3 = vector.load %arg9[%c0_1, %c0_2] : memref<16x256xf32, #tpu.memory_space<vmem>>, vector<1x256xf32>
    tpu.vector_store %arg9[%c0_1, %c0_2], %2 {strides = array<i32>} : memref<16x256xf32, #tpu.memory_space<vmem>>, vector<1x256xf32>,
    %c1 = arith.constant 1 : index
    %4 = memref.load %arg1[%c1] : memref<16xi32, #tpu.memory_space<smem>>
    %5 = arith.index_cast %4 : i32 to index
    %c0_3 = arith.constant 0 : index
    %6 = vector.load %arg2[%5, %c0_3] : memref<72x256xf32, #tpu.memory_space<vmem>>, vector<1x256xf32>
    %c1_4 = arith.constant 1 : index
    %c0_5 = arith.constant 0 : index
    %7 = vector.load %arg9[%c1_4, %c0_5] : memref<16x256xf32, #tpu.memory_space<vmem>>, vector<1x256xf32>
    tpu.vector_store %arg9[%c1_4, %c0_5], %6 {strides = array<i32>} : memref<16x256xf32, #tpu.memory_space<vmem>>, vector<1x256xf32>,
    %c2 = arith.constant 2 : index
    %8 = memref.load %arg1[%c2] : memref<16xi32, #tpu.memory_space<smem>>
    %9 = arith.index_cast %8 : i32 to index
    %c0_6 = arith.constant 0 : index
    %10 = vector.load %arg2[%9, %c0_6] : memref<72x256xf32, #tpu.memory_space<vmem>>, vector<1x256xf32>
    %c2_7 = arith.constant 2 : index
    %c0_8 = arith.constant 0 : index
    %11 = vector.load %arg9[%c2_7, %c0_8] : memref<16x256xf32, #tpu.memory_space<vmem>>, vector<1x256xf32>
    tpu.vector_store %arg9[%c2_7, %c0_8], %10 {strides = array<i32>} : memref<16x256xf32, #tpu.memory_space<vmem>>, vector<1x256xf32>,
    %c3 = arith.constant 3 : index
    %12 = memref.load %arg1[%c3] : memref<16xi32, #tpu.memory_space<smem>>
    %13 = arith.index_cast %12 : i32 to index
    %c0_9 = arith.constant 0 : index
    %14 = vector.load %arg2[%13, %c0_9] : memref<72x256xf32, #tpu.memory_space<vmem>>, vector<1x256xf32>
    %c3_10 = arith.constant 3 : index
    %c0_11 = arith.constant 0 : index
    %15 = vector.load %arg9[%c3_10, %c0_11] : memref<16x256xf32, #tpu.memory_space<vmem>>, vector<1x256xf32>
    tpu.vector_store %arg9[%c3_10, %c0_11], %14 {strides = array<i32>} : memref<16x256xf32, #tpu.memory_space<vmem>>, vector<1x256xf32>,
    %c4 = arith.constant 4 : index
    %16 = memref.load %arg1[%c4] : memref<16xi32, #tpu.memory_space<smem>>
    %17 = arith.index_cast %16 : i32 to index
    %c0_12 = arith.constant 0 : index
    %18 = vector.load %arg2[%17, %c0_12] : memref<72x256xf32, #tpu.memory_space<vmem>>, vector<1x256xf32>
    %c4_13 = arith.constant 4 : index
    %c0_14 = arith.constant 0 : index
    %19 = vector.load %arg9[%c4_13, %c0_14] : memref<16x256xf32, #tpu.memory_space<vmem>>, vector<1x256xf32>
    tpu.vector_store %arg9[%c4_13, %c0_14], %18 {strides = array<i32>} : memref<16x256xf32, #tpu.memory_space<vmem>>, vector<1x256xf32>,
    %c5 = arith.constant 5 : index
    %20 = memref.load %arg1[%c5] : memref<16xi32, #tpu.memory_space<smem>>
    %21 = arith.index_cast %20 : i32 to index
    %c0_15 = arith.constant 0 : index
    %22 = vector.load %arg2[%21, %c0_15] : memref<72x256xf32, #tpu.memory_space<vmem>>, vector<1x256xf32>
    %c5_16 = arith.constant 5 : index
    %c0_17 = arith.constant 0 : index
    %23 = vector.load %arg9[%c5_16, %c0_17] : memref<16x256xf32, #tpu.memory_space<vmem>>, vector<1x256xf32>
    tpu.vector_store %arg9[%c5_16, %c0_17], %22 {strides = array<i32>} : memref<16x256xf32, #tpu.memory_space<vmem>>, vector<1x256xf32>,
    %c6 = arith.constant 6 : index
    %24 = memref.load %arg1[%c6] : memref<16xi32, #tpu.memory_space<smem>>
    %25 = arith.index_cast %24 : i32 to index
    %c0_18 = arith.constant 0 : index
    %26 = vector.load %arg2[%25, %c0_18] : memref<72x256xf32, #tpu.memory_space<vmem>>, vector<1x256xf32>
    %c6_19 = arith.constant 6 : index
    %c0_20 = arith.constant 0 : index
    %27 = vector.load %arg9[%c6_19, %c0_20] : memref<16x256xf32, #tpu.memory_space<vmem>>, vector<1x256xf32>
    tpu.vector_store %arg9[%c6_19, %c0_20], %26 {strides = array<i32>} : memref<16x256xf32, #tpu.memory_space<vmem>>, vector<1x256xf32>,
    %c7 = arith.constant 7 : index
    %28 = memref.load %arg1[%c7] : memref<16xi32, #tpu.memory_space<smem>>
    %29 = arith.index_cast %28 : i32 to index
    %c0_21 = arith.constant 0 : index
    %30 = vector.load %arg2[%29, %c0_21] : memref<72x256xf32, #tpu.memory_space<vmem>>, vector<1x256xf32>
    %c7_22 = arith.constant 7 : index
    %c0_23 = arith.constant 0 : index
    %31 = vector.load %arg9[%c7_22, %c0_23] : memref<16x256xf32, #tpu.memory_space<vmem>>, vector<1x256xf32>
    tpu.vector_store %arg9[%c7_22, %c0_23], %30 {strides = array<i32>} : memref<16x256xf32, #tpu.memory_space<vmem>>, vector<1x256xf32>,
    %c8 = arith.constant 8 : index
    %32 = memref.load %arg1[%c8] : memref<16xi32, #tpu.memory_space<smem>>
    %33 = arith.index_cast %32 : i32 to index
    %c0_24 = arith.constant 0 : index
    %34 = vector.load %arg2[%33, %c0_24] : memref<72x256xf32, #tpu.memory_space<vmem>>, vector<1x256xf32>
    %c8_25 = arith.constant 8 : index
    %c0_26 = arith.constant 0 : index
    %35 = vector.load %arg9[%c8_25, %c0_26] : memref<16x256xf32, #tpu.memory_space<vmem>>, vector<1x256xf32>
    tpu.vector_store %arg9[%c8_25, %c0_26], %34 {strides = array<i32>} : memref<16x256xf32, #tpu.memory_space<vmem>>, vector<1x256xf32>,
    %c9 = arith.constant 9 : index
    %36 = memref.load %arg1[%c9] : memref<16xi32, #tpu.memory_space<smem>>
    %37 = arith.index_cast %36 : i32 to index
    %c0_27 = arith.constant 0 : index
    %38 = vector.load %arg2[%37, %c0_27] : memref<72x256xf32, #tpu.memory_space<vmem>>, vector<1x256xf32>
    %c9_28 = arith.constant 9 : index
    %c0_29 = arith.constant 0 : index
    %39 = vector.load %arg9[%c9_28, %c0_29] : memref<16x256xf32, #tpu.memory_space<vmem>>, vector<1x256xf32>
    tpu.vector_store %arg9[%c9_28, %c0_29], %38 {strides = array<i32>} : memref<16x256xf32, #tpu.memory_space<vmem>>, vector<1x256xf32>,
    %c10 = arith.constant 10 : index
    %40 = memref.load %arg1[%c10] : memref<16xi32, #tpu.memory_space<smem>>
    %41 = arith.index_cast %40 : i32 to index
    %c0_30 = arith.constant 0 : index
    %42 = vector.load %arg2[%41, %c0_30] : memref<72x256xf32, #tpu.memory_space<vmem>>, vector<1x256xf32>
    %c10_31 = arith.constant 10 : index
    %c0_32 = arith.constant 0 : index
    %43 = vector.load %arg9[%c10_31, %c0_32] : memref<16x256xf32, #tpu.memory_space<vmem>>, vector<1x256xf32>
    tpu.vector_store %arg9[%c10_31, %c0_32], %42 {strides = array<i32>} : memref<16x256xf32, #tpu.memory_space<vmem>>, vector<1x256xf32>,
    %c11 = arith.constant 11 : index
    %44 = memref.load %arg1[%c11] : memref<16xi32, #tpu.memory_space<smem>>
    %45 = arith.index_cast %44 : i32 to index
    %c0_33 = arith.constant 0 : index
    %46 = vector.load %arg2[%45, %c0_33] : memref<72x256xf32, #tpu.memory_space<vmem>>, vector<1x256xf32>
    %c11_34 = arith.constant 11 : index
    %c0_35 = arith.constant 0 : index
    %47 = vector.load %arg9[%c11_34, %c0_35] : memref<16x256xf32, #tpu.memory_space<vmem>>, vector<1x256xf32>
    tpu.vector_store %arg9[%c11_34, %c0_35], %46 {strides = array<i32>} : memref<16x256xf32, #tpu.memory_space<vmem>>, vector<1x256xf32>,
    %c12 = arith.constant 12 : index
    %48 = memref.load %arg1[%c12] : memref<16xi32, #tpu.memory_space<smem>>
    %49 = arith.index_cast %48 : i32 to index
    %c0_36 = arith.constant 0 : index
    %50 = vector.load %arg2[%49, %c0_36] : memref<72x256xf32, #tpu.memory_space<vmem>>, vector<1x256xf32>
    %c12_37 = arith.constant 12 : index
    %c0_38 = arith.constant 0 : index
    %51 = vector.load %arg9[%c12_37, %c0_38] : memref<16x256xf32, #tpu.memory_space<vmem>>, vector<1x256xf32>
    tpu.vector_store %arg9[%c12_37, %c0_38], %50 {strides = array<i32>} : memref<16x256xf32, #tpu.memory_space<vmem>>, vector<1x256xf32>,
    %c13 = arith.constant 13 : index
    %52 = memref.load %arg1[%c13] : memref<16xi32, #tpu.memory_space<smem>>
    %53 = arith.index_cast %52 : i32 to index
    %c0_39 = arith.constant 0 : index
    %54 = vector.load %arg2[%53, %c0_39] : memref<72x256xf32, #tpu.memory_space<vmem>>, vector<1x256xf32>
    %c13_40 = arith.constant 13 : index
    %c0_41 = arith.constant 0 : index
    %55 = vector.load %arg9[%c13_40, %c0_41] : memref<16x256xf32, #tpu.memory_space<vmem>>, vector<1x256xf32>
    tpu.vector_store %arg9[%c13_40, %c0_41], %54 {strides = array<i32>} : memref<16x256xf32, #tpu.memory_space<vmem>>, vector<1x256xf32>,
    %c14 = arith.constant 14 : index
    %56 = memref.load %arg1[%c14] : memref<16xi32, #tpu.memory_space<smem>>
    %57 = arith.index_cast %56 : i32 to index
    %c0_42 = arith.constant 0 : index
    %58 = vector.load %arg2[%57, %c0_42] : memref<72x256xf32, #tpu.memory_space<vmem>>, vector<1x256xf32>
    %c14_43 = arith.constant 14 : index
    %c0_44 = arith.constant 0 : index
    %59 = vector.load %arg9[%c14_43, %c0_44] : memref<16x256xf32, #tpu.memory_space<vmem>>, vector<1x256xf32>
    tpu.vector_store %arg9[%c14_43, %c0_44], %58 {strides = array<i32>} : memref<16x256xf32, #tpu.memory_space<vmem>>, vector<1x256xf32>,
    %c15 = arith.constant 15 : index
    %60 = memref.load %arg1[%c15] : memref<16xi32, #tpu.memory_space<smem>>
    %61 = arith.index_cast %60 : i32 to index
    %c0_45 = arith.constant 0 : index
    %62 = vector.load %arg2[%61, %c0_45] : memref<72x256xf32, #tpu.memory_space<vmem>>, vector<1x256xf32>
    %c15_46 = arith.constant 15 : index
    %c0_47 = arith.constant 0 : index
    %63 = vector.load %arg9[%c15_46, %c0_47] : memref<16x256xf32, #tpu.memory_space<vmem>>, vector<1x256xf32>
    tpu.vector_store %arg9[%c15_46, %c0_47], %62 {strides = array<i32>} : memref<16x256xf32, #tpu.memory_space<vmem>>, vector<1x256xf32>,
    %c0_48 = arith.constant 0 : index
    %c0_49 = arith.constant 0 : index
    %64 = vector.load %arg9[%c0_48, %c0_49] : memref<16x256xf32, #tpu.memory_space<vmem>>, vector<16x256xf32>
    %65 = vector.shape_cast %64 : vector<16x256xf32> to vector<2x8x256xf32>
    %c0_50 = arith.constant 0 : index
    %c0_51 = arith.constant 0 : index
    %66 = vector.load %arg3[%c0_50, %c0_51] : memref<7x256xf32, #tpu.memory_space<vmem>>, vector<1x256xf32>
    %67 = vector.shape_cast %66 : vector<1x256xf32> to vector<256xf32>
    %c1_52 = arith.constant 1 : index
    %c0_53 = arith.constant 0 : index
    %68 = vector.load %arg3[%c1_52, %c0_53] : memref<7x256xf32, #tpu.memory_space<vmem>>, vector<1x256xf32>
    %69 = vector.shape_cast %68 : vector<1x256xf32> to vector<256xf32>
    %cst = arith.constant dense<0.000000e+00> : vector<2x256xf32>
    %70 = vector.multi_reduction <add>, %65, %cst [1] : vector<2x8x256xf32> to vector<2x256xf32>
    %71 = vector.shape_cast %70 : vector<2x256xf32> to vector<2x1x256xf32>
    %cst_54 = arith.constant 8.000000e+00 : f32
    %72 = vector.broadcast %cst_54 : f32 to vector<2x1x256xf32>
    %73 = arith.divf %71, %72 : vector<2x1x256xf32>
    %74 = vector.broadcast %73 : vector<2x1x256xf32> to vector<2x8x256xf32>
    %75 = arith.subf %65, %74 : vector<2x8x256xf32>
    %76 = arith.mulf %75, %75 : vector<2x8x256xf32>
    %cst_55 = arith.constant dense<0.000000e+00> : vector<2x256xf32>
    %77 = vector.multi_reduction <add>, %76, %cst_55 [1] : vector<2x8x256xf32> to vector<2x256xf32>
    %78 = vector.shape_cast %77 : vector<2x256xf32> to vector<2x1x256xf32>
    %cst_56 = arith.constant 7.000000e+00 : f32
    %79 = vector.broadcast %cst_56 : f32 to vector<2x1x256xf32>
    %80 = arith.divf %78, %79 : vector<2x1x256xf32>
    %81 = vector.broadcast %73 : vector<2x1x256xf32> to vector<2x8x256xf32>
    %82 = arith.subf %65, %81 : vector<2x8x256xf32>
    %cst_57 = arith.constant 9.99999974E-6 : f32
    %83 = vector.broadcast %cst_57 : f32 to vector<2x1x256xf32>
    %84 = arith.addf %80, %83 : vector<2x1x256xf32>
    %85 = math.rsqrt %84 : vector<2x1x256xf32>
    %86 = vector.broadcast %85 : vector<2x1x256xf32> to vector<2x8x256xf32>
    %87 = arith.mulf %82, %86 : vector<2x8x256xf32>
    %88 = vector.shape_cast %67 : vector<256xf32> to vector<1x1x256xf32>
    %89 = vector.broadcast %88 : vector<1x1x256xf32> to vector<2x8x256xf32>
    %90 = arith.mulf %89, %87 : vector<2x8x256xf32>
    %91 = vector.shape_cast %69 : vector<256xf32> to vector<1x1x256xf32>
    %92 = vector.broadcast %91 : vector<1x1x256xf32> to vector<2x8x256xf32>
    %93 = arith.addf %90, %92 : vector<2x8x256xf32>
    %94 = vector.shape_cast %93 : vector<2x8x256xf32> to vector<16x256xf32>
    %95 = arith.truncf %94 : vector<16x256xf32> to vector<16x256xbf16>
    %c0_58 = arith.constant 0 : index
    %c0_59 = arith.constant 0 : index
    %96 = vector.load %arg4[%c0_58, %c0_59] : memref<2x1280xf32, #tpu.memory_space<vmem>>, vector<1x1024xf32>
    %97 = vector.shape_cast %96 : vector<1x1024xf32> to vector<1024xf32>
    %c0_60 = arith.constant 0 : index
    %c1024 = arith.constant 1024 : index
    %98 = vector.load %arg4[%c0_60, %c1024] : memref<2x1280xf32, #tpu.memory_space<vmem>>, vector<1x256xf32>
    %99 = vector.shape_cast %98 : vector<1x256xf32> to vector<256xf32>
    %c0_61 = arith.constant 0 : index
    %c0_62 = arith.constant 0 : index
    %c0_63 = arith.constant 0 : index
    %100 = vector.load %arg5[%c0_61, %c0_62, %c0_63] : memref<2x256x1024xbf16, #tpu.memory_space<vmem>>, vector<1x256x1024xbf16>
    %101 = vector.shape_cast %100 : vector<1x256x1024xbf16> to vector<256x1024xbf16>
    %cst_64 = arith.constant dense<0.000000e+00> : vector<16x1024xf32>
    %102 = tpu.matmul %95, %101, %cst_64 {dimension_numbers = #tpu.dot_dimension_numbers<[1], [0], [0], [1], [0, 0, 1, 1], [], []>} : vector<16x256xbf16>, vector<256x1024xbf16>, vector<16x1024xf32> -> vector<16x1024xf32>
    %103 = vector.shape_cast %97 : vector<1024xf32> to vector<1x1024xf32>
    %104 = vector.broadcast %103 : vector<1x1024xf32> to vector<16x1024xf32>
    %105 = arith.addf %102, %104 : vector<16x1024xf32>
    %cst_65 = arith.constant 0.000000e+00 : f32
    %106 = vector.broadcast %cst_65 : f32 to vector<16x1024xf32>
    %107 = arith.maximumf %105, %106 : vector<16x1024xf32>
    %108 = arith.truncf %107 : vector<16x1024xf32> to vector<16x1024xbf16>
    %c0_66 = arith.constant 0 : index
    %c0_67 = arith.constant 0 : index
    %c0_68 = arith.constant 0 : index
    %109 = vector.load %arg6[%c0_66, %c0_67, %c0_68] : memref<2x1024x256xbf16, #tpu.memory_space<vmem>>, vector<1x1024x256xbf16>
    %110 = vector.shape_cast %109 : vector<1x1024x256xbf16> to vector<1024x256xbf16>
    %cst_69 = arith.constant dense<0.000000e+00> : vector<16x256xf32>
    %111 = tpu.matmul %108, %110, %cst_69 {dimension_numbers = #tpu.dot_dimension_numbers<[1], [0], [0], [1], [0, 0, 1, 1], [], []>} : vector<16x1024xbf16>, vector<1024x256xbf16>, vector<16x256xf32> -> vector<16x256xf32>
    %112 = vector.shape_cast %99 : vector<256xf32> to vector<1x256xf32>
    %113 = vector.broadcast %112 : vector<1x256xf32> to vector<16x256xf32>
    %114 = arith.addf %111, %113 : vector<16x256xf32>
    %115 = vector.shape_cast %114 : vector<16x256xf32> to vector<2x8x256xf32>
    %116 = arith.addf %115, %65 : vector<2x8x256xf32>
    %c2_70 = arith.constant 2 : index
    %c0_71 = arith.constant 0 : index
    %117 = vector.load %arg3[%c2_70, %c0_71] : memref<7x256xf32, #tpu.memory_space<vmem>>, vector<1x256xf32>
    %118 = vector.shape_cast %117 : vector<1x256xf32> to vector<256xf32>
    %c3_72 = arith.constant 3 : index
    %c0_73 = arith.constant 0 : index
    %119 = vector.load %arg3[%c3_72, %c0_73] : memref<7x256xf32, #tpu.memory_space<vmem>>, vector<1x256xf32>
    %120 = vector.shape_cast %119 : vector<1x256xf32> to vector<256xf32>
    %cst_74 = arith.constant dense<0.000000e+00> : vector<2x256xf32>
    %121 = vector.multi_reduction <add>, %116, %cst_74 [1] : vector<2x8x256xf32> to vector<2x256xf32>
    %122 = vector.shape_cast %121 : vector<2x256xf32> to vector<2x1x256xf32>
    %cst_75 = arith.constant 8.000000e+00 : f32
    %123 = vector.broadcast %cst_75 : f32 to vector<2x1x256xf32>
    %124 = arith.divf %122, %123 : vector<2x1x256xf32>
    %125 = vector.broadcast %124 : vector<2x1x256xf32> to vector<2x8x256xf32>
    %126 = arith.subf %116, %125 : vector<2x8x256xf32>
    %127 = arith.mulf %126, %126 : vector<2x8x256xf32>
    %cst_76 = arith.constant dense<0.000000e+00> : vector<2x256xf32>
    %128 = vector.multi_reduction <add>, %127, %cst_76 [1] : vector<2x8x256xf32> to vector<2x256xf32>
    %129 = vector.shape_cast %128 : vector<2x256xf32> to vector<2x1x256xf32>
    %cst_77 = arith.constant 7.000000e+00 : f32
    %130 = vector.broadcast %cst_77 : f32 to vector<2x1x256xf32>
    %131 = arith.divf %129, %130 : vector<2x1x256xf32>
    %132 = vector.broadcast %124 : vector<2x1x256xf32> to vector<2x8x256xf32>
    %133 = arith.subf %116, %132 : vector<2x8x256xf32>
    %cst_78 = arith.constant 9.99999974E-6 : f32
    %134 = vector.broadcast %cst_78 : f32 to vector<2x1x256xf32>
    %135 = arith.addf %131, %134 : vector<2x1x256xf32>
    %136 = math.rsqrt %135 : vector<2x1x256xf32>
    %137 = vector.broadcast %136 : vector<2x1x256xf32> to vector<2x8x256xf32>
    %138 = arith.mulf %133, %137 : vector<2x8x256xf32>
    %139 = vector.shape_cast %118 : vector<256xf32> to vector<1x1x256xf32>
    %140 = vector.broadcast %139 : vector<1x1x256xf32> to vector<2x8x256xf32>
    %141 = arith.mulf %140, %138 : vector<2x8x256xf32>
    %142 = vector.shape_cast %120 : vector<256xf32> to vector<1x1x256xf32>
    %143 = vector.broadcast %142 : vector<1x1x256xf32> to vector<2x8x256xf32>
    %144 = arith.addf %141, %143 : vector<2x8x256xf32>
    %145 = vector.shape_cast %144 : vector<2x8x256xf32> to vector<16x256xf32>
    %146 = arith.truncf %145 : vector<16x256xf32> to vector<16x256xbf16>
    %c1_79 = arith.constant 1 : index
    %c0_80 = arith.constant 0 : index
    %147 = vector.load %arg4[%c1_79, %c0_80] : memref<2x1280xf32, #tpu.memory_space<vmem>>, vector<1x1024xf32>
    %148 = vector.shape_cast %147 : vector<1x1024xf32> to vector<1024xf32>
    %c1_81 = arith.constant 1 : index
    %c1024_82 = arith.constant 1024 : index
    %149 = vector.load %arg4[%c1_81, %c1024_82] : memref<2x1280xf32, #tpu.memory_space<vmem>>, vector<1x256xf32>
    %150 = vector.shape_cast %149 : vector<1x256xf32> to vector<256xf32>
    %c1_83 = arith.constant 1 : index
    %c0_84 = arith.constant 0 : index
    %c0_85 = arith.constant 0 : index
    %151 = vector.load %arg5[%c1_83, %c0_84, %c0_85] : memref<2x256x1024xbf16, #tpu.memory_space<vmem>>, vector<1x256x1024xbf16>
    %152 = vector.shape_cast %151 : vector<1x256x1024xbf16> to vector<256x1024xbf16>
    %cst_86 = arith.constant dense<0.000000e+00> : vector<16x1024xf32>
    %153 = tpu.matmul %146, %152, %cst_86 {dimension_numbers = #tpu.dot_dimension_numbers<[1], [0], [0], [1], [0, 0, 1, 1], [], []>} : vector<16x256xbf16>, vector<256x1024xbf16>, vector<16x1024xf32> -> vector<16x1024xf32>
    %154 = vector.shape_cast %148 : vector<1024xf32> to vector<1x1024xf32>
    %155 = vector.broadcast %154 : vector<1x1024xf32> to vector<16x1024xf32>
    %156 = arith.addf %153, %155 : vector<16x1024xf32>
    %cst_87 = arith.constant 0.000000e+00 : f32
    %157 = vector.broadcast %cst_87 : f32 to vector<16x1024xf32>
    %158 = arith.maximumf %156, %157 : vector<16x1024xf32>
    %159 = arith.truncf %158 : vector<16x1024xf32> to vector<16x1024xbf16>
    %c1_88 = arith.constant 1 : index
    %c0_89 = arith.constant 0 : index
    %c0_90 = arith.constant 0 : index
    %160 = vector.load %arg6[%c1_88, %c0_89, %c0_90] : memref<2x1024x256xbf16, #tpu.memory_space<vmem>>, vector<1x1024x256xbf16>
    %161 = vector.shape_cast %160 : vector<1x1024x256xbf16> to vector<1024x256xbf16>
    %cst_91 = arith.constant dense<0.000000e+00> : vector<16x256xf32>
    %162 = tpu.matmul %159, %161, %cst_91 {dimension_numbers = #tpu.dot_dimension_numbers<[1], [0], [0], [1], [0, 0, 1, 1], [], []>} : vector<16x1024xbf16>, vector<1024x256xbf16>, vector<16x256xf32> -> vector<16x256xf32>
    %163 = vector.shape_cast %150 : vector<256xf32> to vector<1x256xf32>
    %164 = vector.broadcast %163 : vector<1x256xf32> to vector<16x256xf32>
    %165 = arith.addf %162, %164 : vector<16x256xf32>
    %166 = vector.shape_cast %165 : vector<16x256xf32> to vector<2x8x256xf32>
    %167 = arith.addf %166, %116 : vector<2x8x256xf32>
    %c4_92 = arith.constant 4 : index
    %c0_93 = arith.constant 0 : index
    %168 = vector.load %arg3[%c4_92, %c0_93] : memref<7x256xf32, #tpu.memory_space<vmem>>, vector<1x256xf32>
    %169 = vector.shape_cast %168 : vector<1x256xf32> to vector<256xf32>
    %c5_94 = arith.constant 5 : index
    %c0_95 = arith.constant 0 : index
    %170 = vector.load %arg3[%c5_94, %c0_95] : memref<7x256xf32, #tpu.memory_space<vmem>>, vector<1x256xf32>
    %171 = vector.shape_cast %170 : vector<1x256xf32> to vector<256xf32>
    %cst_96 = arith.constant dense<0.000000e+00> : vector<2x256xf32>
    %172 = vector.multi_reduction <add>, %167, %cst_96 [1] : vector<2x8x256xf32> to vector<2x256xf32>
    %173 = vector.shape_cast %172 : vector<2x256xf32> to vector<2x1x256xf32>
    %cst_97 = arith.constant 8.000000e+00 : f32
    %174 = vector.broadcast %cst_97 : f32 to vector<2x1x256xf32>
    %175 = arith.divf %173, %174 : vector<2x1x256xf32>
    %176 = vector.broadcast %175 : vector<2x1x256xf32> to vector<2x8x256xf32>
    %177 = arith.subf %167, %176 : vector<2x8x256xf32>
    %178 = arith.mulf %177, %177 : vector<2x8x256xf32>
    %cst_98 = arith.constant dense<0.000000e+00> : vector<2x256xf32>
    %179 = vector.multi_reduction <add>, %178, %cst_98 [1] : vector<2x8x256xf32> to vector<2x256xf32>
    %180 = vector.shape_cast %179 : vector<2x256xf32> to vector<2x1x256xf32>
    %cst_99 = arith.constant 7.000000e+00 : f32
    %181 = vector.broadcast %cst_99 : f32 to vector<2x1x256xf32>
    %182 = arith.divf %180, %181 : vector<2x1x256xf32>
    %183 = vector.broadcast %175 : vector<2x1x256xf32> to vector<2x8x256xf32>
    %184 = arith.subf %167, %183 : vector<2x8x256xf32>
    %cst_100 = arith.constant 9.99999974E-6 : f32
    %185 = vector.broadcast %cst_100 : f32 to vector<2x1x256xf32>
    %186 = arith.addf %182, %185 : vector<2x1x256xf32>
    %187 = math.rsqrt %186 : vector<2x1x256xf32>
    %188 = vector.broadcast %187 : vector<2x1x256xf32> to vector<2x8x256xf32>
    %189 = arith.mulf %184, %188 : vector<2x8x256xf32>
    %190 = vector.shape_cast %169 : vector<256xf32> to vector<1x1x256xf32>
    %191 = vector.broadcast %190 : vector<1x1x256xf32> to vector<2x8x256xf32>
    %192 = arith.mulf %191, %189 : vector<2x8x256xf32>
    %193 = vector.shape_cast %171 : vector<256xf32> to vector<1x1x256xf32>
    %194 = vector.broadcast %193 : vector<1x1x256xf32> to vector<2x8x256xf32>
    %195 = arith.addf %192, %194 : vector<2x8x256xf32>
    %c6_101 = arith.constant 6 : index
    %c0_102 = arith.constant 0 : index
    %196 = vector.load %arg3[%c6_101, %c0_102] : memref<7x256xf32, #tpu.memory_space<vmem>>, vector<1x128xf32>
    %197 = vector.shape_cast %196 : vector<1x128xf32> to vector<128xf32>
    %198 = vector.shape_cast %195 : vector<2x8x256xf32> to vector<16x256xf32>
    %199 = arith.truncf %198 : vector<16x256xf32> to vector<16x256xbf16>
    %c0_103 = arith.constant 0 : index
    %c0_104 = arith.constant 0 : index
    %200 = vector.load %arg7[%c0_103, %c0_104] : memref<256x128xbf16, #tpu.memory_space<vmem>>, vector<256x128xbf16>
    %cst_105 = arith.constant dense<0.000000e+00> : vector<16x128xf32>
    %201 = tpu.matmul %199, %200, %cst_105 {dimension_numbers = #tpu.dot_dimension_numbers<[1], [0], [0], [1], [0, 0, 1, 1], [], []>} : vector<16x256xbf16>, vector<256x128xbf16>, vector<16x128xf32> -> vector<16x128xf32>
    %202 = vector.shape_cast %197 : vector<128xf32> to vector<1x128xf32>
    %203 = vector.broadcast %202 : vector<1x128xf32> to vector<16x128xf32>
    %204 = arith.addf %201, %203 : vector<16x128xf32>
    %205 = vector.shape_cast %204 : vector<16x128xf32> to vector<2x8x128xf32>
    %c0_106 = arith.constant 0 : index
    %c0_107 = arith.constant 0 : index
    %c0_108 = arith.constant 0 : index
    %206 = vector.load %arg8[%c0_106, %c0_107, %c0_108] : memref<2x8x128xf32, #tpu.memory_space<vmem>>, vector<2x8x128xf32>
    tpu.vector_store %arg8[%c0_106, %c0_107, %c0_108], %205 {strides = array<i32>} : memref<2x8x128xf32, #tpu.memory_space<vmem>>, vector<2x8x128xf32>,
    return
  }
  func.func @transform_0(%arg0: i32, %arg1: memref<16xi32, #tpu.memory_space<smem>>) -> (i32, i32) {
    %c0_i32 = arith.constant 0 : i32
    %c0_i32_0 = arith.constant 0 : i32
    %c0_i32_1 = arith.constant 0 : i32
    return %c0_i32, %c0_i32_0 : i32, i32
  }
  func.func @transform_1(%arg0: i32, %arg1: memref<16xi32, #tpu.memory_space<smem>>) -> (i32, i32) {
    %c0_i32 = arith.constant 0 : i32
    %c0_i32_0 = arith.constant 0 : i32
    %c0_i32_1 = arith.constant 0 : i32
    return %c0_i32, %c0_i32_0 : i32, i32
  }
  func.func @transform_2(%arg0: i32, %arg1: memref<16xi32, #tpu.memory_space<smem>>) -> (i32, i32) {
    %c0_i32 = arith.constant 0 : i32
    %c0_i32_0 = arith.constant 0 : i32
    %c0_i32_1 = arith.constant 0 : i32
    return %c0_i32, %c0_i32_0 : i32, i32
  }
  func.func @transform_3(%arg0: i32, %arg1: memref<16xi32, #tpu.memory_space<smem>>) -> (i32, i32, i32) {
    %c0_i32 = arith.constant 0 : i32
    %c0_i32_0 = arith.constant 0 : i32
    %c0_i32_1 = arith.constant 0 : i32
    %c0_i32_2 = arith.constant 0 : i32
    return %c0_i32, %c0_i32_0, %c0_i32_1 : i32, i32, i32
  }
  func.func @transform_4(%arg0: i32, %arg1: memref<16xi32, #tpu.memory_space<smem>>) -> (i32, i32, i32) {
    %c0_i32 = arith.constant 0 : i32
    %c0_i32_0 = arith.constant 0 : i32
    %c0_i32_1 = arith.constant 0 : i32
    %c0_i32_2 = arith.constant 0 : i32
    return %c0_i32, %c0_i32_0, %c0_i32_1 : i32, i32, i32
  }
  func.func @transform_5(%arg0: i32, %arg1: memref<16xi32, #tpu.memory_space<smem>>) -> (i32, i32) {
    %c0_i32 = arith.constant 0 : i32
    %c0_i32_0 = arith.constant 0 : i32
    %c0_i32_1 = arith.constant 0 : i32
    return %c0_i32, %c0_i32_0 : i32, i32
  }
  func.func @transform_6(%arg0: i32, %arg1: memref<16xi32, #tpu.memory_space<smem>>) -> (i32, i32, i32) {
    %c0_i32 = arith.constant 0 : i32
    %c0_i32_0 = arith.constant 0 : i32
    %c0_i32_1 = arith.constant 0 : i32
    %c0_i32_2 = arith.constant 0 : i32
    return %c0_i32, %c0_i32_0, %c0_i32_1 : i32, i32, i32
  }
}

</mosaic_0001>

<bundles_post_ra>
// kernel: gpt_forward.1
= control target key start
LH: loop header
LB: loop body
LE: loop exit
PB: predicated region body
PF: predicated region fallthrough
CT: control target
= control target key end

     0   :  { %s6466_s0 = inlined_call_operand.vmem [shape: s32[16], index: 0, kind: input, shape index: {}]   ;;  %s6467_s1 = inlined_call_operand.hbm [shape: f32[72,256], index: 1, kind: input, shape index: {}]   ;;  %s6468_s2 = inlined_call_operand.hbm [shape: f32[7,256], index: 2, kind: input, shape index: {}]   ;;  %s6469_s3 = inlined_call_operand.hbm [shape: f32[2,1280], index: 3, kind: input, shape index: {}]   ;;  %s6470_s4 = inlined_call_operand.hbm [shape: bf16[2,256,1024], index: 4, kind: input, shape index: {}]   ;;  %s6471_s5 = inlined_call_operand.hbm [shape: bf16[2,1024,256], index: 5, kind: input, shape index: {}]   ;;  %s6472_s6 = inlined_call_operand.hbm [shape: bf16[256,128], index: 6, kind: input, shape index: {}]   ;;  %s6473_s7 = inlined_call_operand.hbm [shape: f32[2,8,128], index: 7, kind: output, shape index: {}]  }
   0x1   :  { %s12_s26 = sshll.u32 %s6466_s0, 4  ;;  %s13_s26 = int_to_ptr.vmem [resolvable:$true] %s12_s26 }
   0x2   :  { %s5888_s27 = scalar_lea.vmem %s13_s26, 16  ;;  %p5893_p1 = scmp.lt.s32.totalorder %s13_s26, %s13_s26 }
   0x3   :  { %p5889_p0 = scmp.ne.s32.totalorder %s13_s26, %s5888_s27  ;;  %p5894_p2 = scmp.lt.s32.totalorder %s5888_s27, %s5888_s27 }
   0x5   :  { %p5895_p3 = por %p5894_p2, %p5893_p1 }
   0x7   :  { %p5896_p4 = pnand %p5895_p3, %p5889_p0 }
   0x9   :  { %5899 = shalt.err (!%p5896_p4)  }
   0xa   :  { %s6052_s28 = smov [#allocation4]  }
   0xb   :  { %15 = dma.vmem_to_smem %s13_s26, 16, %s6052_s28, [#allocation3] }
   0xc   :  { %6040 = dma.done.wait [#allocation3], 16 }
   0xd   :  { %6041 = vsyncadd [#allocation3], 4294967280 }
   0xe   :  { %17 = sfence }
   0xf   :  { %18 = vsyncpa [#allocation6], 0 }
  0x10   :  { %19 = vsyncpa [#allocation9], 0 }
  0x11   :  { %20 = vsyncpa [#allocation12], 0 }
  0x12   :  { %21 = vsyncpa [#allocation15], 0 }
  0x13   :  { %22 = vsyncpa [#allocation7], 0  ;;  %s6053_s29 = smov [#allocation8]   ;;  %s6054_s30 = smov [#allocation11]  }
  0x14   :  { %s41_s0 = sshll.u32 %s6053_s29, 4  ;;  %s60_s8 = sshll.u32 %s6054_s30, 4  ;;  %s42_s0 = int_to_ptr.vmem [resolvable:$true] %s41_s0  ;;  %s61_s8 = int_to_ptr.vmem [resolvable:$true] %s60_s8 }
  0x15   :  { %s5908_s9 = scalar_lea.vmem %s42_s0, 256  ;;  %p5913_p6 = scmp.lt.s32.totalorder %s42_s0, %s42_s0 }
  0x16   :  { %p5909_p5 = scmp.ne.s32.totalorder %s42_s0, %s5908_s9  ;;  %p5914_p7 = scmp.lt.s32.totalorder %s5908_s9, %s5908_s9 }
  0x18   :  { %p5915_p8 = por %p5914_p7, %p5913_p6 }
  0x1a   :  { %p5916_p9 = pnand %p5915_p8, %p5909_p5 }
  0x1c   :  { %5919 = shalt.err (!%p5916_p9)
}
  0x1d   :  { %44 = dma.hbm_to_vmem [thread:$0]  %s6468_s2, 256, %s42_s0, [#allocation9]  }
  0x1e   :  { %s5928_s12 = scalar_lea.vmem %s61_s8, 32768  ;;  %p5933_p11 = scmp.lt.s32.totalorder %s61_s8, %s61_s8 }
  0x1f   :  { %p5929_p10 = scmp.ne.s32.totalorder %s61_s8, %s5928_s12  ;;  %p5934_p12 = scmp.lt.s32.totalorder %s5928_s12, %s5928_s12 }
  0x21   :  { %p5935_p13 = por %p5934_p12, %p5933_p11 }
  0x23   :  { %p5936_p0 = pnand %p5935_p13, %p5929_p10 }
  0x25   :  { %5939 = shalt.err (!%p5936_p0)
}
  0x26   :  { %s6055_s13 = smov 512   ;;  %s6056_s14 = smov 32  }
  0x27   :  { %66 = dma.hbm_to_vmem [thread:$0]  %s6470_s4, 32768, %s61_s8, [#allocation12], %s6055_s13, %s6055_s13, %s6056_s14  }
  0x28   :  { %s6057_s17 = smov [#allocation5]  }
  0x29   :  { %s28_s18 = sshll.u32 %s6057_s17, 4  ;;  %s29_s18 = int_to_ptr.vmem [resolvable:$true] %s28_s18 }
  0x2a   :  { %s5948_s19 = scalar_lea.vmem %s29_s18, 2304  ;;  %p5953_p2 = scmp.lt.s32.totalorder %s29_s18, %s29_s18 }
  0x2b   :  { %p5949_p1 = scmp.ne.s32.totalorder %s29_s18, %s5948_s19  ;;  %p5954_p3 = scmp.lt.s32.totalorder %s5948_s19, %s5948_s19 }
  0x2d   :  { %p5955_p4 = por %p5954_p3, %p5953_p2 }
  0x2f   :  { %p5956_p5 = pnand %p5955_p4, %p5949_p1 }
  0x31   :  { %5959 = shalt.err (!%p5956_p5)
}
  0x32   :  { %s6058_s2 = smov 256   ;;  %s6059_s20 = smov 16  }
  0x33   :  { %34 = dma.hbm_to_vmem [thread:$0]  %s6467_s1, 2304, %s29_s18, [#allocation6], %s6058_s2, %s6058_s2, %s6059_s20  }
  0x34   :  { %s6060_s23 = smov [#allocation10]   ;;  %s6061_s4 = smov [#allocation13]  }
  0x35   :  { %s51_s24 = sshll.u32 %s6060_s23, 4  ;;  %s72_s25 = sshll.u32 %s6061_s4, 4  ;;  %s52_s24 = int_to_ptr.vmem [resolvable:$true] %s51_s24  ;;  %s73_s25 = int_to_ptr.vmem [resolvable:$true] %s72_s25 }
  0x36   :  { %s5968_s26 = scalar_lea.vmem %s52_s24, 320  ;;  %p5973_p7 = scmp.lt.s32.totalorder %s52_s24, %s52_s24 }
  0x37   :  { %p5969_p6 = scmp.ne.s32.totalorder %s52_s24, %s5968_s26  ;;  %p5974_p8 = scmp.lt.s32.totalorder %s5968_s26, %s5968_s26 }
  0x39   :  { %p5975_p9 = por %p5974_p8, %p5973_p7 }
  0x3b   :  { %p5976_p10 = pnand %p5975_p9, %p5969_p6 }
  0x3d   :  { %5979 = shalt.err (!%p5976_p10)
}
  0x3e   :  { %54 = dma.hbm_to_vmem [thread:$0]  %s6469_s3, 320, %s52_s24, [#allocation9]  }
  0x3f   :  { %s5988_s29 = scalar_lea.vmem %s73_s25, 32768  ;;  %p5993_p12 = scmp.lt.s32.totalorder %s73_s25, %s73_s25 }
  0x40   :  { %p5989_p11 = scmp.ne.s32.totalorder %s73_s25, %s5988_s29  ;;  %p5994_p13 = scmp.lt.s32.totalorder %s5988_s29, %s5988_s29 }
  0x42   :  { %p5995_p0 = por %p5994_p13, %p5993_p12 }
  0x44   :  { %p5996_p1 = pnand %p5995_p0, %p5989_p11 }
  0x46   :  { %5999 = shalt.err (!%p5996_p1)
}
  0x47   :  { %s6062_s1 = smov 128   ;;  %s6063_s0 = smov 8  }
  0x48   :  { %78 = dma.hbm_to_vmem [thread:$0]  %s6471_s5, 32768, %s73_s25, [#allocation12], %s6062_s1, %s6062_s1, %s6063_s0  }
  0x49   :  { %s6064_s9 = smov [#allocation14]  }
  0x4a   :  { %s84_s10 = sshll.u32 %s6064_s9, 4  ;;  %s85_s10 = int_to_ptr.vmem [resolvable:$true] %s84_s10 }
  0x4b   :  { %s6008_s3 = scalar_lea.vmem %s85_s10, 2048  ;;  %p6013_p3 = scmp.lt.s32.totalorder %s85_s10, %s85_s10 }
  0x4c   :  { %p6009_p2 = scmp.ne.s32.totalorder %s85_s10, %s6008_s3  ;;  %p6014_p4 = scmp.lt.s32.totalorder %s6008_s3, %s6008_s3 }
  0x4e   :  { %p6015_p5 = por %p6014_p4, %p6013_p3 }
  0x50   :  { %p6016_p6 = pnand %p6015_p5, %p6009_p2 }
  0x52   :  { %6019 = shalt.err (!%p6016_p6)
}
  0x53   :  { %s6065_s11 = smov 64   ;;  %s6066_s12 = smov 4  }
  0x54   :  { %90 = dma.hbm_to_vmem [thread:$0]  %s6472_s6, 2048, %s85_s10, [#allocation15], %s6065_s11, %s6065_s11, %s6066_s12  }
  0x55   :  { %6042 = dma.done.wait [#allocation6], 2304  }
  0x56   :  { %6043 = vsyncadd [#allocation6], 4294964992 }
  0x57   :  { %6044 = dma.done.wait [#allocation9], 576  }
  0x58   :  { %6045 = vsyncadd [#allocation9], 4294966720 }
  0x59   :  { %6046 = dma.done.wait [#allocation12], 65536  }
  0x5a   :  { %6047 = vsyncadd [#allocation12], 4294901760 }
  0x5b   :  { %6048 = dma.done.wait [#allocation15], 2048  }
  0x5c   :  { %6049 = vsyncadd [#allocation15], 4294965248  ;;  %s6132_s5 = sld [smem:[#allocation4]]  ;;  %v497_v0 = vld [vmem:[#allocation11 + $0x1c0] sm:$0xff]  ;;  %v498_v2 = vld [vmem:[#allocation11 + $0x1c8] sm:$0xff]  ;;  %v120_v42 = vlaneseq }
  0x5d   :  { %s6134_s15 = sld [smem:[#allocation4 + $0x1]]  ;;  %v501_v1 = vld [vmem:[#allocation11 + $0x1e0] sm:$0xff]  ;;  %v502_v4 = vld [vmem:[#allocation11 + $0x1e8] sm:$0xff] }
  0x5e   :  { %s6136_s16 = sld [smem:[#allocation4 + $0x2]]  ;;  %v4935_v3 = vcombine.high %v497_v0, %v501_v1  ;;  %v4934_v5 = vcombine.low %v497_v0, %v501_v1  ;;  %v489_v6 = vld [vmem:[#allocation11 + $0x180] sm:$0xff]  ;;  %v4937_v8 = vcombine.high %v498_v2, %v502_v4  ;;  %v4936_v9 = vcombine.low %v498_v2, %v502_v4  ;;  %v490_v11 = vld [vmem:[#allocation11 + $0x188] sm:$0xff] }
  0x5f   :  { %s6138_s17 = sld [smem:[#allocation4 + $0x3]]  ;;  %v493_v7 = vld [vmem:[#allocation11 + $0x1a0] sm:$0xff]  ;;  %v494_v12 = vld [vmem:[#allocation11 + $0x1a8] sm:$0xff]  ;;  %vm6185_vm0 = vcmp.lt.s32.totalorder %v120_v42, 256 }
  0x60   :  { %s6141_s18 = sld [smem:[#allocation4 + $0x4]]  ;;  %v4927_v10 = vcombine.high %v489_v6, %v493_v7  ;;  %v481_v13 = vld [vmem:[#allocation11 + $0x140] sm:$0xff]  ;;  %1250 = vmatprep.subr.bf16.mxu0 %v4935_v3  ;;  %v4929_v14 = vcombine.high %v490_v11, %v494_v12  ;;  %v482_v16 = vld [vmem:[#allocation11 + $0x148] sm:$0xff]  ;;  %1293 = vmatprep.subr.bf16.mxu1 %v4937_v8  ;;  %v4926_v18 = vcombine.low %v489_v6, %v493_v7 }
  0x61   :  { %s6144_s2 = sld [smem:[#allocation4 + $0x5]]  ;;  %v485_v15 = vld [vmem:[#allocation11 + $0x160] sm:$0xff]  ;;  %v486_v17 = vld [vmem:[#allocation11 + $0x168] sm:$0xff]  ;;  %1251 = vmatpush1.bf16.msra.mxu0 %v4934_v5  ;;  %1294 = vmatpush1.bf16.msra.mxu1 %v4936_v9  ;;  %v4928_v19 = vcombine.low %v490_v11, %v494_v12 }
  0x62   :  { %s111_s6 = sshra.s32 %s6132_s5, 3  ;;  %s114_s20 = sand.u32 7, %s6132_s5  ;;  %1252 = vmatprep.subr.bf16.mxu0 %v4927_v10  ;;  %v4919_v20 = vcombine.high %v481_v13, %v485_v15  ;;  %1295 = vmatprep.subr.bf16.mxu1 %v4929_v14  ;;  %v4921_v21 = vcombine.high %v482_v16, %v486_v17  ;;  %v473_v22 = vld [vmem:[#allocation11 + $0x100] sm:$0xff]  ;;  %v474_v24 = vld [vmem:[#allocation11 + $0x108] sm:$0xff]  ;;  %v4918_v26 = vcombine.low %v481_v13, %v485_v15 }
  0x63   :  { %s127_s19 = sshra.s32 %s6134_s15, 3  ;;  %s5406_s21 = sshll.u32 %s111_s6, 4  ;;  %v477_v23 = vld [vmem:[#allocation11 + $0x120] sm:$0xff]  ;;  %v478_v25 = vld [vmem:[#allocation11 + $0x128] sm:$0xff]  ;;  %v4920_v27 = vcombine.low %v482_v16, %v486_v17 }
  0x64   :  { %s130_s22 = sand.u32 7, %s6134_s15  ;;  %s5407_s23 = sshll.u32 %s127_s19, 4  ;;  %v4911_v28 = vcombine.high %v473_v22, %v477_v23  ;;  %v4913_v29 = vcombine.high %v474_v24, %v478_v25  ;;  %v465_v30 = vld [vmem:[#allocation11 + $0xc0] sm:$0xff]  ;;  %v466_v32 = vld [vmem:[#allocation11 + $0xc8] sm:$0xff]  ;;  %v4910_v34 = vcombine.low %v473_v22, %v477_v23  ;;  %v4912_v35 = vcombine.low %v474_v24, %v478_v25 }
  0x65   :  { %s140_s24 = sshra.s32 %s6136_s16, 3  ;;  %s6149_s4 = sadd.s32 %s5406_s21, %s114_s20  ;;  %1253 = vmatpush1.bf16.msra.mxu0 %v4926_v18  ;;  %1296 = vmatpush1.bf16.msra.mxu1 %v4928_v19  ;;  %v469_v31 = vld [vmem:[#allocation11 + $0xe0] sm:$0xff]  ;;  %v470_v33 = vld [vmem:[#allocation11 + $0xe8] sm:$0xff] }
  0x66   :  { %s143_s25 = sand.u32 7, %s6136_s16  ;;  %s6152_s26 = sadd.s32 %s5407_s23, %s130_s22  ;;  %1254 = vmatprep.subr.bf16.mxu0 %v4919_v20  ;;  %1297 = vmatprep.subr.bf16.mxu1 %v4921_v21  ;;  %v4903_v36 = vcombine.high %v465_v30, %v469_v31  ;;  %v4905_v37 = vcombine.high %v466_v32, %v470_v33  ;;  %v457_v38 = vld [vmem:[#allocation11 + $0x80] sm:$0xff]  ;;  %v458_v40 = vld [vmem:[#allocation11 + $0x88] sm:$0xff]  ;;  %v4902_v43 = vcombine.low %v465_v30, %v469_v31 }
  0x67   :  { %s5408_s27 = sshll.u32 %s140_s24, 4  ;;  %s153_s29 = sshra.s32 %s6138_s17, 3  ;;  %v461_v39 = vld [vmem:[#allocation11 + $0xa0] sm:$0xff]  ;;  %v462_v41 = vld [vmem:[#allocation11 + $0xa8] sm:$0xff]  ;;  %v4904_v44 = vcombine.low %v466_v32, %v470_v33 }
  0x68   :  { %s6154_s28 = sadd.s32 %s5408_s27, %s143_s25  ;;  %s166_s30 = sshra.s32 %s6141_s18, 3  ;;  %v4895_v45 = vcombine.high %v457_v38, %v461_v39  ;;  %v4897_v46 = vcombine.high %v458_v40, %v462_v41  ;;  %v6176_v47 = vld [vmem:[#allocation11 + $0x40] sm:$0xff]  ;;  %v6180_v49 = vld [vmem:[#allocation11 + $0x48] sm:$0xff]  ;;  %v4894_v52 = vcombine.low %v457_v38, %v461_v39  ;;  %v4896_v55 = vcombine.low %v458_v40, %v462_v41 }
  0x69   :  { %s156_s8 = sand.u32 7, %s6138_s17  ;;  %s5409_s9 = sshll.u32 %s153_s29, 4  ;;  %1255 = vmatpush1.bf16.msra.mxu0 %v4918_v26  ;;  %1298 = vmatpush1.bf16.msra.mxu1 %v4920_v27  ;;  %v453_v48 = vld [vmem:[#allocation11 + $0x60] sm:$0xff]  ;;  %v6182_v50 = vld [vmem:[#allocation11 + $0x68] sm:$0xff] }
  0x6a   :  { %s179_s10 = sshra.s32 %s6144_s2, 3  ;;  %s169_s3 = sand.u32 7, %s6141_s18  ;;  %1256 = vmatprep.subr.bf16.mxu0 %v4911_v28  ;;  %1299 = vmatprep.subr.bf16.mxu1 %v4913_v29  ;;  %v6191_v53 = vld [vmem:[#allocation11] sm:$0xff]  ;;  %v4887_v56 = vcombine.high %v6176_v47, %v453_v48  ;;  %v6198_v57 = vld [vmem:[#allocation11 + $0x8] sm:$0xff]  ;;  %v4889_v60 = vcombine.high %v6180_v49, %v6182_v50  ;;  %v4886_v1 = vcombine.low %v6176_v47, %v453_v48 }
  0x6b   :  { %s5410_s11 = sshll.u32 %s166_s30, 4  ;;  %s182_s12 = sand.u32 7, %s6144_s2  ;;  %v6193_v54 = vld [vmem:[#allocation11 + $0x20] sm:$0xff]  ;;  %v6200_v58 = vld [vmem:[#allocation11 + $0x28] sm:$0xff]  ;;  %v4888_v3 = vcombine.low %v6180_v49, %v6182_v50 }
  0x6c   :  { %s5411_s13 = sshll.u32 %s179_s10, 4  ;;  %s6162_s14 = sadd.s32 %s5409_s9, %s156_s8  ;;  %v4879_v4 = vcombine.high %v6191_v53, %v6193_v54  ;;  %v4881_v6 = vcombine.high %v6198_v57, %v6200_v58  ;;  %v561_v7 = vld [vmem:[#allocation11 + $0x3c0] sm:$0xff]  ;;  %v562_v9 = vld [vmem:[#allocation11 + $0x3c8] sm:$0xff]  ;;  %v4878_v11 = vcombine.low %v6191_v53, %v6193_v54  ;;  %v4880_v13 = vcombine.low %v6198_v57, %v6200_v58 }
  0x6d   :  { %s6164_s5 = sld [smem:[#allocation4 + $0x6]]  ;;  %s6166_s15 = sadd.s32 %s5410_s11, %s169_s3  ;;  %1257 = vmatpush1.bf16.msra.mxu0 %v4910_v34  ;;  %1300 = vmatpush1.bf16.msra.mxu1 %v4912_v35  ;;  %v565_v8 = vld [vmem:[#allocation11 + $0x3e0] sm:$0xff]  ;;  %v566_v10 = vld [vmem:[#allocation11 + $0x3e8] sm:$0xff] }
  0x6e   :  { %s6168_s16 = sld [smem:[#allocation4 + $0x7]]  ;;  %s6170_s17 = sadd.s32 %s5411_s13, %s182_s12  ;;  %1258 = vmatprep.subr.bf16.mxu0 %v4903_v36  ;;  %1301 = vmatprep.subr.bf16.mxu1 %v4905_v37  ;;  %v4999_v14 = vcombine.high %v561_v7, %v565_v8  ;;  %v6240_v15 = vld [vmem:[#allocation11 + $0x380] sm:$0xff]  ;;  %v5001_v16 = vcombine.high %v562_v9, %v566_v10  ;;  %v554_v19 = vld [vmem:[#allocation11 + $0x388] sm:$0xff]  ;;  %v4998_v21 = vcombine.low %v561_v7, %v565_v8 }
  0x6f   :  { %s6172_s6 = sld [smem:[#allocation4 + $0x8]]  ;;  %s118_s22 = scalar_lea.vmem [#allocation5], %s6149_s4  ;;  %v557_v17 = vld [vmem:[#allocation11 + $0x3a0] sm:$0xff]  ;;  %v558_v20 = vld [vmem:[#allocation11 + $0x3a8] sm:$0xff]  ;;  %v5000_v22 = vcombine.low %v562_v9, %v566_v10 }
  0x70   :  { %s6174_s18 = sld [smem:[#allocation4 + $0x9]]  ;;  %v119_v59 = vld [vmem:[%s118_s22] ss:$8 sm:$0x3]  ;;  %s134_s25 = scalar_lea.vmem [#allocation5], %s6152_s26  ;;  %v4991_v23 = vcombine.high %v6240_v15, %v557_v17  ;;  %v6250_v24 = vld [vmem:[#allocation11 + $0x340] sm:$0xff]  ;;  %v4993_v26 = vcombine.high %v554_v19, %v558_v20  ;;  %v4990_v31 = vcombine.low %v6240_v15, %v557_v17  ;;  %v4992_v34 = vcombine.low %v554_v19, %v558_v20 }
  0x71   :  { %s6178_s19 = sld [smem:[#allocation4 + $0xa]]  ;;  %1259 = vmatpush1.bf16.msra.mxu0 %v4902_v43  ;;  %1302 = vmatpush1.bf16.msra.mxu1 %v4904_v44  ;;  %124 = vst.msk [vmem:[#allocation2] ss:$8 sm:$0x3] %vm6185_vm0, %v119_v59  ;;  %s147_s27 = scalar_lea.vmem [#allocation5], %s6154_s28  ;;  %v549_v27 = vld [vmem:[#allocation11 + $0x360] sm:$0xff] }
  0x72   :  { %s6189_s2 = sld [smem:[#allocation4 + $0xb]]  ;;  %1260 = vmatprep.subr.bf16.mxu0 %v4895_v45  ;;  %1303 = vmatprep.subr.bf16.mxu1 %v4897_v46  ;;  %v135_v61 = vld [vmem:[%s134_s25] ss:$8 sm:$0x3]  ;;  %s160_s4 = scalar_lea.vmem [#allocation5], %s6162_s14  ;;  %v4983_v35 = vcombine.high %v6250_v24, %v549_v27  ;;  %v537_v39 = vld [vmem:[#allocation11 + $0x300] sm:$0xff]  ;;  %v4982_v47 = vcombine.low %v6250_v24, %v549_v27 }
  0x73   :  { %s192_s20 = sshra.s32 %s6164_s5, 3  ;;  %s195_s21 = sand.u32 7, %s6164_s5  ;;  %v148_v62 = vld [vmem:[%s147_s27] ss:$8 sm:$0x3]  ;;  %v541_v40 = vld [vmem:[#allocation11 + $0x320] sm:$0xff] }
  0x74   :  { %s5412_s23 = sshll.u32 %s192_s20, 4  ;;  %s205_s24 = sshra.s32 %s6168_s16, 3  ;;  %137 = vst.msk [vmem:[#allocation2 + $0x1] ss:$8 sm:$0x3] %vm6185_vm0, %v135_v61  ;;  %v546_v28 = vld [vmem:[#allocation11 + $0x348] sm:$0xff]  ;;  %v4975_v49 = vcombine.high %v537_v39, %v541_v40 }
  0x75   :  { %s198_s29 = sadd.s32 %s5412_s23, %s195_s21  ;;  %150 = vst.msk [vmem:[#allocation2 + $0x2] ss:$8 sm:$0x3] %vm6185_vm0, %v148_v62  ;;  %v161_v63 = vld [vmem:[%s160_s4] ss:$8 sm:$0x3]  ;;  %1261 = vmatpush1.bf16.msra.mxu0 %v4894_v52  ;;  %1304 = vmatpush1.bf16.msra.mxu1 %v4896_v55 }
  0x76   :  { %s173_s30 = scalar_lea.vmem [#allocation5], %s6166_s15  ;;  %163 = vst.msk [vmem:[#allocation2 + $0x3] ss:$8 sm:$0x3] %vm6185_vm0, %v161_v63  ;;  %s186_s26 = scalar_lea.vmem [#allocation5], %s6170_s17  ;;  %1262 = vmatprep.subr.bf16.mxu0 %v4887_v56  ;;  %1305 = vmatprep.subr.bf16.mxu1 %v4889_v60  ;;  %v550_v29 = vld [vmem:[#allocation11 + $0x368] sm:$0xff]  ;;  %v4974_v60 = vcombine.low %v537_v39, %v541_v40 }
  0x77   :  { %v174_v0 = vld [vmem:[%s173_s30] ss:$8 sm:$0x3]  ;;  %s208_s28 = sand.u32 7, %s6168_s16  ;;  %s199_s8 = scalar_lea.vmem [#allocation5], %s198_s29  ;;  %v4985_v38 = vcombine.high %v546_v28, %v550_v29  ;;  %v4984_v48 = vcombine.low %v546_v28, %v550_v29  ;;  %v529_v54 = vld [vmem:[#allocation11 + $0x2c0] sm:$0xff] }
  0x78   :  { %176 = vst.msk [vmem:[#allocation2 + $0x4] ss:$8 sm:$0x3] %vm6185_vm0, %v174_v0  ;;  %v187_v2 = vld [vmem:[%s186_s26] ss:$8 sm:$0x3] }
  0x79   :  { %189 = vst.msk [vmem:[#allocation2 + $0x5] ss:$8 sm:$0x3] %vm6185_vm0, %v187_v2  ;;  %v200_v5 = vld [vmem:[%s199_s8] ss:$8 sm:$0x3]  ;;  %1263 = vmatpush1.bf16.msra.mxu0 %v4886_v1  ;;  %1306 = vmatpush1.bf16.msra.mxu1 %v4888_v3 }
  0x7a   :  { %s5413_s9 = sshll.u32 %s205_s24, 4  ;;  %s218_s10 = sshra.s32 %s6172_s6, 3  ;;  %202 = vst.msk [vmem:[#allocation2 + $0x6] ss:$8 sm:$0x3] %vm6185_vm0, %v200_v5  ;;  %1264 = vmatprep.subr.bf16.mxu0 %v4879_v4  ;;  %1307 = vmatprep.subr.bf16.mxu1 %v4881_v6  ;;  %v538_v43 = vld [vmem:[#allocation11 + $0x308] sm:$0xff] }
  0x7b   :  { %s211_s3 = sadd.s32 %s5413_s9, %s208_s28  ;;  %s221_s11 = sand.u32 7, %s6172_s6  ;;  %v542_v44 = vld [vmem:[#allocation11 + $0x328] sm:$0xff]  ;;  %v533_v55 = vld [vmem:[#allocation11 + $0x2e0] sm:$0xff]  ;;  %v6307_v40 = vld [vmem:[#allocation11 + $0x1f0] sm:$0xff] }
  0x7c   :  { %s5414_s12 = sshll.u32 %s218_s10, 4  ;;  %s212_s13 = scalar_lea.vmem [#allocation5], %s211_s3  ;;  %v4977_v53 = vcombine.high %v538_v43, %v542_v44  ;;  %v530_v56 = vld [vmem:[#allocation11 + $0x2c8] sm:$0xff]  ;;  %v4976_v61 = vcombine.low %v538_v43, %v542_v44  ;;  %v4967_v62 = vcombine.high %v529_v54, %v533_v55  ;;  %v521_v3 = vld [vmem:[#allocation11 + $0x280] sm:$0xff]  ;;  %v4966_v10 = vcombine.low %v529_v54, %v533_v55  ;;  %v6311_v44 = vld [vmem:[#allocation11 + $0x1f8] sm:$0xff] }
  0x7d   :  { %v213_v12 = vld [vmem:[%s212_s13] ss:$8 sm:$0x3]  ;;  %s224_s14 = sadd.s32 %s5414_s12, %s221_s11  ;;  %s231_s5 = sshra.s32 %s6174_s18, 3  ;;  %1265 = vmatpush1.bf16.msra.mxu0 %v4878_v11  ;;  %1308 = vmatpush1.bf16.msra.mxu1 %v4880_v13  ;;  %v525_v4 = vld [vmem:[#allocation11 + $0x2a0] sm:$0xff] }
  0x7e   :  { %215 = vst.msk [vmem:[#allocation2 + $0x7] ss:$8 sm:$0x3] %vm6185_vm0, %v213_v12  ;;  %s234_s15 = sand.u32 7, %s6174_s18  ;;  %s225_s16 = scalar_lea.vmem [#allocation5], %s224_s14  ;;  %1266 = vmatprep.subr.bf16.mxu0 %v4999_v14  ;;  %1309 = vmatprep.subr.bf16.mxu1 %v5001_v16  ;;  %v534_v57 = vld [vmem:[#allocation11 + $0x2e8] sm:$0xff]  ;;  %v4959_v12 = vcombine.high %v521_v3, %v525_v4 }
  0x7f   :  { %v226_v18 = vld [vmem:[%s225_s16] ss:$8 sm:$0x3]  ;;  %s5415_s17 = sshll.u32 %s231_s5, 4  ;;  %s244_s6 = sshra.s32 %s6178_s19, 3  ;;  %v4969_v2 = vcombine.high %v530_v56, %v534_v57  ;;  %v4968_v11 = vcombine.low %v530_v56, %v534_v57  ;;  %v513_v16 = vld [vmem:[#allocation11 + $0x240] sm:$0xff] }
  0x80   :  { %228 = vst.msk [vmem:[#allocation2 + $0x10] ss:$8 sm:$0x3] %vm6185_vm0, %v226_v18  ;;  %s237_s20 = sadd.s32 %s5415_s17, %s234_s15  ;;  %s247_s21 = sand.u32 7, %s6178_s19  ;;  %v522_v5 = vld [vmem:[#allocation11 + $0x288] sm:$0xff]  ;;  %v517_v17 = vld [vmem:[#allocation11 + $0x260] sm:$0xff] }
  0x81   :  { %s5416_s22 = sshll.u32 %s244_s6, 4  ;;  %s238_s18 = scalar_lea.vmem [#allocation5], %s237_s20  ;;  %1267 = vmatpush2.bf16.msra.mxu0 %v4998_v21  ;;  %1310 = vmatpush2.bf16.msra.mxu1 %v5000_v22  ;;  %v526_v6 = vld [vmem:[#allocation11 + $0x2a8] sm:$0xff] }
  0x82   :  { %v239_v25 = vld [vmem:[%s238_s18] ss:$8 sm:$0x3]  ;;  %s250_s23 = sadd.s32 %s5416_s22, %s247_s21  ;;  %s257_s24 = sshra.s32 %s6189_s2, 3  ;;  %1268 = vmatprep.subr.bf16.mxu0 %v4991_v23  ;;  %1311 = vmatprep.subr.bf16.mxu1 %v4993_v26  ;;  %v4961_v15 = vcombine.high %v522_v5, %v526_v6  ;;  %v4958_v23 = vcombine.low %v521_v3, %v525_v4  ;;  %v4960_v24 = vcombine.low %v522_v5, %v526_v6 }
  0x83   :  { %241 = vst.msk [vmem:[#allocation2 + $0x11] ss:$8 sm:$0x3] %vm6185_vm0, %v239_v25  ;;  %s260_s19 = sand.u32 7, %s6189_s2  ;;  %s251_s25 = scalar_lea.vmem [#allocation5], %s250_s23  ;;  %v514_v19 = vld [vmem:[#allocation11 + $0x248] sm:$0xff]  ;;  %v4951_v26 = vcombine.high %v513_v16, %v517_v17 }
  0x84   :  { %v252_v30 = vld [vmem:[%s251_s25] ss:$8 sm:$0x3]  ;;  %s5417_s27 = sshll.u32 %s257_s24, 4  ;;  %s6256_s29 = sld [smem:[#allocation4 + $0xc]] }
  0x85   :  { %254 = vst.msk [vmem:[#allocation2 + $0x12] ss:$8 sm:$0x3] %vm6185_vm0, %v252_v30  ;;  %s263_s4 = sadd.s32 %s5417_s27, %s260_s19  ;;  %s6261_s30 = sld [smem:[#allocation4 + $0xd]]  ;;  %v6263_v32 = vld [vmem:[#allocation2 + $0x8] sm:$0xff]  ;;  %v6265_v33 = vld [vmem:[#allocation2] sm:$0xff]  ;;  %1269 = vmatpush2.bf16.msra.mxu0 %v4990_v31  ;;  %1312 = vmatpush2.bf16.msra.mxu1 %v4992_v34 }
  0x86   :  { %s6268_s2 = sld [smem:[#allocation4 + $0xe]]  ;;  %v334_v36 = vrot.slane %v6263_v32, 4  ;;  %v328_v37 = vrot.slane %v6265_v33, 4  ;;  %s264_s26 = scalar_lea.vmem [#allocation5], %s263_s4  ;;  %1270 = vmatprep.subr.bf16.mxu0 %v4983_v35  ;;  %1313 = vmatprep.subr.bf16.mxu1 %v4985_v38  ;;  %v518_v20 = vld [vmem:[#allocation11 + $0x268] sm:$0xff]  ;;  %v505_v30 = vld [vmem:[#allocation11 + $0x200] sm:$0xff]  ;;  %v4950_v35 = vcombine.low %v513_v16, %v517_v17 }
  0x87   :  { %v265_v41 = vld [vmem:[%s264_s26] ss:$8 sm:$0x3]  ;;  %s6274_s28 = sld [smem:[#allocation4 + $0xf]]  ;;  %v4953_v29 = vcombine.high %v514_v19, %v518_v20  ;;  %v509_v31 = vld [vmem:[#allocation11 + $0x220] sm:$0xff]  ;;  %v4952_v51 = vcombine.low %v514_v19, %v518_v20  ;;  %s6067_s25 = smov [#allocation16]  }
  0x88   :  { %267 = vst.msk [vmem:[#allocation2 + $0x13] ss:$8 sm:$0x3] %vm6185_vm0, %v265_v41  ;;  %v335_v45 = vadd.f32 %v334_v36, %v6263_v32  ;;  %v329_v46 = vadd.f32 %v328_v37, %v6265_v33  ;;  %v4943_v37 = vcombine.high %v505_v30, %v509_v31  ;;  %v6305_v38 = vld [vmem:[#allocation11 + $0x1d0] sm:$0xff]  ;;  %v6309_v41 = vld [vmem:[#allocation11 + $0x1d8] sm:$0xff]  ;;  %s4768_s27 = sshll.u32 %s6067_s25, 4  ;;  %s4769_s27 = int_to_ptr.vmem [resolvable:$true] %s4768_s27 }
  0x89   :  { %1271 = vmatpush2.bf16.msra.mxu0 %v4982_v47  ;;  %1314 = vmatpush2.bf16.msra.mxu1 %v4984_v48  ;;  %v4941_v54 = vcombine.high %v6309_v41, %v6311_v44  ;;  %p6025_p8 = scmp.lt.s32.totalorder %s4769_s27, %s4769_s27 }
  0x8a   :  { %s270_s8 = sshra.s32 %s6256_s29, 3  ;;  %s273_s9 = sand.u32 7, %s6256_s29  ;;  %v336_v50 = vrot.slane %v335_v45, 2  ;;  %v330_v52 = vrot.slane %v329_v46, 2  ;;  %1272 = vmatprep.subr.bf16.mxu0 %v4975_v49  ;;  %1315 = vmatprep.subr.bf16.mxu1 %v4977_v53 }
  0x8b   :  { %s5418_s10 = sshll.u32 %s270_s8, 4  ;;  %s283_s3 = sshra.s32 %s6261_s30, 3 }
  0x8c   :  { %s276_s11 = sadd.s32 %s5418_s10, %s273_s9  ;;  %s286_s12 = sand.u32 7, %s6261_s30  ;;  %v337_v58 = vadd.f32 %v336_v50, %v335_v45  ;;  %v331_v59 = vadd.f32 %v330_v52, %v329_v46  ;;  %v4942_v45 = vcombine.low %v505_v30, %v509_v31  ;;  %v4939_v52 = vcombine.high %v6305_v38, %v6307_v40 }
  0x8d   :  { %s5419_s13 = sshll.u32 %s283_s3, 4  ;;  %s277_s14 = scalar_lea.vmem [#allocation5], %s276_s11  ;;  %1273 = vmatpush2.bf16.msra.mxu0 %v4974_v60  ;;  %1316 = vmatpush2.bf16.msra.mxu1 %v4976_v61 }
  0x8e   :  { %v278_v63 = vld [vmem:[%s277_s14] ss:$8 sm:$0x3]  ;;  %s289_s5 = sadd.s32 %s5419_s13, %s286_s12  ;;  %s296_s15 = sshra.s32 %s6268_s2, 3  ;;  %v338_v0 = vrot.slane %v337_v58, 1  ;;  %v332_v1 = vrot.slane %v331_v59, 1  ;;  %1274 = vmatprep.subr.bf16.mxu0 %v4967_v62  ;;  %1317 = vmatprep.subr.bf16.mxu1 %v4969_v2 }
  0x8f   :  { %280 = vst.msk [vmem:[#allocation2 + $0x14] ss:$8 sm:$0x3] %vm6185_vm0, %v278_v63  ;;  %s299_s16 = sand.u32 7, %s6268_s2  ;;  %s290_s17 = scalar_lea.vmem [#allocation5], %s289_s5 }
  0x90   :  { %v291_v7 = vld [vmem:[%s290_s17] ss:$8 sm:$0x3]  ;;  %s5420_s6 = sshll.u32 %s296_s15, 4  ;;  %s309_s20 = sshra.s32 %s6274_s28, 3  ;;  %v339_v8 = vadd.f32 %v338_v0, %v337_v58  ;;  %v333_v9 = vadd.f32 %v332_v1, %v331_v59 }
  0x91   :  { %293 = vst.msk [vmem:[#allocation2 + $0x15] ss:$8 sm:$0x3] %vm6185_vm0, %v291_v7  ;;  %s302_s21 = sadd.s32 %s5420_s6, %s299_s16  ;;  %s312_s22 = sand.u32 7, %s6274_s28  ;;  %1275 = vmatpush2.bf16.msra.mxu0 %v4966_v10  ;;  %1318 = vmatpush2.bf16.msra.mxu1 %v4968_v11 }
  0x92   :  { %s5421_s18 = sshll.u32 %s309_s20, 4  ;;  %v354_v13 = vmul.f32 0.125, %v339_v8  ;;  %v353_v14 = vmul.f32 0.125, %v333_v9  ;;  %s303_s23 = scalar_lea.vmem [#allocation5], %s302_s21  ;;  %1276 = vmatprep.subr.bf16.mxu0 %v4959_v12  ;;  %1319 = vmatprep.subr.bf16.mxu1 %v4961_v15 }
  0x93   :  { %v304_v18 = vld [vmem:[%s303_s23] ss:$8 sm:$0x3]  ;;  %s315_s24 = sadd.s32 %s5421_s18, %s312_s22  ;;  %s6020_s29 = scalar_lea.vmem %s4769_s27, 256 }
  0x94   :  { %306 = vst.msk [vmem:[#allocation2 + $0x16] ss:$8 sm:$0x3] %vm6185_vm0, %v304_v18  ;;  %v6294_v21 = vsub.f32 %v6263_v32, %v354_v13  ;;  %v6297_v22 = vsub.f32 %v6265_v33, %v353_v14  ;;  %s316_s19 = scalar_lea.vmem [#allocation5], %s315_s24  ;;  %v506_v32 = vld [vmem:[#allocation11 + $0x208] sm:$0xff]  ;;  %p6021_p7 = scmp.ne.s32.totalorder %s4769_s27, %s6020_s29 }
  0x95   :  { %v317_v25 = vld [vmem:[%s316_s19] ss:$8 sm:$0x3]  ;;  %1277 = vmatpush2.bf16.msra.mxu0 %v4958_v23  ;;  %1320 = vmatpush2.bf16.msra.mxu1 %v4960_v24  ;;  %p6026_p9 = scmp.lt.s32.totalorder %s6020_s29, %s6020_s29 }
  0x96   :  { %319 = vst.msk [vmem:[#allocation2 + $0x17] ss:$8 sm:$0x3] %vm6185_vm0, %v317_v25  ;;  %v362_v27 = vmul.f32 %v6294_v21, %v6294_v21  ;;  %v361_v28 = vmul.f32 %v6297_v22, %v6297_v22  ;;  %v510_v33 = vld [vmem:[#allocation11 + $0x228] sm:$0xff]  ;;  %1278 = vmatprep.subr.bf16.mxu0 %v4951_v26  ;;  %1321 = vmatprep.subr.bf16.mxu1 %v4953_v29 }
  0x97   :  { %v4945_v39 = vcombine.high %v506_v32, %v510_v33  ;;  %v4944_v49 = vcombine.low %v506_v32, %v510_v33  ;;  %p6027_p10 = por %p6026_p9, %p6025_p8 }
  0x98   :  { %v371_v34 = vrot.slane %v362_v27, 4  ;;  %v365_v36 = vrot.slane %v361_v28, 4 }
  0x99   :  { %1279 = vmatpush2.bf16.msra.mxu0 %v4950_v35  ;;  %1322 = vmatpush2.bf16.msra.mxu1 %v4952_v51  ;;  %v6318_v51 = vshrl.u32 %v120_v42, 7  ;;  %p6028_p11 = pnand %p6027_p10, %p6021_p7 }
  0x9a   :  { %v372_v43 = vadd.f32 %v371_v34, %v362_v27  ;;  %v366_v48 = vadd.f32 %v365_v36, %v361_v28  ;;  %1280 = vmatprep.subr.bf16.mxu0 %v4943_v37  ;;  %1323 = vmatprep.subr.bf16.mxu1 %v4945_v39 }
  0x9b   :  { %v6321_v37 = vsub.s32 1, %v6318_v51 }
  0x9c   :  { %v373_v56 = vrot.slane %v372_v43, 2  ;;  %v367_v58 = vrot.slane %v366_v48, 2 }
  0x9d   :  { %v324_v46 = vld [vmem:[#allocation2 + $0x18] sm:$0xff]  ;;  %v323_v47 = vld [vmem:[#allocation2 + $0x10] sm:$0xff]  ;;  %1281 = vmatpush2.bf16.msra.mxu0 %v4942_v45  ;;  %1324 = vmatpush2.bf16.msra.mxu1 %v4944_v49  ;;  %v6324_v45 = vsub.s32 0, %v6318_v51 }
  0x9e   :  { %v346_v50 = vrot.slane %v324_v46, 4  ;;  %v340_v53 = vrot.slane %v323_v47, 4  ;;  %1336 = vmatprep.subr.bf16.mxu0 %v4939_v52  ;;  %1379 = vmatprep.subr.bf16.mxu1 %v4941_v54  ;;  %v374_v62 = vadd.f32 %v373_v56, %v372_v43  ;;  %v368_v0 = vadd.f32 %v367_v58, %v366_v48  ;;  %v325_v43 = vld [vmem:[#allocation8] ss:$8 sm:$0x3] }
  0x9f   :  { %v414_v49 = vrot.slane %v325_v43, %v6321_v37  ;;  %v410_v42 = vrot.slane %v325_v43, %v6324_v45  ;;  %v451_v43 = vld [vmem:[#allocation11 + $0x50] sm:$0xff] }
  0xa0   :  { %v347_v55 = vadd.f32 %v346_v50, %v324_v46  ;;  %v341_v57 = vadd.f32 %v340_v53, %v323_v47  ;;  %v375_v4 = vrot.slane %v374_v62, 1  ;;  %v369_v6 = vrot.slane %v368_v0, 1 }
  0xa2   :  { %v348_v59 = vrot.slane %v347_v55, 2  ;;  %v342_v60 = vrot.slane %v341_v57, 2  ;;  %v376_v10 = vadd.f32 %v375_v4, %v374_v62  ;;  %v370_v12 = vadd.f32 %v369_v6, %v368_v0  ;;  %v491_v62 = vld [vmem:[#allocation11 + $0x190] sm:$0xff]  ;;  %v496_v0 = vld [vmem:[#allocation11 + $0x1b8] sm:$0xff] }
  0xa3   :  { %v4940_v6 = vcombine.low %v6309_v41, %v6311_v44  ;;  %v479_v41 = vld [vmem:[#allocation11 + $0x130] sm:$0xff]  ;;  %v476_v44 = vld [vmem:[#allocation11 + $0x118] sm:$0xff] }
  0xa4   :  { %v349_v61 = vadd.f32 %v348_v59, %v347_v55  ;;  %v343_v63 = vadd.f32 %v342_v60, %v341_v57  ;;  %v391_v16 = vmul.f32 0.14285715, %v376_v10  ;;  %v390_v18 = vmul.f32 0.14285715, %v370_v12  ;;  %v488_v10 = vld [vmem:[#allocation11 + $0x178] sm:$0xff] }
  0xa6   :  { %v350_v1 = vrot.slane %v349_v61, 1  ;;  %v344_v2 = vrot.slane %v343_v63, 1  ;;  %v395_v24 = vadd.f32 1e-05, %v391_v16  ;;  %v394_v26 = vadd.f32 1e-05, %v390_v18 }
  0xa8   :  { %v351_v3 = vadd.f32 %v350_v1, %v349_v61  ;;  %v345_v5 = vadd.f32 %v344_v2, %v343_v63  ;;  %5860 = vrsqrt.f32 %v395_v24  ;;  %v492_v63 = vld [vmem:[#allocation11 + $0x198] sm:$0xff] }
  0xa9   :  { %5862 = vrsqrt.f32 %v394_v26  ;;  %v468_v24 = vld [vmem:[#allocation11 + $0xd8] sm:$0xff] }
  0xaa   :  { %v356_v7 = vmul.f32 0.125, %v351_v3  ;;  %v355_v8 = vmul.f32 0.125, %v345_v5  ;;  %v4938_v5 = vcombine.low %v6305_v38, %v6307_v40  ;;  %v4932_v40 = vcombine.low %v492_v63, %v496_v0 }
  0xac   :  { %v360_v9 = vsub.f32 %v324_v46, %v356_v7  ;;  %v359_v11 = vsub.f32 %v323_v47, %v355_v8  ;;  %v327_v47 = vld [vmem:[#allocation8 + $0x1] ss:$8 sm:$0x3]  ;;  %v483_v7 = vld [vmem:[#allocation11 + $0x150] sm:$0xff] }
  0xad   :  { %v429_v53 = vrot.slane %v327_v47, %v6321_v37  ;;  %v425_v56 = vrot.slane %v327_v47, %v6324_v45  ;;  %v487_v8 = vld [vmem:[#allocation11 + $0x170] sm:$0xff]  ;;  %v452_v47 = vld [vmem:[#allocation11 + $0x58] sm:$0xff] }
  0xae   :  { %v364_v13 = vmul.f32 %v360_v9, %v360_v9  ;;  %v363_v14 = vmul.f32 %v359_v11, %v359_v11  ;;  %v4923_v16 = vcombine.high %v483_v7, %v487_v8  ;;  %v4922_v18 = vcombine.low %v483_v7, %v487_v8 }
  0xb0   :  { %v383_v15 = vrot.slane %v364_v13, 4  ;;  %v377_v17 = vrot.slane %v363_v14, 4 }
  0xb2   :  { %v384_v19 = vadd.f32 %v383_v15, %v364_v13  ;;  %v378_v20 = vadd.f32 %v377_v17, %v363_v14  ;;  %v4933_v13 = vcombine.high %v492_v63, %v496_v0  ;;  %v475_v14 = vld [vmem:[#allocation11 + $0x110] sm:$0xff]  ;;  %v480_v15 = vld [vmem:[#allocation11 + $0x138] sm:$0xff] }
  0xb3   :  { %v4915_v26 = vcombine.high %v475_v14, %v479_v41  ;;  %v568_v63 = vld [vmem:[#allocation11 + $0x3f8] sm:$0xff] }
  0xb4   :  { %v385_v23 = vrot.slane %v384_v19, 2  ;;  %v379_v25 = vrot.slane %v378_v20, 2 }
  0xb5   :  { %v5861_v39 = vpop.eup %5860 }
  0xb6   :  { %v386_v27 = vadd.f32 %v385_v23, %v384_v19  ;;  %v380_v28 = vadd.f32 %v379_v25, %v378_v20  ;;  %v5863_v46 = vpop.eup %5862  ;;  %v403_v48 = vmul.f32 %v5861_v39, %v6294_v21  ;;  %v495_v21 = vld [vmem:[#allocation11 + $0x1b0] sm:$0xff]  ;;  %v472_v25 = vld [vmem:[#allocation11 + $0xf8] sm:$0xff] }
  0xb7   :  { %v402_v50 = vmul.f32 %v5863_v46, %v6297_v22  ;;  %v4931_v12 = vcombine.high %v491_v62, %v495_v21  ;;  %v4930_v38 = vcombine.low %v491_v62, %v495_v21  ;;  %v467_v20 = vld [vmem:[#allocation11 + $0xd0] sm:$0xff]  ;;  %v4908_v39 = vcombine.low %v468_v24, %v472_v25  ;;  %v564_v21 = vld [vmem:[#allocation11 + $0x3d8] sm:$0xff] }
  0xb8   :  { %v387_v29 = vrot.slane %v386_v27, 1  ;;  %v381_v30 = vrot.slane %v380_v28, 1  ;;  %v418_v52 = vmul.f32 %v414_v49, %v403_v48  ;;  %v471_v23 = vld [vmem:[#allocation11 + $0xf0] sm:$0xff]  ;;  %v456_v48 = vld [vmem:[#allocation11 + $0x78] sm:$0xff]  ;;  %v5005_v8 = vcombine.high %v564_v21, %v568_v63 }
  0xb9   :  { %v417_v55 = vmul.f32 %v410_v42, %v402_v50  ;;  %v455_v46 = vld [vmem:[#allocation11 + $0x70] sm:$0xff] }
  0xba   :  { %v388_v31 = vadd.f32 %v387_v29, %v386_v27  ;;  %v382_v32 = vadd.f32 %v381_v30, %v380_v28  ;;  %v433_v61 = vadd.f32 %v429_v53, %v418_v52  ;;  %v4917_v27 = vcombine.high %v476_v44, %v480_v15  ;;  %v459_v30 = vld [vmem:[#allocation11 + $0x90] sm:$0xff] }
  0xbb   :  { %v432_v22 = vadd.f32 %v425_v56, %v417_v55  ;;  %v4914_v28 = vcombine.low %v475_v14, %v479_v41  ;;  %v4916_v29 = vcombine.low %v476_v44, %v480_v15  ;;  %v444_v55 = vld [vmem:[#allocation11 + $0x18] sm:$0xff]  ;;  %v567_v62 = vld [vmem:[#allocation11 + $0x3f0] sm:$0xff] }
  0xbc   :  { %v393_v33 = vmul.f32 0.14285715, %v388_v31  ;;  %v392_v34 = vmul.f32 0.14285715, %v382_v32  ;;  %v463_v31 = vld [vmem:[#allocation11 + $0xb0] sm:$0xff]  ;;  %v460_v32 = vld [vmem:[#allocation11 + $0x98] sm:$0xff] }
  0xbe   :  { %v397_v35 = vadd.f32 1e-05, %v393_v33  ;;  %v396_v36 = vadd.f32 1e-05, %v392_v34  ;;  %v464_v33 = vld [vmem:[#allocation11 + $0xb8] sm:$0xff]  ;;  %v4907_v34 = vcombine.high %v467_v20, %v471_v23 }
  0xbf   :  { %v4901_v50 = vcombine.high %v460_v32, %v464_v33  ;;  %v4900_v52 = vcombine.low %v460_v32, %v464_v33 }
  0xc0   :  { %5864 = vrsqrt.f32 %v397_v35  ;;  %v4909_v35 = vcombine.high %v468_v24, %v472_v25 }
  0xc1   :  { %5866 = vrsqrt.f32 %v396_v36  ;;  %v4906_v36 = vcombine.low %v467_v20, %v471_v23 }
  0xcd   :  { %v5865_v54 = vpop.eup %5864 }
  0xce   :  { %v5867_v57 = vpop.eup %5866  ;;  %v405_v58 = vmul.f32 %v5865_v54, %v360_v9  ;;  %v484_v9 = vld [vmem:[#allocation11 + $0x158] sm:$0xff]  ;;  %v447_v54 = vld [vmem:[#allocation11 + $0x30] sm:$0xff] }
  0xcf   :  { %v404_v59 = vmul.f32 %v5867_v57, %v359_v11  ;;  %v4925_v17 = vcombine.high %v484_v9, %v488_v10  ;;  %v4924_v19 = vcombine.low %v484_v9, %v488_v10  ;;  %v4891_v57 = vcombine.high %v451_v43, %v455_v46 }
  0xd0   :  { %v420_v60 = vmul.f32 %v414_v49, %v405_v58  ;;  %v4899_v49 = vcombine.high %v459_v30, %v463_v31  ;;  %v4893_v58 = vcombine.high %v452_v47, %v456_v48  ;;  %v5004_v10 = vcombine.low %v564_v21, %v568_v63 }
  0xd1   :  { %v419_v1 = vmul.f32 %v410_v42, %v404_v59  ;;  %v4898_v42 = vcombine.low %v459_v30, %v463_v31  ;;  %v4890_v59 = vcombine.low %v451_v43, %v455_v46 }
  0xd2   :  { %v435_v2 = vadd.f32 %v429_v53, %v420_v60  ;;  %v443_v53 = vld [vmem:[#allocation11 + $0x10] sm:$0xff]  ;;  %v4892_v60 = vcombine.low %v452_v47, %v456_v48 }
  0xd3   :  { %v434_v3 = vadd.f32 %v425_v56, %v419_v1  ;;  %v448_v56 = vld [vmem:[#allocation11 + $0x38] sm:$0xff]  ;;  %v4883_v0 = vcombine.high %v443_v53, %v447_v54 }
  0xd4   :  { %v437_v4 = vpack.c.bf16 %v435_v2, %v433_v61  ;;  %v563_v61 = vld [vmem:[#allocation11 + $0x3d0] sm:$0xff]  ;;  %v4885_v1 = vcombine.high %v444_v55, %v448_v56  ;;  %v4884_v2 = vcombine.low %v444_v55, %v448_v56 }
  0xd5   :  { %v6336_v11 = vpack.c.bf16 %v434_v3, %v432_v22  ;;  %v4882_v22 = vcombine.low %v443_v53, %v447_v54  ;;  %v555_v3 = vld [vmem:[#allocation11 + $0x390] sm:$0xff]  ;;  %v5003_v7 = vcombine.high %v563_v61, %v567_v62  ;;  %v5002_v9 = vcombine.low %v563_v61, %v567_v62 }
  0xd6   :  { %1282 = vmatprep.mubr.bf16.mxu0 %v437_v4  ;;  %1325 = vmatprep.mubr.bf16.mxu1 %v437_v4 }
  0xd7   :  { %1283 = vmatmul.mubr.bf16.vlgmr.msra.gmra.mxu0 %v6336_v11  ;;  %1326 = vmatmul.mubr.bf16.vlgmr.msra.gmra.mxu1 %v6336_v11 }
  0xd8   :  { %1337 = vmatpush1.bf16.msra.mxu0 %v4938_v5  ;;  %1380 = vmatpush1.bf16.msra.mxu1 %v4940_v6  ;;  %v556_v5 = vld [vmem:[#allocation11 + $0x398] sm:$0xff] }
  0xd9   :  { %1338 = vmatprep.subr.bf16.mxu0 %v4931_v12  ;;  %1381 = vmatprep.subr.bf16.mxu1 %v4933_v13  ;;  %v560_v6 = vld [vmem:[#allocation11 + $0x3b8] sm:$0xff]  ;;  %v547_v12 = vld [vmem:[#allocation11 + $0x350] sm:$0xff] }
  0xda   :  { %1368 = vmatprep.mubr.bf16.mxu0 %v437_v4  ;;  %1411 = vmatprep.mubr.bf16.mxu1 %v437_v4  ;;  %v559_v4 = vld [vmem:[#allocation11 + $0x3b0] sm:$0xff]  ;;  %v4997_v41 = vcombine.high %v556_v5, %v560_v6  ;;  %v4996_v15 = vcombine.low %v556_v5, %v560_v6 }
  0xdb   :  { %v551_v13 = vld [vmem:[#allocation11 + $0x370] sm:$0xff]  ;;  %v4995_v14 = vcombine.high %v555_v3, %v559_v4  ;;  %v4994_v44 = vcombine.low %v555_v3, %v559_v4 }
  0xdc   :  { %1339 = vmatpush1.bf16.msra.mxu0 %v4930_v38  ;;  %1382 = vmatpush1.bf16.msra.mxu1 %v4932_v40  ;;  %v548_v38 = vld [vmem:[#allocation11 + $0x358] sm:$0xff]  ;;  %v4987_v20 = vcombine.high %v547_v12, %v551_v13  ;;  %v4986_v24 = vcombine.low %v547_v12, %v551_v13 }
  0xdd   :  { %1340 = vmatprep.subr.bf16.mxu0 %v4923_v16  ;;  %1383 = vmatprep.subr.bf16.mxu1 %v4925_v17  ;;  %v552_v40 = vld [vmem:[#allocation11 + $0x378] sm:$0xff]  ;;  %v539_v16 = vld [vmem:[#allocation11 + $0x310] sm:$0xff] }
  0xde   :  { %v543_v17 = vld [vmem:[#allocation11 + $0x330] sm:$0xff]  ;;  %v4989_v23 = vcombine.high %v548_v38, %v552_v40  ;;  %v4988_v25 = vcombine.low %v548_v38, %v552_v40 }
  0xdf   :  { %v4979_v30 = vcombine.high %v539_v16, %v543_v17  ;;  %v4978_v32 = vcombine.low %v539_v16, %v543_v17  ;;  %v5462_v3 = vld [vmem:[#allocation13 + $0x74] ss:$8 sps:$4 sm:$0xff]   ;;  %v5460_v5 = vld [vmem:[#allocation13 + $0x70] ss:$8 sps:$4 sm:$0xff]  }
  0xe0   :  { %1341 = vmatpush1.bf16.msra.mxu0 %v4922_v18  ;;  %1384 = vmatpush1.bf16.msra.mxu1 %v4924_v19  ;;  %v540_v18 = vld [vmem:[#allocation11 + $0x318] sm:$0xff] }
  0xe1   :  { %1342 = vmatprep.subr.bf16.mxu0 %v4915_v26  ;;  %1385 = vmatprep.subr.bf16.mxu1 %v4917_v27  ;;  %v544_v19 = vld [vmem:[#allocation11 + $0x338] sm:$0xff]  ;;  %v531_v26 = vld [vmem:[#allocation11 + $0x2d0] sm:$0xff] }
  0xe2   :  { %v535_v27 = vld [vmem:[#allocation11 + $0x2f0] sm:$0xff]  ;;  %v4981_v31 = vcombine.high %v540_v18, %v544_v19  ;;  %v4980_v33 = vcombine.low %v540_v18, %v544_v19  ;;  %v5492_v19 = vld [vmem:[#allocation13 + $0x24] ss:$8 sps:$4 sm:$0xff]  }
  0xe3   :  { %v4971_v43 = vcombine.high %v531_v26, %v535_v27  ;;  %v4970_v47 = vcombine.low %v531_v26, %v535_v27  ;;  %v5465_v4 = vld [vmem:[#allocation13 + $0x174] ss:$8 sps:$4 sm:$0xff]   ;;  %v5463_v6 = vld [vmem:[#allocation13 + $0x170] ss:$8 sps:$4 sm:$0xff]  }
  0xe4   :  { %1343 = vmatpush1.bf16.msra.mxu0 %v4914_v28  ;;  %1386 = vmatpush1.bf16.msra.mxu1 %v4916_v29  ;;  %v532_v28 = vld [vmem:[#allocation11 + $0x2d8] sm:$0xff] }
  0xe5   :  { %1344 = vmatprep.subr.bf16.mxu0 %v4907_v34  ;;  %1387 = vmatprep.subr.bf16.mxu1 %v4909_v35  ;;  %v536_v29 = vld [vmem:[#allocation11 + $0x2f8] sm:$0xff]  ;;  %v523_v34 = vld [vmem:[#allocation11 + $0x290] sm:$0xff] }
  0xe6   :  { %v527_v35 = vld [vmem:[#allocation11 + $0x2b0] sm:$0xff]  ;;  %v4973_v46 = vcombine.high %v532_v28, %v536_v29  ;;  %v4972_v48 = vcombine.low %v532_v28, %v536_v29  ;;  %v5504_v29 = vld [vmem:[#allocation13 + $0x4] ss:$8 sps:$4 sm:$0xff]  }
  0xe7   :  { %v4963_v53 = vcombine.high %v523_v34, %v527_v35  ;;  %v4962_v55 = vcombine.low %v523_v34, %v527_v35  ;;  %v5474_v12 = vld [vmem:[#allocation13 + $0x54] ss:$8 sps:$4 sm:$0xff]   ;;  %v5472_v38 = vld [vmem:[#allocation13 + $0x50] ss:$8 sps:$4 sm:$0xff]  }
  0xe8   :  { %1345 = vmatpush1.bf16.msra.mxu0 %v4906_v36  ;;  %1388 = vmatpush1.bf16.msra.mxu1 %v4908_v39  ;;  %v524_v36 = vld [vmem:[#allocation11 + $0x298] sm:$0xff] }
  0xe9   :  { %1346 = vmatprep.subr.bf16.mxu0 %v4899_v49  ;;  %1389 = vmatprep.subr.bf16.mxu1 %v4901_v50  ;;  %v528_v39 = vld [vmem:[#allocation11 + $0x2b8] sm:$0xff]  ;;  %v515_v49 = vld [vmem:[#allocation11 + $0x250] sm:$0xff] }
  0xea   :  { %v519_v50 = vld [vmem:[#allocation11 + $0x270] sm:$0xff]  ;;  %v4965_v54 = vcombine.high %v524_v36, %v528_v39  ;;  %v4964_v56 = vcombine.low %v524_v36, %v528_v39  ;;  %v5516_v39 = vld [vmem:[#allocation13 + $0xe4] ss:$8 sps:$4 sm:$0xff]  }
  0xeb   :  { %v4955_v61 = vcombine.high %v515_v49, %v519_v50  ;;  %v4954_v21 = vcombine.low %v515_v49, %v519_v50  ;;  %v5477_v13 = vld [vmem:[#allocation13 + $0x154] ss:$8 sps:$4 sm:$0xff]   ;;  %v5475_v40 = vld [vmem:[#allocation13 + $0x150] ss:$8 sps:$4 sm:$0xff]  }
  0xec   :  { %1347 = vmatpush1.bf16.msra.mxu0 %v4898_v42  ;;  %1390 = vmatpush1.bf16.msra.mxu1 %v4900_v52  ;;  %v516_v42 = vld [vmem:[#allocation11 + $0x258] sm:$0xff] }
  0xed   :  { %1348 = vmatprep.subr.bf16.mxu0 %v4891_v57  ;;  %1391 = vmatprep.subr.bf16.mxu1 %v4893_v58  ;;  %v520_v52 = vld [vmem:[#allocation11 + $0x278] sm:$0xff]  ;;  %v507_v57 = vld [vmem:[#allocation11 + $0x210] sm:$0xff] }
  0xee   :  { %v511_v58 = vld [vmem:[#allocation11 + $0x230] sm:$0xff]  ;;  %v4957_v62 = vcombine.high %v516_v42, %v520_v52  ;;  %v4956_v63 = vcombine.low %v516_v42, %v520_v52  ;;  %v5528_v52 = vld [vmem:[#allocation13 + $0xc4] ss:$8 sps:$4 sm:$0xff]  }
  0xef   :  { %v5489_v16 = vld [vmem:[#allocation13 + $0x134] ss:$8 sps:$4 sm:$0xff]   ;;  %v5484_v17 = vld [vmem:[#allocation13 + $0x30] ss:$8 sps:$4 sm:$0xff]  }
  0xf0   :  { %1349 = vmatpush1.bf16.msra.mxu0 %v4890_v59  ;;  %1392 = vmatpush1.bf16.msra.mxu1 %v4892_v60  ;;  %v508_v59 = vld [vmem:[#allocation11 + $0x218] sm:$0xff] }
  0xf1   :  { %1350 = vmatprep.subr.bf16.mxu0 %v4883_v0  ;;  %1393 = vmatprep.subr.bf16.mxu1 %v4885_v1  ;;  %v512_v60 = vld [vmem:[#allocation11 + $0x238] sm:$0xff]  ;;  %v4947_v0 = vcombine.high %v507_v57, %v511_v58 }
  0xf2   :  { %v4949_v1 = vcombine.high %v508_v59, %v512_v60  ;;  %v5487_v18 = vld [vmem:[#allocation13 + $0x130] ss:$8 sps:$4 sm:$0xff]   ;;  %v5501_v26 = vld [vmem:[#allocation13 + $0x114] ss:$8 sps:$4 sm:$0xff]  }
  0xf3   :  { %v5496_v27 = vld [vmem:[#allocation13 + $0x10] ss:$8 sps:$4 sm:$0xff]   ;;  %v5513_v34 = vld [vmem:[#allocation13 + $0x1f4] ss:$8 sps:$4 sm:$0xff]  }
  0xf4   :  { %1351 = vmatpush1.bf16.msra.mxu0 %v4882_v22  ;;  %1394 = vmatpush1.bf16.msra.mxu1 %v4884_v2  ;;  %v4946_v22 = vcombine.low %v507_v57, %v511_v58  ;;  %v4948_v2 = vcombine.low %v508_v59, %v512_v60  ;;  %v5499_v28 = vld [vmem:[#allocation13 + $0x110] ss:$8 sps:$4 sm:$0xff]   ;;  %v5525_v49 = vld [vmem:[#allocation13 + $0x1d4] ss:$8 sps:$4 sm:$0xff]   ;;  %v5540_v60 = vld [vmem:[#allocation13 + $0xa4] ss:$8 sps:$4 sm:$0xff]  }
  0xf5   :  { %1352 = vmatprep.subr.bf16.mxu0 %v5003_v7  ;;  %1395 = vmatprep.subr.bf16.mxu1 %v5005_v8  ;;  %v5468_v7 = vld [vmem:[#allocation13 + $0x64] ss:$8 sps:$4 sm:$0xff]   ;;  %v5508_v35 = vld [vmem:[#allocation13 + $0xf0] ss:$8 sps:$4 sm:$0xff]   ;;  %v5537_v57 = vld [vmem:[#allocation13 + $0x1b4] ss:$8 sps:$4 sm:$0xff]  }
  0xf6   :  { %v5471_v8 = vld [vmem:[#allocation13 + $0x164] ss:$8 sps:$4 sm:$0xff]   ;;  %v5511_v36 = vld [vmem:[#allocation13 + $0x1f0] ss:$8 sps:$4 sm:$0xff]  }
  0xf7   :  { %v5520_v50 = vld [vmem:[#allocation13 + $0xd0] ss:$8 sps:$4 sm:$0xff]  }
  0xf8   :  { %1353 = vmatpush2.bf16.msra.mxu0 %v5002_v9  ;;  %1396 = vmatpush2.bf16.msra.mxu1 %v5004_v10  ;;  %v5466_v9 = vld [vmem:[#allocation13 + $0x60] ss:$8 sps:$4 sm:$0xff]   ;;  %v5523_v42 = vld [vmem:[#allocation13 + $0x1d0] ss:$8 sps:$4 sm:$0xff]  }
  0xf9   :  { %1354 = vmatprep.subr.bf16.mxu0 %v4995_v14  ;;  %1397 = vmatprep.subr.bf16.mxu1 %v4997_v41  ;;  %v5469_v10 = vld [vmem:[#allocation13 + $0x160] ss:$8 sps:$4 sm:$0xff]   ;;  %v5480_v14 = vld [vmem:[#allocation13 + $0x44] ss:$8 sps:$4 sm:$0xff]   ;;  %v5532_v58 = vld [vmem:[#allocation13 + $0xb0] ss:$8 sps:$4 sm:$0xff]  }
  0xfa   :  { %v5483_v41 = vld [vmem:[#allocation13 + $0x144] ss:$8 sps:$4 sm:$0xff]   ;;  %v5535_v59 = vld [vmem:[#allocation13 + $0x1b0] ss:$8 sps:$4 sm:$0xff]  }
  0xfc   :  { %1355 = vmatpush2.bf16.msra.mxu0 %v4994_v44  ;;  %1398 = vmatpush2.bf16.msra.mxu1 %v4996_v15  ;;  %v5478_v44 = vld [vmem:[#allocation13 + $0x40] ss:$8 sps:$4 sm:$0xff]   ;;  %v5486_v15 = vld [vmem:[#allocation13 + $0x34] ss:$8 sps:$4 sm:$0xff]  }
  0xfd   :  { %1356 = vmatprep.subr.bf16.mxu0 %v4987_v20  ;;  %1399 = vmatprep.subr.bf16.mxu1 %v4989_v23  ;;  %v5495_v20 = vld [vmem:[#allocation13 + $0x124] ss:$8 sps:$4 sm:$0xff]   ;;  %v5490_v23 = vld [vmem:[#allocation13 + $0x20] ss:$8 sps:$4 sm:$0xff]  }
 0x100   :  { %1357 = vmatpush2.bf16.msra.mxu0 %v4986_v24  ;;  %1400 = vmatpush2.bf16.msra.mxu1 %v4988_v25  ;;  %v5493_v24 = vld [vmem:[#allocation13 + $0x120] ss:$8 sps:$4 sm:$0xff]   ;;  %v5498_v25 = vld [vmem:[#allocation13 + $0x14] ss:$8 sps:$4 sm:$0xff]  }
 0x101   :  { %1358 = vmatprep.subr.bf16.mxu0 %v4979_v30  ;;  %1401 = vmatprep.subr.bf16.mxu1 %v4981_v31  ;;  %v5507_v30 = vld [vmem:[#allocation13 + $0x104] ss:$8 sps:$4 sm:$0xff]   ;;  %v5502_v31 = vld [vmem:[#allocation13] ss:$8 sps:$4 sm:$0xff]  }
 0x104   :  { %1359 = vmatpush2.bf16.msra.mxu0 %v4978_v32  ;;  %1402 = vmatpush2.bf16.msra.mxu1 %v4980_v33  ;;  %v5505_v32 = vld [vmem:[#allocation13 + $0x100] ss:$8 sps:$4 sm:$0xff]   ;;  %v5510_v33 = vld [vmem:[#allocation13 + $0xf4] ss:$8 sps:$4 sm:$0xff]  }
 0x105   :  { %1360 = vmatprep.subr.bf16.mxu0 %v4971_v43  ;;  %1403 = vmatprep.subr.bf16.mxu1 %v4973_v46  ;;  %v5519_v43 = vld [vmem:[#allocation13 + $0x1e4] ss:$8 sps:$4 sm:$0xff]   ;;  %v5514_v46 = vld [vmem:[#allocation13 + $0xe0] ss:$8 sps:$4 sm:$0xff]  }
 0x108   :  { %1361 = vmatpush2.bf16.msra.mxu0 %v4970_v47  ;;  %1404 = vmatpush2.bf16.msra.mxu1 %v4972_v48  ;;  %v5517_v47 = vld [vmem:[#allocation13 + $0x1e0] ss:$8 sps:$4 sm:$0xff]   ;;  %v5522_v48 = vld [vmem:[#allocation13 + $0xd4] ss:$8 sps:$4 sm:$0xff]  }
 0x109   :  { %1362 = vmatprep.subr.bf16.mxu0 %v4963_v53  ;;  %1405 = vmatprep.subr.bf16.mxu1 %v4965_v54  ;;  %v5531_v53 = vld [vmem:[#allocation13 + $0x1c4] ss:$8 sps:$4 sm:$0xff]   ;;  %v5526_v54 = vld [vmem:[#allocation13 + $0xc0] ss:$8 sps:$4 sm:$0xff]  }
 0x10c   :  { %1363 = vmatpush2.bf16.msra.mxu0 %v4962_v55  ;;  %1406 = vmatpush2.bf16.msra.mxu1 %v4964_v56  ;;  %v5529_v55 = vld [vmem:[#allocation13 + $0x1c0] ss:$8 sps:$4 sm:$0xff]   ;;  %v5534_v56 = vld [vmem:[#allocation13 + $0xb4] ss:$8 sps:$4 sm:$0xff]  }
 0x10d   :  { %1364 = vmatprep.subr.bf16.mxu0 %v4955_v61  ;;  %1407 = vmatprep.subr.bf16.mxu1 %v4957_v62  ;;  %v5543_v61 = vld [vmem:[#allocation13 + $0x1a4] ss:$8 sps:$4 sm:$0xff]   ;;  %v5538_v62 = vld [vmem:[#allocation13 + $0xa0] ss:$8 sps:$4 sm:$0xff]  }
 0x110   :  { %1365 = vmatpush2.bf16.msra.mxu0 %v4954_v21  ;;  %1408 = vmatpush2.bf16.msra.mxu1 %v4956_v63  ;;  %v5541_v21 = vld [vmem:[#allocation13 + $0x1a0] ss:$8 sps:$4 sm:$0xff]   ;;  %v5546_v63 = vld [vmem:[#allocation13 + $0x94] ss:$8 sps:$4 sm:$0xff]  }
 0x111   :  { %1366 = vmatprep.subr.bf16.mxu0 %v4947_v0  ;;  %1409 = vmatprep.subr.bf16.mxu1 %v4949_v1  ;;  %v5549_v0 = vld [vmem:[#allocation13 + $0x194] ss:$8 sps:$4 sm:$0xff]   ;;  %v5544_v1 = vld [vmem:[#allocation13 + $0x90] ss:$8 sps:$4 sm:$0xff]  }
 0x114   :  { %1367 = vmatpush2.bf16.msra.mxu0 %v4946_v22  ;;  %1410 = vmatpush2.bf16.msra.mxu1 %v4948_v2  ;;  %v5547_v22 = vld [vmem:[#allocation13 + $0x190] ss:$8 sps:$4 sm:$0xff]   ;;  %v5552_v2 = vld [vmem:[#allocation13 + $0x84] ss:$8 sps:$4 sm:$0xff]  }
 0x115   :  { %2225 = vmatprep.subr.bf16.mxu0 %v5462_v3  ;;  %2268 = vmatprep.subr.bf16.mxu1 %v5465_v4  ;;  %v5555_v3 = vld [vmem:[#allocation13 + $0x184] ss:$8 sps:$4 sm:$0xff]   ;;  %v5550_v4 = vld [vmem:[#allocation13 + $0x80] ss:$8 sps:$4 sm:$0xff]  }
 0x117   :  { %1369 = vmatmul.mubr.bf16.vlgmr.msra.gmra.mxu0 %v6336_v11  ;;  %1412 = vmatmul.mubr.bf16.vlgmr.msra.gmra.mxu1 %v6336_v11  ;;  %v5481_v11 = vld [vmem:[#allocation13 + $0x140] ss:$8 sps:$4 sm:$0xff]  }
 0x118   :  { %2226 = vmatpush1.bf16.msra.mxu0 %v5460_v5  ;;  %2269 = vmatpush1.bf16.msra.mxu1 %v5463_v6  ;;  %v5553_v5 = vld [vmem:[#allocation13 + $0x180] ss:$8 sps:$4 sm:$0xff]   ;;  %v5558_v6 = vld [vmem:[#allocation13 + $0x274] ss:$8 sps:$4 sm:$0xff]  }
 0x119   :  { %2227 = vmatprep.subr.bf16.mxu0 %v5468_v7  ;;  %2270 = vmatprep.subr.bf16.mxu1 %v5471_v8  ;;  %v5561_v7 = vld [vmem:[#allocation13 + $0x374] ss:$8 sps:$4 sm:$0xff]   ;;  %v584_v8 = vsub.s32 3, %v6318_v51 }
 0x11c   :  { %2228 = vmatpush1.bf16.msra.mxu0 %v5466_v9  ;;  %2271 = vmatpush1.bf16.msra.mxu1 %v5469_v10  ;;  %v580_v9 = vsub.s32 2, %v6318_v51  ;;  %v6344_v10 = vld [vmem:[#allocation10] ss:$2 sm:$0xff] }
 0x11d   :  { %2229 = vmatprep.subr.bf16.mxu0 %v5474_v12  ;;  %2272 = vmatprep.subr.bf16.mxu1 %v5477_v13 }
 0x120   :  { %2230 = vmatpush1.bf16.msra.mxu0 %v5472_v38  ;;  %2273 = vmatpush1.bf16.msra.mxu1 %v5475_v40  ;;  %v577_v38 = vrot.slane %v6344_v10, %v6321_v37  ;;  %v585_v40 = vrot.slane %v6344_v10, %v584_v8 }
 0x121   :  { %2231 = vmatprep.subr.bf16.mxu0 %v5480_v14  ;;  %2274 = vmatprep.subr.bf16.mxu1 %v5483_v41  ;;  %v573_v14 = vrot.slane %v6344_v10, %v6324_v45  ;;  %v581_v41 = vrot.slane %v6344_v10, %v580_v9 }
 0x124   :  { %2232 = vmatpush1.bf16.msra.mxu0 %v5478_v44  ;;  %2275 = vmatpush1.bf16.msra.mxu1 %v5481_v11 }
 0x125   :  { %2233 = vmatprep.subr.bf16.mxu0 %v5486_v15  ;;  %2276 = vmatprep.subr.bf16.mxu1 %v5489_v16 }
 0x128   :  { %2234 = vmatpush1.bf16.msra.mxu0 %v5484_v17  ;;  %2277 = vmatpush1.bf16.msra.mxu1 %v5487_v18 }
 0x129   :  { %2235 = vmatprep.subr.bf16.mxu0 %v5492_v19  ;;  %2278 = vmatprep.subr.bf16.mxu1 %v5495_v20 }
 0x12c   :  { %2236 = vmatpush1.bf16.msra.mxu0 %v5490_v23  ;;  %2279 = vmatpush1.bf16.msra.mxu1 %v5493_v24 }
 0x12d   :  { %2237 = vmatprep.subr.bf16.mxu0 %v5498_v25  ;;  %2280 = vmatprep.subr.bf16.mxu1 %v5501_v26 }
 0x130   :  { %2238 = vmatpush1.bf16.msra.mxu0 %v5496_v27  ;;  %2281 = vmatpush1.bf16.msra.mxu1 %v5499_v28 }
 0x131   :  { %2239 = vmatprep.subr.bf16.mxu0 %v5504_v29  ;;  %2282 = vmatprep.subr.bf16.mxu1 %v5507_v30 }
 0x134   :  { %2240 = vmatpush1.bf16.msra.mxu0 %v5502_v31  ;;  %2283 = vmatpush1.bf16.msra.mxu1 %v5505_v32 }
 0x135   :  { %2241 = vmatprep.subr.bf16.mxu0 %v5510_v33  ;;  %2284 = vmatprep.subr.bf16.mxu1 %v5513_v34 }
 0x138   :  { %2242 = vmatpush2.bf16.msra.mxu0 %v5508_v35  ;;  %2285 = vmatpush2.bf16.msra.mxu1 %v5511_v36 }
 0x139   :  { %2243 = vmatprep.subr.bf16.mxu0 %v5516_v39  ;;  %2286 = vmatprep.subr.bf16.mxu1 %v5519_v43 }
 0x13c   :  { %2244 = vmatpush2.bf16.msra.mxu0 %v5514_v46  ;;  %2287 = vmatpush2.bf16.msra.mxu1 %v5517_v47  ;;  %v5556_v46 = vld [vmem:[#allocation13 + $0x270] ss:$8 sps:$4 sm:$0xff]  }
 0x13d   :  { %2245 = vmatprep.subr.bf16.mxu0 %v5522_v48  ;;  %2288 = vmatprep.subr.bf16.mxu1 %v5525_v49  ;;  %v5559_v47 = vld [vmem:[#allocation13 + $0x370] ss:$8 sps:$4 sm:$0xff]  }
 0x140   :  { %2246 = vmatpush2.bf16.msra.mxu0 %v5520_v50  ;;  %2289 = vmatpush2.bf16.msra.mxu1 %v5523_v42  ;;  %v5564_v50 = vld [vmem:[#allocation13 + $0x264] ss:$8 sps:$4 sm:$0xff]  }
 0x141   :  { %2247 = vmatprep.subr.bf16.mxu0 %v5528_v52  ;;  %2290 = vmatprep.subr.bf16.mxu1 %v5531_v53  ;;  %v5567_v42 = vld [vmem:[#allocation13 + $0x364] ss:$8 sps:$4 sm:$0xff]   ;;  %v5562_v52 = vld [vmem:[#allocation13 + $0x260] ss:$8 sps:$4 sm:$0xff]  }
 0x142   :  { %v5565_v53 = vld [vmem:[#allocation13 + $0x360] ss:$8 sps:$4 sm:$0xff]  }
 0x144   :  { %2248 = vmatpush2.bf16.msra.mxu0 %v5526_v54  ;;  %2291 = vmatpush2.bf16.msra.mxu1 %v5529_v55  ;;  %v5570_v54 = vld [vmem:[#allocation13 + $0x254] ss:$8 sps:$4 sm:$0xff]  }
 0x145   :  { %2249 = vmatprep.subr.bf16.mxu0 %v5534_v56  ;;  %2292 = vmatprep.subr.bf16.mxu1 %v5537_v57  ;;  %v5573_v55 = vld [vmem:[#allocation13 + $0x354] ss:$8 sps:$4 sm:$0xff]   ;;  %v5568_v56 = vld [vmem:[#allocation13 + $0x250] ss:$8 sps:$4 sm:$0xff]  }
 0x146   :  { %v5571_v57 = vld [vmem:[#allocation13 + $0x350] ss:$8 sps:$4 sm:$0xff]  }
 0x148   :  { %2250 = vmatpush2.bf16.msra.mxu0 %v5532_v58  ;;  %2293 = vmatpush2.bf16.msra.mxu1 %v5535_v59  ;;  %v5576_v58 = vld [vmem:[#allocation13 + $0x244] ss:$8 sps:$4 sm:$0xff]  }
 0x149   :  { %2251 = vmatprep.subr.bf16.mxu0 %v5540_v60  ;;  %2294 = vmatprep.subr.bf16.mxu1 %v5543_v61  ;;  %v5579_v59 = vld [vmem:[#allocation13 + $0x344] ss:$8 sps:$4 sm:$0xff]   ;;  %v5574_v60 = vld [vmem:[#allocation13 + $0x240] ss:$8 sps:$4 sm:$0xff]  }
 0x14a   :  { %v5577_v61 = vld [vmem:[#allocation13 + $0x340] ss:$8 sps:$4 sm:$0xff]  }
 0x14c   :  { %2252 = vmatpush2.bf16.msra.mxu0 %v5538_v62  ;;  %2295 = vmatpush2.bf16.msra.mxu1 %v5541_v21  ;;  %v5582_v62 = vld [vmem:[#allocation13 + $0x234] ss:$8 sps:$4 sm:$0xff]  }
 0x14d   :  { %2253 = vmatprep.subr.bf16.mxu0 %v5546_v63  ;;  %2296 = vmatprep.subr.bf16.mxu1 %v5549_v0  ;;  %v5585_v21 = vld [vmem:[#allocation13 + $0x334] ss:$8 sps:$4 sm:$0xff]   ;;  %v5580_v63 = vld [vmem:[#allocation13 + $0x230] ss:$8 sps:$4 sm:$0xff]  }
 0x14e   :  { %v5583_v0 = vld [vmem:[#allocation13 + $0x330] ss:$8 sps:$4 sm:$0xff]  }
 0x150   :  { %2254 = vmatpush2.bf16.msra.mxu0 %v5544_v1  ;;  %2297 = vmatpush2.bf16.msra.mxu1 %v5547_v22  ;;  %v5588_v1 = vld [vmem:[#allocation13 + $0x224] ss:$8 sps:$4 sm:$0xff]  }
 0x151   :  { %2255 = vmatprep.subr.bf16.mxu0 %v5552_v2  ;;  %2298 = vmatprep.subr.bf16.mxu1 %v5555_v3  ;;  %v5591_v22 = vld [vmem:[#allocation13 + $0x324] ss:$8 sps:$4 sm:$0xff]   ;;  %v5586_v2 = vld [vmem:[#allocation13 + $0x220] ss:$8 sps:$4 sm:$0xff]  }
 0x152   :  { %v5589_v3 = vld [vmem:[#allocation13 + $0x320] ss:$8 sps:$4 sm:$0xff]  }
 0x154   :  { %2256 = vmatpush2.bf16.msra.mxu0 %v5550_v4  ;;  %2299 = vmatpush2.bf16.msra.mxu1 %v5553_v5  ;;  %v5594_v4 = vld [vmem:[#allocation13 + $0x214] ss:$8 sps:$4 sm:$0xff]  }
 0x155   :  { %2311 = vmatprep.subr.bf16.mxu0 %v5558_v6  ;;  %2354 = vmatprep.subr.bf16.mxu1 %v5561_v7  ;;  %v5597_v5 = vld [vmem:[#allocation13 + $0x314] ss:$8 sps:$4 sm:$0xff]   ;;  %v5592_v6 = vld [vmem:[#allocation13 + $0x210] ss:$8 sps:$4 sm:$0xff]  }
 0x156   :  { %v5595_v7 = vld [vmem:[#allocation13 + $0x310] ss:$8 sps:$4 sm:$0xff]  }
 0x197   :  { %v1284_v12 = vpop.f32.mrf.mxu0  ;;  %v1327_v13 = vpop.f32.mrf.mxu1 }
 0x198   :  { %v1285_v23 = vadd.f32 %v1284_v12, %v573_v14  ;;  %v1328_v24 = vadd.f32 %v1327_v13, %v581_v41  ;;  %v5600_v12 = vld [vmem:[#allocation13 + $0x204] ss:$8 sps:$4 sm:$0xff]  }
 0x199   :  { %v1286_v44 = vpop.f32.mrf.mxu0  ;;  %v1329_v11 = vpop.f32.mrf.mxu1  ;;  %v5603_v13 = vld [vmem:[#allocation13 + $0x304] ss:$8 sps:$4 sm:$0xff]  }
 0x19a   :  { %v1287_v17 = vadd.f32 %v1286_v44, %v577_v38  ;;  %v1330_v18 = vadd.f32 %v1329_v11, %v585_v40  ;;  %v1422_v35 = vmax.f32 %v1285_v23, 0.0  ;;  %v1424_v36 = vmax.f32 %v1328_v24, 0.0  ;;  %v5604_v44 = vld [vmem:[#allocation13 + $0x2f0] ss:$8 sps:$4 sm:$0xff]  }
 0x19b   :  { %v1288_v15 = vpop.f32.mrf.mxu0  ;;  %v1331_v16 = vpop.f32.mrf.mxu1  ;;  %v5607_v11 = vld [vmem:[#allocation13 + $0x3f0] ss:$8 sps:$4 sm:$0xff]  }
 0x19c   :  { %v1289_v19 = vadd.f32 %v1288_v15, %v573_v14  ;;  %v1332_v20 = vadd.f32 %v1331_v16, %v581_v41  ;;  %v1423_v31 = vmax.f32 %v1287_v17, 0.0  ;;  %v1425_v32 = vmax.f32 %v1330_v18, 0.0  ;;  %v5606_v14 = vld [vmem:[#allocation13 + $0x2f4] ss:$8 sps:$4 sm:$0xff]   ;;  %v5612_v15 = vld [vmem:[#allocation13 + $0x2e4] ss:$8 sps:$4 sm:$0xff]  }
 0x19d   :  { %v1290_v25 = vpop.f32.mrf.mxu0  ;;  %v1333_v26 = vpop.f32.mrf.mxu1  ;;  %v5609_v41 = vld [vmem:[#allocation13 + $0x3f4] ss:$8 sps:$4 sm:$0xff]   ;;  %v5615_v16 = vld [vmem:[#allocation13 + $0x3e4] ss:$8 sps:$4 sm:$0xff]   ;;  %v5610_v17 = vld [vmem:[#allocation13 + $0x2e0] ss:$8 sps:$4 sm:$0xff]  }
 0x19e   :  { %v1291_v27 = vadd.f32 %v1290_v25, %v577_v38  ;;  %v1334_v28 = vadd.f32 %v1333_v26, %v585_v40  ;;  %v1430_v29 = vmax.f32 %v1289_v19, 0.0  ;;  %v1432_v30 = vmax.f32 %v1332_v20, 0.0  ;;  %v5598_v38 = vld [vmem:[#allocation13 + $0x200] ss:$8 sps:$4 sm:$0xff]   ;;  %v5618_v19 = vld [vmem:[#allocation13 + $0x2d4] ss:$8 sps:$4 sm:$0xff]  }
 0x19f   :  { %v5601_v40 = vld [vmem:[#allocation13 + $0x300] ss:$8 sps:$4 sm:$0xff]   ;;  %v5621_v20 = vld [vmem:[#allocation13 + $0x3d4] ss:$8 sps:$4 sm:$0xff]   ;;  %v5616_v23 = vld [vmem:[#allocation13 + $0x2d0] ss:$8 sps:$4 sm:$0xff]  }
 0x1a0   :  { %v1431_v33 = vmax.f32 %v1291_v27, 0.0  ;;  %v1433_v34 = vmax.f32 %v1334_v28, 0.0  ;;  %v1438_v48 = vpack.c.bf16 %v1430_v29, %v1422_v35  ;;  %v1440_v49 = vpack.c.bf16 %v1432_v30, %v1424_v36  ;;  %v5613_v18 = vld [vmem:[#allocation13 + $0x3e0] ss:$8 sps:$4 sm:$0xff]   ;;  %v5619_v24 = vld [vmem:[#allocation13 + $0x3d0] ss:$8 sps:$4 sm:$0xff]  }
 0x1a1   :  { %v5624_v25 = vld [vmem:[#allocation13 + $0x2c4] ss:$8 sps:$4 sm:$0xff]   ;;  %v5622_v27 = vld [vmem:[#allocation13 + $0x2c0] ss:$8 sps:$4 sm:$0xff]   ;;  %v5630_v29 = vld [vmem:[#allocation13 + $0x2b4] ss:$8 sps:$4 sm:$0xff]  }
 0x1a2   :  { %v1439_v39 = vpack.c.bf16 %v1431_v33, %v1423_v31  ;;  %v1441_v43 = vpack.c.bf16 %v1433_v34, %v1425_v32  ;;  %v5627_v26 = vld [vmem:[#allocation13 + $0x3c4] ss:$8 sps:$4 sm:$0xff]   ;;  %v5625_v28 = vld [vmem:[#allocation13 + $0x3c0] ss:$8 sps:$4 sm:$0xff]   ;;  %v5633_v30 = vld [vmem:[#allocation13 + $0x3b4] ss:$8 sps:$4 sm:$0xff]  }
 0x1a3   :  { %v5628_v31 = vld [vmem:[#allocation13 + $0x2b0] ss:$8 sps:$4 sm:$0xff]   ;;  %v5636_v33 = vld [vmem:[#allocation13 + $0x2a4] ss:$8 sps:$4 sm:$0xff]   ;;  %v592_v35 = vsub.s32 5, %v6318_v51  ;;  %v600_v36 = vsub.s32 7, %v6318_v51 }
 0x1a4   :  { %2257 = vmatprep.mubr.bf16.mxu0 %v1439_v39  ;;  %2300 = vmatprep.mubr.bf16.mxu1 %v1441_v43  ;;  %v5631_v32 = vld [vmem:[#allocation13 + $0x3b0] ss:$8 sps:$4 sm:$0xff]   ;;  %v5639_v34 = vld [vmem:[#allocation13 + $0x3a4] ss:$8 sps:$4 sm:$0xff]   ;;  %v588_v39 = vsub.s32 4, %v6318_v51  ;;  %v596_v43 = vsub.s32 6, %v6318_v51 }
 0x1a5   :  { %2258 = vmatmul.mubr.bf16.vlgmr.msra.gmra.mxu0 %v1438_v48  ;;  %2301 = vmatmul.mubr.bf16.vlgmr.msra.gmra.mxu1 %v1440_v49 }
 0x1a6   :  { %2312 = vmatpush1.bf16.msra.mxu0 %v5556_v46  ;;  %2355 = vmatpush1.bf16.msra.mxu1 %v5559_v47  ;;  %v5634_v46 = vld [vmem:[#allocation13 + $0x2a0] ss:$8 sps:$4 sm:$0xff]  }
 0x1a7   :  { %2313 = vmatprep.subr.bf16.mxu0 %v5564_v50  ;;  %2356 = vmatprep.subr.bf16.mxu1 %v5567_v42  ;;  %v5637_v47 = vld [vmem:[#allocation13 + $0x3a0] ss:$8 sps:$4 sm:$0xff]   ;;  %v5642_v50 = vld [vmem:[#allocation13 + $0x294] ss:$8 sps:$4 sm:$0xff]  }
 0x1a8   :  { %v5645_v42 = vld [vmem:[#allocation13 + $0x394] ss:$8 sps:$4 sm:$0xff]  }
 0x1aa   :  { %2314 = vmatpush1.bf16.msra.mxu0 %v5562_v52  ;;  %2357 = vmatpush1.bf16.msra.mxu1 %v5565_v53  ;;  %v593_v52 = vrot.slane %v6344_v10, %v592_v35  ;;  %v601_v53 = vrot.slane %v6344_v10, %v600_v36 }
 0x1ab   :  { %2315 = vmatprep.subr.bf16.mxu0 %v5570_v54  ;;  %2358 = vmatprep.subr.bf16.mxu1 %v5573_v55  ;;  %v589_v54 = vrot.slane %v6344_v10, %v588_v39  ;;  %v597_v55 = vrot.slane %v6344_v10, %v596_v43 }
 0x1ae   :  { %2316 = vmatpush1.bf16.msra.mxu0 %v5568_v56  ;;  %2359 = vmatpush1.bf16.msra.mxu1 %v5571_v57 }
 0x1af   :  { %2317 = vmatprep.subr.bf16.mxu0 %v5576_v58  ;;  %2360 = vmatprep.subr.bf16.mxu1 %v5579_v59  ;;  %v5640_v58 = vld [vmem:[#allocation13 + $0x290] ss:$8 sps:$4 sm:$0xff]  }
 0x1b0   :  { %v5643_v59 = vld [vmem:[#allocation13 + $0x390] ss:$8 sps:$4 sm:$0xff]  }
 0x1b2   :  { %2318 = vmatpush1.bf16.msra.mxu0 %v5574_v60  ;;  %2361 = vmatpush1.bf16.msra.mxu1 %v5577_v61 }
 0x1b3   :  { %2319 = vmatprep.subr.bf16.mxu0 %v5582_v62  ;;  %2362 = vmatprep.subr.bf16.mxu1 %v5585_v21  ;;  %v5648_v62 = vld [vmem:[#allocation13 + $0x284] ss:$8 sps:$4 sm:$0xff]  }
 0x1b4   :  { %v5651_v21 = vld [vmem:[#allocation13 + $0x384] ss:$8 sps:$4 sm:$0xff]  }
 0x1b6   :  { %2320 = vmatpush1.bf16.msra.mxu0 %v5580_v63  ;;  %2363 = vmatpush1.bf16.msra.mxu1 %v5583_v0 }
 0x1b7   :  { %2321 = vmatprep.subr.bf16.mxu0 %v5588_v1  ;;  %2364 = vmatprep.subr.bf16.mxu1 %v5591_v22 }
 0x1ba   :  { %2322 = vmatpush1.bf16.msra.mxu0 %v5586_v2  ;;  %2365 = vmatpush1.bf16.msra.mxu1 %v5589_v3 }
 0x1bb   :  { %2323 = vmatprep.subr.bf16.mxu0 %v5594_v4  ;;  %2366 = vmatprep.subr.bf16.mxu1 %v5597_v5 }
 0x1be   :  { %2324 = vmatpush1.bf16.msra.mxu0 %v5592_v6  ;;  %2367 = vmatpush1.bf16.msra.mxu1 %v5595_v7  ;;  %v5646_v7 = vld [vmem:[#allocation13 + $0x280] ss:$8 sps:$4 sm:$0xff]  }
 0x1bf   :  { %2325 = vmatprep.subr.bf16.mxu0 %v5600_v12  ;;  %2368 = vmatprep.subr.bf16.mxu1 %v5603_v13  ;;  %v5649_v12 = vld [vmem:[#allocation13 + $0x380] ss:$8 sps:$4 sm:$0xff]  }
 0x1c2   :  { %2326 = vmatpush1.bf16.msra.mxu0 %v5598_v38  ;;  %2369 = vmatpush1.bf16.msra.mxu1 %v5601_v40 }
 0x1c3   :  { %2327 = vmatprep.subr.bf16.mxu0 %v5606_v14  ;;  %2370 = vmatprep.subr.bf16.mxu1 %v5609_v41 }
 0x1c6   :  { %2328 = vmatpush2.bf16.msra.mxu0 %v5604_v44  ;;  %2371 = vmatpush2.bf16.msra.mxu1 %v5607_v11 }
 0x1c7   :  { %2329 = vmatprep.subr.bf16.mxu0 %v5612_v15  ;;  %2372 = vmatprep.subr.bf16.mxu1 %v5615_v16 }
 0x1ca   :  { %2330 = vmatpush2.bf16.msra.mxu0 %v5610_v17  ;;  %2373 = vmatpush2.bf16.msra.mxu1 %v5613_v18 }
 0x1cb   :  { %2331 = vmatprep.subr.bf16.mxu0 %v5618_v19  ;;  %2374 = vmatprep.subr.bf16.mxu1 %v5621_v20  ;;  %v2574_v20 = vld [vmem:[#allocation11 + $0x5c0] sm:$0xff] }
 0x1ce   :  { %2332 = vmatpush2.bf16.msra.mxu0 %v5616_v23  ;;  %2375 = vmatpush2.bf16.msra.mxu1 %v5619_v24  ;;  %v2578_v23 = vld [vmem:[#allocation11 + $0x5e0] sm:$0xff]  ;;  %v2575_v24 = vld [vmem:[#allocation11 + $0x5c8] sm:$0xff] }
 0x1cf   :  { %2333 = vmatprep.subr.bf16.mxu0 %v5624_v25  ;;  %2376 = vmatprep.subr.bf16.mxu1 %v5627_v26  ;;  %v5191_v25 = vcombine.high %v2574_v20, %v2578_v23  ;;  %v2579_v26 = vld [vmem:[#allocation11 + $0x5e8] sm:$0xff] }
 0x1d2   :  { %2334 = vmatpush2.bf16.msra.mxu0 %v5622_v27  ;;  %2377 = vmatpush2.bf16.msra.mxu1 %v5625_v28  ;;  %v5190_v27 = vcombine.low %v2574_v20, %v2578_v23  ;;  %v5192_v28 = vcombine.low %v2575_v24, %v2579_v26  ;;  %v2518_v23 = vld [vmem:[#allocation11 + $0x400] sm:$0xff] }
 0x1d3   :  { %2335 = vmatprep.subr.bf16.mxu0 %v5630_v29  ;;  %2378 = vmatprep.subr.bf16.mxu1 %v5633_v30  ;;  %v5193_v29 = vcombine.high %v2575_v24, %v2579_v26  ;;  %v2566_v30 = vld [vmem:[#allocation11 + $0x580] sm:$0xff] }
 0x1d4   :  { %v2522_v24 = vld [vmem:[#allocation11 + $0x420] sm:$0xff] }
 0x1d5   :  { %v5135_v26 = vcombine.high %v2518_v23, %v2522_v24 }
 0x1d6   :  { %2336 = vmatpush2.bf16.msra.mxu0 %v5628_v31  ;;  %2379 = vmatpush2.bf16.msra.mxu1 %v5631_v32  ;;  %v2570_v31 = vld [vmem:[#allocation11 + $0x5a0] sm:$0xff]  ;;  %v2567_v32 = vld [vmem:[#allocation11 + $0x588] sm:$0xff] }
 0x1d7   :  { %v1370_v48 = vpop.f32.mrf.mxu0  ;;  %v1413_v49 = vpop.f32.mrf.mxu1  ;;  %2337 = vmatprep.subr.bf16.mxu0 %v5636_v33  ;;  %2380 = vmatprep.subr.bf16.mxu1 %v5639_v34  ;;  %v5183_v33 = vcombine.high %v2566_v30, %v2570_v31  ;;  %v2571_v34 = vld [vmem:[#allocation11 + $0x5a8] sm:$0xff] }
 0x1d8   :  { %v1371_v2 = vadd.f32 %v1370_v48, %v589_v54  ;;  %v1414_v3 = vadd.f32 %v1413_v49, %v597_v55  ;;  %v5185_v48 = vcombine.high %v2567_v32, %v2571_v34  ;;  %v2558_v49 = vld [vmem:[#allocation11 + $0x540] sm:$0xff] }
 0x1d9   :  { %v1372_v56 = vpop.f32.mrf.mxu0  ;;  %v1415_v57 = vpop.f32.mrf.mxu1 }
 0x1da   :  { %2338 = vmatpush2.bf16.msra.mxu0 %v5634_v46  ;;  %2381 = vmatpush2.bf16.msra.mxu1 %v5637_v47  ;;  %v1373_v63 = vadd.f32 %v1372_v56, %v593_v52  ;;  %v1416_v0 = vadd.f32 %v1415_v57, %v601_v53  ;;  %v1426_v11 = vmax.f32 %v1371_v2, 0.0  ;;  %v1428_v15 = vmax.f32 %v1414_v3, 0.0  ;;  %v2550_v57 = vld [vmem:[#allocation11 + $0x500] sm:$0xff]  ;;  %v2547_v3 = vld [vmem:[#allocation11 + $0x4e8] sm:$0xff] }
 0x1db   :  { %v1374_v60 = vpop.f32.mrf.mxu0  ;;  %v1417_v61 = vpop.f32.mrf.mxu1  ;;  %2339 = vmatprep.subr.bf16.mxu0 %v5642_v50  ;;  %2382 = vmatprep.subr.bf16.mxu1 %v5645_v42  ;;  %v5182_v46 = vcombine.low %v2566_v30, %v2570_v31  ;;  %v5184_v47 = vcombine.low %v2567_v32, %v2571_v34  ;;  %v2562_v50 = vld [vmem:[#allocation11 + $0x560] sm:$0xff]  ;;  %v2559_v42 = vld [vmem:[#allocation11 + $0x548] sm:$0xff] }
 0x1dc   :  { %v1375_v1 = vadd.f32 %v1374_v60, %v589_v54  ;;  %v1418_v22 = vadd.f32 %v1417_v61, %v597_v55  ;;  %v1427_v40 = vmax.f32 %v1373_v63, 0.0  ;;  %v1429_v14 = vmax.f32 %v1416_v0, 0.0  ;;  %v2555_v61 = vld [vmem:[#allocation11 + $0x528] sm:$0xff]  ;;  %v2542_v0 = vld [vmem:[#allocation11 + $0x4c0] sm:$0xff] }
 0x1dd   :  { %v1376_v4 = vpop.f32.mrf.mxu0  ;;  %v1419_v10 = vpop.f32.mrf.mxu1  ;;  %v5174_v54 = vcombine.low %v2558_v49, %v2562_v50  ;;  %v2638_v31 = vld [vmem:[#allocation11 + $0x7c0] sm:$0xff] }
 0x1de   :  { %v1377_v5 = vadd.f32 %v1376_v4, %v593_v52  ;;  %v1420_v6 = vadd.f32 %v1419_v10, %v601_v53  ;;  %2340 = vmatpush2.bf16.msra.mxu0 %v5640_v58  ;;  %2383 = vmatpush2.bf16.msra.mxu1 %v5643_v59  ;;  %v1434_v13 = vmax.f32 %v1375_v1, 0.0  ;;  %v1436_v38 = vmax.f32 %v1418_v22, 0.0  ;;  %v2563_v53 = vld [vmem:[#allocation11 + $0x568] sm:$0xff]  ;;  %v2554_v58 = vld [vmem:[#allocation11 + $0x520] sm:$0xff] }
 0x1df   :  { %2341 = vmatprep.subr.bf16.mxu0 %v5648_v62  ;;  %2384 = vmatprep.subr.bf16.mxu1 %v5651_v21  ;;  %v5175_v52 = vcombine.high %v2558_v49, %v2562_v50  ;;  %v5176_v55 = vcombine.low %v2559_v42, %v2563_v53  ;;  %v5177_v56 = vcombine.high %v2559_v42, %v2563_v53  ;;  %v2551_v59 = vld [vmem:[#allocation11 + $0x508] sm:$0xff]  ;;  %v2546_v1 = vld [vmem:[#allocation11 + $0x4e0] sm:$0xff] }
 0x1e0   :  { %v1435_v41 = vmax.f32 %v1377_v5, 0.0  ;;  %v1437_v44 = vmax.f32 %v1420_v6, 0.0  ;;  %v1442_v18 = vpack.c.bf16 %v1434_v13, %v1426_v11  ;;  %v1444_v19 = vpack.c.bf16 %v1436_v38, %v1428_v15  ;;  %v2543_v22 = vld [vmem:[#allocation11 + $0x4c8] sm:$0xff]  ;;  %v2534_v6 = vld [vmem:[#allocation11 + $0x480] sm:$0xff] }
 0x1e1   :  { %v5167_v60 = vcombine.high %v2550_v57, %v2554_v58  ;;  %v5166_v62 = vcombine.low %v2550_v57, %v2554_v58  ;;  %v5168_v21 = vcombine.low %v2551_v59, %v2555_v61  ;;  %v5169_v63 = vcombine.high %v2551_v59, %v2555_v61  ;;  %v2539_v38 = vld [vmem:[#allocation11 + $0x4a8] sm:$0xff]  ;;  %v2530_v11 = vld [vmem:[#allocation11 + $0x460] sm:$0xff] }
 0x1e2   :  { %v1443_v16 = vpack.c.bf16 %v1435_v41, %v1427_v40  ;;  %v1445_v17 = vpack.c.bf16 %v1437_v44, %v1429_v14  ;;  %2342 = vmatpush2.bf16.msra.mxu0 %v5646_v7  ;;  %2385 = vmatpush2.bf16.msra.mxu1 %v5649_v12  ;;  %v5159_v2 = vcombine.high %v2542_v0, %v2546_v1  ;;  %v2538_v7 = vld [vmem:[#allocation11 + $0x4a0] sm:$0xff]  ;;  %v2535_v12 = vld [vmem:[#allocation11 + $0x488] sm:$0xff] }
 0x1e3   :  { %3327 = vmatprep.subr.bf16.mxu0 %v5191_v25  ;;  %3370 = vmatprep.subr.bf16.mxu1 %v5193_v29  ;;  %v5158_v4 = vcombine.low %v2542_v0, %v2546_v1  ;;  %v5160_v10 = vcombine.low %v2543_v22, %v2547_v3  ;;  %v5161_v5 = vcombine.high %v2543_v22, %v2547_v3  ;;  %v2526_v44 = vld [vmem:[#allocation11 + $0x440] sm:$0xff]  ;;  %v2527_v15 = vld [vmem:[#allocation11 + $0x448] sm:$0xff] }
 0x1e4   :  { %2343 = vmatprep.mubr.bf16.mxu0 %v1443_v16  ;;  %2386 = vmatprep.mubr.bf16.mxu1 %v1445_v17  ;;  %v5151_v13 = vcombine.high %v2534_v6, %v2538_v7  ;;  %v5150_v40 = vcombine.low %v2534_v6, %v2538_v7  ;;  %v5152_v14 = vcombine.low %v2535_v12, %v2539_v38  ;;  %v2531_v17 = vld [vmem:[#allocation11 + $0x468] sm:$0xff]  ;;  %v2642_v32 = vld [vmem:[#allocation11 + $0x7e0] sm:$0xff] }
 0x1e5   :  { %2344 = vmatmul.mubr.bf16.vlgmr.msra.gmra.mxu0 %v1442_v18  ;;  %2387 = vmatmul.mubr.bf16.vlgmr.msra.gmra.mxu1 %v1444_v19  ;;  %v5153_v41 = vcombine.high %v2535_v12, %v2539_v38  ;;  %v5143_v16 = vcombine.high %v2526_v44, %v2530_v11  ;;  %v5142_v18 = vcombine.low %v2526_v44, %v2530_v11  ;;  %v2519_v25 = vld [vmem:[#allocation11 + $0x408] sm:$0xff]  ;;  %v2630_v50 = vld [vmem:[#allocation11 + $0x780] sm:$0xff] }
 0x1e6   :  { %3328 = vmatpush1.bf16.msra.mxu0 %v5190_v27  ;;  %3371 = vmatpush1.bf16.msra.mxu1 %v5192_v28  ;;  %v5144_v19 = vcombine.low %v2527_v15, %v2531_v17  ;;  %v5145_v20 = vcombine.high %v2527_v15, %v2531_v17  ;;  %v2523_v27 = vld [vmem:[#allocation11 + $0x428] sm:$0xff]  ;;  %v5134_v28 = vcombine.low %v2518_v23, %v2522_v24  ;;  %v2634_v42 = vld [vmem:[#allocation11 + $0x7a0] sm:$0xff] }
 0x1e7   :  { %3329 = vmatprep.subr.bf16.mxu0 %v5183_v33  ;;  %3372 = vmatprep.subr.bf16.mxu1 %v5185_v48  ;;  %v5136_v29 = vcombine.low %v2519_v25, %v2523_v27  ;;  %v5137_v30 = vcombine.high %v2519_v25, %v2523_v27  ;;  %v2639_v33 = vld [vmem:[#allocation11 + $0x7c8] sm:$0xff]  ;;  %v5255_v34 = vcombine.high %v2638_v31, %v2642_v32  ;;  %v2622_v58 = vld [vmem:[#allocation11 + $0x740] sm:$0xff] }
 0x1e8   :  { %v5247_v53 = vcombine.high %v2630_v50, %v2634_v42  ;;  %v2626_v59 = vld [vmem:[#allocation11 + $0x760] sm:$0xff] }
 0x1e9   :  { %v5239_v61 = vcombine.high %v2622_v58, %v2626_v59  ;;  %v2614_v1 = vld [vmem:[#allocation11 + $0x700] sm:$0xff] }
 0x1ea   :  { %3330 = vmatpush1.bf16.msra.mxu0 %v5182_v46  ;;  %3373 = vmatpush1.bf16.msra.mxu1 %v5184_v47  ;;  %v2643_v46 = vld [vmem:[#allocation11 + $0x7e8] sm:$0xff]  ;;  %v5254_v47 = vcombine.low %v2638_v31, %v2642_v32  ;;  %v2618_v22 = vld [vmem:[#allocation11 + $0x720] sm:$0xff] }
 0x1eb   :  { %3331 = vmatprep.subr.bf16.mxu0 %v5175_v52  ;;  %3374 = vmatprep.subr.bf16.mxu1 %v5177_v56  ;;  %v5256_v48 = vcombine.low %v2639_v33, %v2643_v46  ;;  %v5257_v49 = vcombine.high %v2639_v33, %v2643_v46  ;;  %v2631_v52 = vld [vmem:[#allocation11 + $0x788] sm:$0xff]  ;;  %v5231_v3 = vcombine.high %v2614_v1, %v2618_v22  ;;  %v2606_v7 = vld [vmem:[#allocation11 + $0x6c0] sm:$0xff] }
 0x1ec   :  { %v2610_v12 = vld [vmem:[#allocation11 + $0x6e0] sm:$0xff] }
 0x1ed   :  { %v5223_v38 = vcombine.high %v2606_v7, %v2610_v12  ;;  %v2598_v11 = vld [vmem:[#allocation11 + $0x680] sm:$0xff] }
 0x1ee   :  { %3332 = vmatpush1.bf16.msra.mxu0 %v5174_v54  ;;  %3375 = vmatpush1.bf16.msra.mxu1 %v5176_v55  ;;  %v2635_v54 = vld [vmem:[#allocation11 + $0x7a8] sm:$0xff]  ;;  %v5246_v55 = vcombine.low %v2630_v50, %v2634_v42  ;;  %v2602_v15 = vld [vmem:[#allocation11 + $0x6a0] sm:$0xff]  ;;  %v6372_v42 = vld [vmem:[#allocation11 + $0x5d0] sm:$0xff] }
 0x1ef   :  { %3333 = vmatprep.subr.bf16.mxu0 %v5167_v60  ;;  %3376 = vmatprep.subr.bf16.mxu1 %v5169_v63  ;;  %v5248_v56 = vcombine.low %v2631_v52, %v2635_v54  ;;  %v5249_v57 = vcombine.high %v2631_v52, %v2635_v54  ;;  %v2623_v60 = vld [vmem:[#allocation11 + $0x748] sm:$0xff]  ;;  %v5215_v17 = vcombine.high %v2598_v11, %v2602_v15  ;;  %v2590_v24 = vld [vmem:[#allocation11 + $0x640] sm:$0xff]  ;;  %v6374_v52 = vld [vmem:[#allocation11 + $0x5f0] sm:$0xff] }
 0x1f0   :  { %v2594_v25 = vld [vmem:[#allocation11 + $0x660] sm:$0xff]  ;;  %v5195_v54 = vcombine.high %v6372_v42, %v6374_v52 }
 0x1f1   :  { %v5207_v27 = vcombine.high %v2590_v24, %v2594_v25  ;;  %v2582_v32 = vld [vmem:[#allocation11 + $0x600] sm:$0xff] }
 0x1f2   :  { %3334 = vmatpush1.bf16.msra.mxu0 %v5166_v62  ;;  %3377 = vmatpush1.bf16.msra.mxu1 %v5168_v21  ;;  %v2627_v62 = vld [vmem:[#allocation11 + $0x768] sm:$0xff]  ;;  %v5238_v21 = vcombine.low %v2622_v58, %v2626_v59  ;;  %v2586_v33 = vld [vmem:[#allocation11 + $0x620] sm:$0xff] }
 0x1f3   :  { %3335 = vmatprep.subr.bf16.mxu0 %v5159_v2  ;;  %3378 = vmatprep.subr.bf16.mxu1 %v5161_v5  ;;  %v5240_v63 = vcombine.low %v2623_v60, %v2627_v62  ;;  %v5241_v0 = vcombine.high %v2623_v60, %v2627_v62  ;;  %v2615_v2 = vld [vmem:[#allocation11 + $0x708] sm:$0xff]  ;;  %v5198_v46 = vcombine.low %v2582_v32, %v2586_v33 }
 0x1f6   :  { %3336 = vmatpush1.bf16.msra.mxu0 %v5158_v4  ;;  %3379 = vmatpush1.bf16.msra.mxu1 %v5160_v10  ;;  %v2619_v4 = vld [vmem:[#allocation11 + $0x728] sm:$0xff]  ;;  %v5230_v10 = vcombine.low %v2614_v1, %v2618_v22 }
 0x1f7   :  { %3337 = vmatprep.subr.bf16.mxu0 %v5151_v13  ;;  %3380 = vmatprep.subr.bf16.mxu1 %v5153_v41  ;;  %v5232_v5 = vcombine.low %v2615_v2, %v2619_v4  ;;  %v5233_v6 = vcombine.high %v2615_v2, %v2619_v4  ;;  %v2607_v13 = vld [vmem:[#allocation11 + $0x6c8] sm:$0xff] }
 0x1fa   :  { %3338 = vmatpush1.bf16.msra.mxu0 %v5150_v40  ;;  %3381 = vmatpush1.bf16.msra.mxu1 %v5152_v14  ;;  %v2611_v40 = vld [vmem:[#allocation11 + $0x6e8] sm:$0xff]  ;;  %v5222_v14 = vcombine.low %v2606_v7, %v2610_v12 }
 0x1fb   :  { %3339 = vmatprep.subr.bf16.mxu0 %v5143_v16  ;;  %3382 = vmatprep.subr.bf16.mxu1 %v5145_v20  ;;  %v5224_v41 = vcombine.low %v2607_v13, %v2611_v40  ;;  %v5225_v44 = vcombine.high %v2607_v13, %v2611_v40  ;;  %v2599_v16 = vld [vmem:[#allocation11 + $0x688] sm:$0xff] }
 0x1fe   :  { %3340 = vmatpush1.bf16.msra.mxu0 %v5142_v18  ;;  %3383 = vmatpush1.bf16.msra.mxu1 %v5144_v19  ;;  %v2603_v18 = vld [vmem:[#allocation11 + $0x6a8] sm:$0xff]  ;;  %v5214_v19 = vcombine.low %v2598_v11, %v2602_v15 }
 0x1ff   :  { %3341 = vmatprep.subr.bf16.mxu0 %v5135_v26  ;;  %3384 = vmatprep.subr.bf16.mxu1 %v5137_v30  ;;  %v5216_v20 = vcombine.low %v2599_v16, %v2603_v18  ;;  %v5217_v23 = vcombine.high %v2599_v16, %v2603_v18  ;;  %v2591_v26 = vld [vmem:[#allocation11 + $0x648] sm:$0xff] }
 0x202   :  { %3342 = vmatpush1.bf16.msra.mxu0 %v5134_v28  ;;  %3385 = vmatpush1.bf16.msra.mxu1 %v5136_v29  ;;  %v2595_v28 = vld [vmem:[#allocation11 + $0x668] sm:$0xff]  ;;  %v5206_v29 = vcombine.low %v2590_v24, %v2594_v25 }
 0x203   :  { %3343 = vmatprep.subr.bf16.mxu0 %v5255_v34  ;;  %3386 = vmatprep.subr.bf16.mxu1 %v5257_v49  ;;  %v5208_v30 = vcombine.low %v2591_v26, %v2595_v28  ;;  %v5209_v31 = vcombine.high %v2591_v26, %v2595_v28  ;;  %v2583_v34 = vld [vmem:[#allocation11 + $0x608] sm:$0xff] }
 0x206   :  { %3344 = vmatpush2.bf16.msra.mxu0 %v5254_v47  ;;  %3387 = vmatpush2.bf16.msra.mxu1 %v5256_v48  ;;  %v5199_v47 = vcombine.high %v2582_v32, %v2586_v33  ;;  %v2587_v48 = vld [vmem:[#allocation11 + $0x628] sm:$0xff] }
 0x207   :  { %3345 = vmatprep.subr.bf16.mxu0 %v5247_v53  ;;  %3388 = vmatprep.subr.bf16.mxu1 %v5249_v57  ;;  %v5200_v49 = vcombine.low %v2583_v34, %v2587_v48  ;;  %v5201_v50 = vcombine.high %v2583_v34, %v2587_v48  ;;  %v6376_v53 = vld [vmem:[#allocation11 + $0x5d8] sm:$0xff] }
 0x208   :  { %v5886_v34 = vld [vmem:[#allocation2 + $0x10] sm:$0xff] }
 0x20a   :  { %3346 = vmatpush2.bf16.msra.mxu0 %v5246_v55  ;;  %3389 = vmatpush2.bf16.msra.mxu1 %v5248_v56  ;;  %v6380_v55 = vld [vmem:[#allocation11 + $0x5f8] sm:$0xff]  ;;  %v5194_v56 = vcombine.low %v6372_v42, %v6374_v52 }
 0x20b   :  { %3347 = vmatprep.subr.bf16.mxu0 %v5239_v61  ;;  %3390 = vmatprep.subr.bf16.mxu1 %v5241_v0  ;;  %v5196_v57 = vcombine.low %v6376_v53, %v6380_v55  ;;  %v5197_v58 = vcombine.high %v6376_v53, %v6380_v55  ;;  %v440_v61 = vld [vmem:[#allocation10 + $0x10] ss:$2 sm:$0x3] }
 0x20c   :  { %v1582_v0 = vrot.slane %v440_v61, %v6321_v37 }
 0x20e   :  { %3348 = vmatpush2.bf16.msra.mxu0 %v5238_v21  ;;  %3391 = vmatpush2.bf16.msra.mxu1 %v5240_v63  ;;  %v1578_v63 = vrot.slane %v440_v61, %v6324_v45 }
 0x20f   :  { %3349 = vmatprep.subr.bf16.mxu0 %v5231_v3  ;;  %3392 = vmatprep.subr.bf16.mxu1 %v5233_v6 }
 0x212   :  { %3350 = vmatpush2.bf16.msra.mxu0 %v5230_v10  ;;  %3393 = vmatpush2.bf16.msra.mxu1 %v5232_v5 }
 0x213   :  { %3351 = vmatprep.subr.bf16.mxu0 %v5223_v38  ;;  %3394 = vmatprep.subr.bf16.mxu1 %v5225_v44 }
 0x216   :  { %3352 = vmatpush2.bf16.msra.mxu0 %v5222_v14  ;;  %3395 = vmatpush2.bf16.msra.mxu1 %v5224_v41 }
 0x217   :  { %3353 = vmatprep.subr.bf16.mxu0 %v5215_v17  ;;  %3396 = vmatprep.subr.bf16.mxu1 %v5217_v23 }
 0x21a   :  { %3354 = vmatpush2.bf16.msra.mxu0 %v5214_v19  ;;  %3397 = vmatpush2.bf16.msra.mxu1 %v5216_v20  ;;  %v5884_v19 = vld [vmem:[#allocation2] sm:$0xff] }
 0x21b   :  { %3355 = vmatprep.subr.bf16.mxu0 %v5207_v27  ;;  %3398 = vmatprep.subr.bf16.mxu1 %v5209_v31  ;;  %v5885_v27 = vld [vmem:[#allocation2 + $0x8] sm:$0xff] }
 0x21e   :  { %3356 = vmatpush2.bf16.msra.mxu0 %v5206_v29  ;;  %3399 = vmatpush2.bf16.msra.mxu1 %v5208_v30 }
 0x21f   :  { %3357 = vmatprep.subr.bf16.mxu0 %v5199_v47  ;;  %3400 = vmatprep.subr.bf16.mxu1 %v5201_v50 }
 0x222   :  { %3358 = vmatpush2.bf16.msra.mxu0 %v5198_v46  ;;  %3401 = vmatpush2.bf16.msra.mxu1 %v5200_v49 }
 0x223   :  { %3413 = vmatprep.subr.bf16.mxu0 %v5195_v54  ;;  %3456 = vmatprep.subr.bf16.mxu1 %v5197_v58  ;;  %v5887_v54 = vld [vmem:[#allocation2 + $0x18] sm:$0xff] }
 0x265   :  { %v2259_v59 = vpop.f32.mrf.mxu0  ;;  %v2302_v60 = vpop.f32.mrf.mxu1 }
 0x266   :  { %v2260_v2 = vadd.f32 %v2259_v59, %v1578_v63 }
 0x267   :  { %v2261_v62 = vpop.f32.mrf.mxu0  ;;  %v2304_v21 = vpop.f32.mrf.mxu1 }
 0x268   :  { %v2262_v3 = vadd.f32 %v2261_v62, %v1582_v0  ;;  %v2303_v5 = vadd.f32 %v2302_v60, %v2260_v2 }
 0x269   :  { %v2263_v1 = vpop.f32.mrf.mxu0  ;;  %v2306_v22 = vpop.f32.mrf.mxu1 }
 0x26a   :  { %v2264_v6 = vadd.f32 %v2263_v1, %v1578_v63  ;;  %v2305_v13 = vadd.f32 %v2304_v21, %v2262_v3 }
 0x26b   :  { %v2265_v4 = vpop.f32.mrf.mxu0  ;;  %v2308_v10 = vpop.f32.mrf.mxu1 }
 0x26c   :  { %v2266_v38 = vadd.f32 %v2265_v4, %v1582_v0  ;;  %v2307_v44 = vadd.f32 %v2306_v22, %v2264_v6 }
 0x26e   :  { %v2309_v18 = vadd.f32 %v2308_v10, %v2266_v38 }
 0x2a5   :  { %v2345_v7 = vpop.f32.mrf.mxu0  ;;  %v2388_v12 = vpop.f32.mrf.mxu1 }
 0x2a6   :  { %v2346_v40 = vadd.f32 %v2345_v7, %v2303_v5 }
 0x2a7   :  { %v2347_v14 = vpop.f32.mrf.mxu0  ;;  %v2390_v41 = vpop.f32.mrf.mxu1 }
 0x2a8   :  { %v2389_v11 = vadd.f32 %v2388_v12, %v2346_v40  ;;  %v2348_v15 = vadd.f32 %v2347_v14, %v2305_v13 }
 0x2a9   :  { %v2349_v16 = vpop.f32.mrf.mxu0  ;;  %v2392_v17 = vpop.f32.mrf.mxu1 }
 0x2aa   :  { %v6390_v20 = vadd.f32 %v5884_v19, %v2389_v11  ;;  %v2391_v23 = vadd.f32 %v2390_v41, %v2348_v15  ;;  %v2350_v24 = vadd.f32 %v2349_v16, %v2307_v44 }
 0x2ab   :  { %v2351_v25 = vpop.f32.mrf.mxu0  ;;  %v2394_v31 = vpop.f32.mrf.mxu1 }
 0x2ac   :  { %v2405_v26 = vrot.slane %v6390_v20, 4  ;;  %v6393_v28 = vadd.f32 %v5885_v27, %v2391_v23  ;;  %v2393_v29 = vadd.f32 %v2392_v17, %v2350_v24  ;;  %v2352_v30 = vadd.f32 %v2351_v25, %v2309_v18 }
 0x2ae   :  { %v2406_v32 = vadd.f32 %v2405_v26, %v6390_v20  ;;  %v2411_v33 = vrot.slane %v6393_v28, 4  ;;  %v6397_v46 = vadd.f32 %v5886_v34, %v2393_v29  ;;  %v2395_v47 = vadd.f32 %v2394_v31, %v2352_v30 }
 0x2b0   :  { %v2407_v48 = vrot.slane %v2406_v32, 2  ;;  %v2412_v49 = vadd.f32 %v2411_v33, %v6393_v28  ;;  %v2417_v50 = vrot.slane %v6397_v46, 4  ;;  %v6401_v58 = vadd.f32 %v5887_v54, %v2395_v47 }
 0x2b2   :  { %v2408_v59 = vadd.f32 %v2407_v48, %v2406_v32  ;;  %v2413_v60 = vrot.slane %v2412_v49, 2  ;;  %v2418_v61 = vadd.f32 %v2417_v50, %v6397_v46  ;;  %v2423_v62 = vrot.slane %v6401_v58, 4 }
 0x2b4   :  { %v2409_v21 = vrot.slane %v2408_v59, 1  ;;  %v2414_v63 = vadd.f32 %v2413_v60, %v2412_v49  ;;  %v2419_v0 = vrot.slane %v2418_v61, 2  ;;  %v2424_v1 = vadd.f32 %v2423_v62, %v6401_v58 }
 0x2b6   :  { %v2410_v22 = vadd.f32 %v2409_v21, %v2408_v59  ;;  %v2415_v2 = vrot.slane %v2414_v63, 1  ;;  %v2420_v3 = vadd.f32 %v2419_v0, %v2418_v61  ;;  %v2425_v4 = vrot.slane %v2424_v1, 2 }
 0x2b8   :  { %v2429_v10 = vmul.f32 0.125, %v2410_v22  ;;  %v2416_v5 = vadd.f32 %v2415_v2, %v2414_v63  ;;  %v2421_v6 = vrot.slane %v2420_v3, 1  ;;  %v2426_v7 = vadd.f32 %v2425_v4, %v2424_v1 }
 0x2ba   :  { %v2433_v12 = vsub.f32 %v6390_v20, %v2429_v10  ;;  %v2430_v13 = vmul.f32 0.125, %v2416_v5  ;;  %v2422_v38 = vadd.f32 %v2421_v6, %v2420_v3  ;;  %v2427_v40 = vrot.slane %v2426_v7, 1 }
 0x2bc   :  { %v2437_v14 = vmul.f32 %v2433_v12, %v2433_v12  ;;  %v2434_v41 = vsub.f32 %v6393_v28, %v2430_v13  ;;  %v2431_v44 = vmul.f32 0.125, %v2422_v38  ;;  %v2428_v11 = vadd.f32 %v2427_v40, %v2426_v7  ;;  %v2402_v40 = vld [vmem:[#allocation8 + $0x2] ss:$8 sm:$0x3] }
 0x2be   :  { %v2441_v15 = vrot.slane %v2437_v14, 4  ;;  %v2438_v16 = vmul.f32 %v2434_v41, %v2434_v41  ;;  %v2435_v17 = vsub.f32 %v6397_v46, %v2431_v44  ;;  %v2432_v18 = vmul.f32 0.125, %v2428_v11 }
 0x2bf   :  { %v2489_v11 = vrot.slane %v2402_v40, %v6321_v37 }
 0x2c0   :  { %v2442_v19 = vadd.f32 %v2441_v15, %v2437_v14  ;;  %v2447_v23 = vrot.slane %v2438_v16, 4  ;;  %v2439_v24 = vmul.f32 %v2435_v17, %v2435_v17  ;;  %v2436_v25 = vsub.f32 %v6401_v58, %v2432_v18 }
 0x2c1   :  { %v2485_v18 = vrot.slane %v2402_v40, %v6324_v45 }
 0x2c2   :  { %v2443_v26 = vrot.slane %v2442_v19, 2  ;;  %v2448_v27 = vadd.f32 %v2447_v23, %v2438_v16  ;;  %v2453_v29 = vrot.slane %v2439_v24, 4  ;;  %v2440_v30 = vmul.f32 %v2436_v25, %v2436_v25  ;;  %v2404_v23 = vld [vmem:[#allocation8 + $0x3] ss:$8 sm:$0x3] }
 0x2c4   :  { %v2444_v31 = vadd.f32 %v2443_v26, %v2442_v19  ;;  %v2449_v32 = vrot.slane %v2448_v27, 2  ;;  %v2454_v33 = vadd.f32 %v2453_v29, %v2439_v24  ;;  %v2459_v34 = vrot.slane %v2440_v30, 4 }
 0x2c5   :  { %v2504_v29 = vrot.slane %v2404_v23, %v6321_v37 }
 0x2c6   :  { %v2445_v47 = vrot.slane %v2444_v31, 1  ;;  %v2450_v48 = vadd.f32 %v2449_v32, %v2448_v27  ;;  %v2455_v49 = vrot.slane %v2454_v33, 2  ;;  %v2460_v50 = vadd.f32 %v2459_v34, %v2440_v30 }
 0x2c7   :  { %v2500_v32 = vrot.slane %v2404_v23, %v6324_v45 }
 0x2c8   :  { %v2446_v54 = vadd.f32 %v2445_v47, %v2444_v31  ;;  %v2451_v59 = vrot.slane %v2450_v48, 1  ;;  %v2456_v60 = vadd.f32 %v2455_v49, %v2454_v33  ;;  %v2461_v61 = vrot.slane %v2460_v50, 2 }
 0x2ca   :  { %v2465_v62 = vmul.f32 0.14285715, %v2446_v54  ;;  %v2452_v21 = vadd.f32 %v2451_v59, %v2450_v48  ;;  %v2457_v63 = vrot.slane %v2456_v60, 1  ;;  %v2462_v0 = vadd.f32 %v2461_v61, %v2460_v50  ;;  %v2568_v48 = vld [vmem:[#allocation11 + $0x590] sm:$0xff]  ;;  %v2569_v50 = vld [vmem:[#allocation11 + $0x598] sm:$0xff] }
 0x2cb   :  { %v2573_v54 = vld [vmem:[#allocation11 + $0x5b8] sm:$0xff] }
 0x2cc   :  { %v2469_v1 = vadd.f32 1e-05, %v2465_v62  ;;  %v2466_v22 = vmul.f32 0.14285715, %v2452_v21  ;;  %v2458_v2 = vadd.f32 %v2457_v63, %v2456_v60  ;;  %v2463_v3 = vrot.slane %v2462_v0, 1  ;;  %v2564_v62 = vld [vmem:[#allocation11 + $0x570] sm:$0xff] }
 0x2cd   :  { %v5189_v61 = vcombine.high %v2569_v50, %v2573_v54  ;;  %v2561_v21 = vld [vmem:[#allocation11 + $0x558] sm:$0xff] }
 0x2ce   :  { %v2470_v4 = vadd.f32 1e-05, %v2466_v22  ;;  %v2467_v10 = vmul.f32 0.14285715, %v2458_v2  ;;  %v2464_v5 = vadd.f32 %v2463_v3, %v2462_v0  ;;  %5868 = vrsqrt.f32 %v2469_v1  ;;  %v2565_v63 = vld [vmem:[#allocation11 + $0x578] sm:$0xff]  ;;  %v2552_v3 = vld [vmem:[#allocation11 + $0x510] sm:$0xff] }
 0x2cf   :  { %v5188_v1 = vcombine.low %v2569_v50, %v2573_v54  ;;  %v5181_v2 = vcombine.high %v2561_v21, %v2565_v63  ;;  %v5180_v52 = vcombine.low %v2561_v21, %v2565_v63 }
 0x2d0   :  { %5870 = vrsqrt.f32 %v2470_v4  ;;  %v2471_v6 = vadd.f32 1e-05, %v2467_v10  ;;  %v2468_v7 = vmul.f32 0.14285715, %v2464_v5  ;;  %v2556_v4 = vld [vmem:[#allocation11 + $0x530] sm:$0xff]  ;;  %v2553_v10 = vld [vmem:[#allocation11 + $0x518] sm:$0xff] }
 0x2d1   :  { %v2557_v5 = vld [vmem:[#allocation11 + $0x538] sm:$0xff]  ;;  %v5171_v53 = vcombine.high %v2552_v3, %v2556_v4 }
 0x2d2   :  { %5872 = vrsqrt.f32 %v2471_v6  ;;  %v2472_v13 = vadd.f32 1e-05, %v2468_v7  ;;  %v5173_v55 = vcombine.high %v2553_v10, %v2557_v5  ;;  %v2545_v6 = vld [vmem:[#allocation11 + $0x4d8] sm:$0xff] }
 0x2d3   :  { %v2549_v7 = vld [vmem:[#allocation11 + $0x4f8] sm:$0xff] }
 0x2d4   :  { %5874 = vrsqrt.f32 %v2472_v13  ;;  %v5170_v13 = vcombine.low %v2552_v3, %v2556_v4  ;;  %v2633_v3 = vld [vmem:[#allocation11 + $0x798] sm:$0xff] }
 0x2d5   :  { %v2637_v4 = vld [vmem:[#allocation11 + $0x7b8] sm:$0xff] }
 0x2db   :  { %v5869_v38 = vpop.eup %5868 }
 0x2dc   :  { %v2477_v16 = vmul.f32 %v5869_v38, %v2433_v12  ;;  %v2572_v12 = vld [vmem:[#allocation11 + $0x5b0] sm:$0xff]  ;;  %v5172_v38 = vcombine.low %v2553_v10, %v2557_v5 }
 0x2dd   :  { %v5871_v14 = vpop.eup %5870  ;;  %v5187_v60 = vcombine.high %v2568_v48, %v2572_v12  ;;  %v5186_v0 = vcombine.low %v2568_v48, %v2572_v12  ;;  %v2521_v48 = vld [vmem:[#allocation11 + $0x418] sm:$0xff] }
 0x2de   :  { %v2478_v44 = vmul.f32 %v5871_v14, %v2434_v41  ;;  %v2492_v31 = vmul.f32 %v2485_v18, %v2477_v16  ;;  %v5165_v14 = vcombine.high %v2545_v6, %v2549_v7  ;;  %v2541_v16 = vld [vmem:[#allocation11 + $0x4b8] sm:$0xff] }
 0x2df   :  { %v5873_v15 = vpop.eup %5872 }
 0x2e0   :  { %v2479_v19 = vmul.f32 %v5873_v15, %v2435_v17  ;;  %v2493_v27 = vmul.f32 %v2489_v11, %v2478_v44  ;;  %v2507_v49 = vadd.f32 %v2500_v32, %v2492_v31  ;;  %v2536_v44 = vld [vmem:[#allocation11 + $0x490] sm:$0xff]  ;;  %v2537_v15 = vld [vmem:[#allocation11 + $0x498] sm:$0xff] }
 0x2e1   :  { %v5875_v24 = vpop.eup %5874 }
 0x2e2   :  { %v2480_v26 = vmul.f32 %v5875_v24, %v2436_v25  ;;  %v2494_v30 = vmul.f32 %v2485_v18, %v2479_v19  ;;  %v2508_v41 = vadd.f32 %v2504_v29, %v2493_v27  ;;  %v2560_v25 = vld [vmem:[#allocation11 + $0x550] sm:$0xff]  ;;  %v5164_v19 = vcombine.low %v2545_v6, %v2549_v7 }
 0x2e3   :  { %v5179_v22 = vcombine.high %v2560_v25, %v2564_v62  ;;  %v5178_v42 = vcombine.low %v2560_v25, %v2564_v62  ;;  %v5157_v24 = vcombine.high %v2537_v15, %v2541_v16  ;;  %v2532_v27 = vld [vmem:[#allocation11 + $0x470] sm:$0xff]  ;;  %v2645_v62 = vld [vmem:[#allocation11 + $0x7f8] sm:$0xff]  ;;  %v5252_v7 = vcombine.low %v2633_v3, %v2637_v4 }
 0x2e4   :  { %v2495_v33 = vmul.f32 %v2489_v11, %v2480_v26  ;;  %v2509_v34 = vadd.f32 %v2500_v32, %v2494_v30  ;;  %v2540_v11 = vld [vmem:[#allocation11 + $0x4b0] sm:$0xff]  ;;  %v2533_v30 = vld [vmem:[#allocation11 + $0x478] sm:$0xff]  ;;  %v5156_v32 = vcombine.low %v2537_v15, %v2541_v16 }
 0x2e5   :  { %v5155_v23 = vcombine.high %v2536_v44, %v2540_v11  ;;  %v2528_v26 = vld [vmem:[#allocation11 + $0x450] sm:$0xff]  ;;  %v5154_v31 = vcombine.low %v2536_v44, %v2540_v11  ;;  %v2617_v44 = vld [vmem:[#allocation11 + $0x718] sm:$0xff] }
 0x2e6   :  { %v2510_v47 = vadd.f32 %v2504_v29, %v2495_v33  ;;  %v6414_v59 = vpack.c.bf16 %v2509_v34, %v2507_v49  ;;  %v2529_v29 = vld [vmem:[#allocation11 + $0x458] sm:$0xff]  ;;  %v5147_v33 = vcombine.high %v2528_v26, %v2532_v27  ;;  %v5146_v12 = vcombine.low %v2528_v26, %v2532_v27  ;;  %v2640_v25 = vld [vmem:[#allocation11 + $0x7d0] sm:$0xff] }
 0x2e7   :  { %v5149_v34 = vcombine.high %v2529_v29, %v2533_v30  ;;  %v2525_v49 = vld [vmem:[#allocation11 + $0x438] sm:$0xff]  ;;  %v5148_v50 = vcombine.low %v2529_v29, %v2533_v30 }
 0x2e8   :  { %v2512_v17 = vpack.c.bf16 %v2510_v47, %v2508_v41  ;;  %v2520_v41 = vld [vmem:[#allocation11 + $0x410] sm:$0xff]  ;;  %v5140_v63 = vcombine.low %v2521_v48, %v2525_v49  ;;  %v2621_v11 = vld [vmem:[#allocation11 + $0x738] sm:$0xff] }
 0x2e9   :  { %v2524_v47 = vld [vmem:[#allocation11 + $0x430] sm:$0xff]  ;;  %v2609_v26 = vld [vmem:[#allocation11 + $0x6d8] sm:$0xff]  ;;  %v5236_v30 = vcombine.low %v2617_v44, %v2621_v11 }
 0x2ea   :  { %3359 = vmatprep.mubr.bf16.mxu0 %v2512_v17  ;;  %3402 = vmatprep.mubr.bf16.mxu1 %v2512_v17  ;;  %v5139_v54 = vcombine.high %v2520_v41, %v2524_v47  ;;  %v5138_v21 = vcombine.low %v2520_v41, %v2524_v47  ;;  %v2613_v27 = vld [vmem:[#allocation11 + $0x6f8] sm:$0xff] }
 0x2eb   :  { %3360 = vmatmul.mubr.bf16.vlgmr.msra.gmra.mxu0 %v6414_v59  ;;  %3403 = vmatmul.mubr.bf16.vlgmr.msra.gmra.mxu1 %v6414_v59  ;;  %v2601_v41 = vld [vmem:[#allocation11 + $0x698] sm:$0xff] }
 0x2ec   :  { %3414 = vmatpush1.bf16.msra.mxu0 %v5194_v56  ;;  %3457 = vmatpush1.bf16.msra.mxu1 %v5196_v57  ;;  %v2544_v56 = vld [vmem:[#allocation11 + $0x4d0] sm:$0xff]  ;;  %v2605_v47 = vld [vmem:[#allocation11 + $0x6b8] sm:$0xff] }
 0x2ed   :  { %3445 = vmatprep.mubr.bf16.mxu0 %v2512_v17  ;;  %3488 = vmatprep.mubr.bf16.mxu1 %v2512_v17  ;;  %v2548_v57 = vld [vmem:[#allocation11 + $0x4f0] sm:$0xff]  ;;  %v5141_v17 = vcombine.high %v2521_v48, %v2525_v49  ;;  %v5228_v49 = vcombine.low %v2609_v26, %v2613_v27 }
 0x2ee   :  { %3415 = vmatprep.subr.bf16.mxu0 %v5187_v60  ;;  %3458 = vmatprep.subr.bf16.mxu1 %v5189_v61  ;;  %v5163_v40 = vcombine.high %v2544_v56, %v2548_v57  ;;  %v5162_v18 = vcombine.low %v2544_v56, %v2548_v57  ;;  %v2644_v60 = vld [vmem:[#allocation11 + $0x7f0] sm:$0xff]  ;;  %v2641_v61 = vld [vmem:[#allocation11 + $0x7d8] sm:$0xff] }
 0x2ef   :  { %v5258_v10 = vcombine.low %v2640_v25, %v2644_v60  ;;  %v5260_v5 = vcombine.low %v2641_v61, %v2645_v62  ;;  %v2625_v56 = vld [vmem:[#allocation11 + $0x758] sm:$0xff] }
 0x2f0   :  { %3416 = vmatpush1.bf16.msra.mxu0 %v5186_v0  ;;  %3459 = vmatpush1.bf16.msra.mxu1 %v5188_v1  ;;  %v5259_v0 = vcombine.high %v2640_v25, %v2644_v60  ;;  %v5261_v1 = vcombine.high %v2641_v61, %v2645_v62  ;;  %v2629_v57 = vld [vmem:[#allocation11 + $0x778] sm:$0xff]  ;;  %v5220_v62 = vcombine.low %v2601_v41, %v2605_v47 }
 0x2f1   :  { %3417 = vmatprep.subr.bf16.mxu0 %v5179_v22  ;;  %3460 = vmatprep.subr.bf16.mxu1 %v5181_v2  ;;  %v2632_v22 = vld [vmem:[#allocation11 + $0x790] sm:$0xff]  ;;  %v5244_v16 = vcombine.low %v2625_v56, %v2629_v57  ;;  %v2593_v25 = vld [vmem:[#allocation11 + $0x658] sm:$0xff] }
 0x2f2   :  { %v2636_v2 = vld [vmem:[#allocation11 + $0x7b0] sm:$0xff]  ;;  %v2597_v60 = vld [vmem:[#allocation11 + $0x678] sm:$0xff] }
 0x2f3   :  { %v5250_v6 = vcombine.low %v2632_v22, %v2636_v2 }
 0x2f4   :  { %3418 = vmatpush1.bf16.msra.mxu0 %v5178_v42  ;;  %3461 = vmatpush1.bf16.msra.mxu1 %v5180_v52  ;;  %v5251_v42 = vcombine.high %v2632_v22, %v2636_v2  ;;  %v5253_v52 = vcombine.high %v2633_v3, %v2637_v4  ;;  %v2585_v22 = vld [vmem:[#allocation11 + $0x618] sm:$0xff]  ;;  %v5212_v4 = vcombine.low %v2593_v25, %v2597_v60 }
 0x2f5   :  { %3419 = vmatprep.subr.bf16.mxu0 %v5171_v53  ;;  %3462 = vmatprep.subr.bf16.mxu1 %v5173_v55  ;;  %v2624_v53 = vld [vmem:[#allocation11 + $0x750] sm:$0xff]  ;;  %v2589_v2 = vld [vmem:[#allocation11 + $0x638] sm:$0xff] }
 0x2f6   :  { %v2628_v55 = vld [vmem:[#allocation11 + $0x770] sm:$0xff] }
 0x2f7   :  { %v5242_v15 = vcombine.low %v2624_v53, %v2628_v55 }
 0x2f8   :  { %3420 = vmatpush1.bf16.msra.mxu0 %v5170_v13  ;;  %3463 = vmatpush1.bf16.msra.mxu1 %v5172_v38  ;;  %v5243_v13 = vcombine.high %v2624_v53, %v2628_v55  ;;  %v5245_v38 = vcombine.high %v2625_v56, %v2629_v57  ;;  %v5654_v53 = vld [vmem:[#allocation13 + $0x474] ss:$8 sps:$4 sm:$0xff]   ;;  %v5652_v56 = vld [vmem:[#allocation13 + $0x470] ss:$8 sps:$4 sm:$0xff]  }
 0x2f9   :  { %3421 = vmatprep.subr.bf16.mxu0 %v5163_v40  ;;  %3464 = vmatprep.subr.bf16.mxu1 %v5165_v14  ;;  %v2616_v40 = vld [vmem:[#allocation11 + $0x710] sm:$0xff] }
 0x2fa   :  { %v2620_v14 = vld [vmem:[#allocation11 + $0x730] sm:$0xff] }
 0x2fb   :  { %v5234_v29 = vcombine.low %v2616_v40, %v2620_v14  ;;  %v5657_v55 = vld [vmem:[#allocation13 + $0x574] ss:$8 sps:$4 sm:$0xff]   ;;  %v5655_v57 = vld [vmem:[#allocation13 + $0x570] ss:$8 sps:$4 sm:$0xff]  }
 0x2fc   :  { %3422 = vmatpush1.bf16.msra.mxu0 %v5162_v18  ;;  %3465 = vmatpush1.bf16.msra.mxu1 %v5164_v19  ;;  %v5235_v18 = vcombine.high %v2616_v40, %v2620_v14  ;;  %v5237_v19 = vcombine.high %v2617_v44, %v2621_v11  ;;  %v5666_v40 = vld [vmem:[#allocation13 + $0x454] ss:$8 sps:$4 sm:$0xff]   ;;  %v5664_v44 = vld [vmem:[#allocation13 + $0x450] ss:$8 sps:$4 sm:$0xff]  }
 0x2fd   :  { %3423 = vmatprep.subr.bf16.mxu0 %v5155_v23  ;;  %3466 = vmatprep.subr.bf16.mxu1 %v5157_v24  ;;  %v2608_v23 = vld [vmem:[#allocation11 + $0x6d0] sm:$0xff] }
 0x2fe   :  { %v2612_v24 = vld [vmem:[#allocation11 + $0x6f0] sm:$0xff] }
 0x2ff   :  { %v5226_v48 = vcombine.low %v2608_v23, %v2612_v24  ;;  %v5669_v14 = vld [vmem:[#allocation13 + $0x554] ss:$8 sps:$4 sm:$0xff]   ;;  %v5667_v11 = vld [vmem:[#allocation13 + $0x550] ss:$8 sps:$4 sm:$0xff]  }
 0x300   :  { %3424 = vmatpush1.bf16.msra.mxu0 %v5154_v31  ;;  %3467 = vmatpush1.bf16.msra.mxu1 %v5156_v32  ;;  %v5227_v31 = vcombine.high %v2608_v23, %v2612_v24  ;;  %v5229_v32 = vcombine.high %v2609_v26, %v2613_v27  ;;  %v5681_v23 = vld [vmem:[#allocation13 + $0x534] ss:$8 sps:$4 sm:$0xff]   ;;  %v5676_v24 = vld [vmem:[#allocation13 + $0x430] ss:$8 sps:$4 sm:$0xff]   ;;  %v5684_v27 = vld [vmem:[#allocation13 + $0x424] ss:$8 sps:$4 sm:$0xff]  }
 0x301   :  { %3425 = vmatprep.subr.bf16.mxu0 %v5147_v33  ;;  %3468 = vmatprep.subr.bf16.mxu1 %v5149_v34  ;;  %v2600_v33 = vld [vmem:[#allocation11 + $0x690] sm:$0xff] }
 0x302   :  { %v2604_v34 = vld [vmem:[#allocation11 + $0x6b0] sm:$0xff] }
 0x303   :  { %v5218_v61 = vcombine.low %v2600_v33, %v2604_v34  ;;  %v5679_v26 = vld [vmem:[#allocation13 + $0x530] ss:$8 sps:$4 sm:$0xff]  }
 0x304   :  { %3426 = vmatpush1.bf16.msra.mxu0 %v5146_v12  ;;  %3469 = vmatpush1.bf16.msra.mxu1 %v5148_v50  ;;  %v5219_v12 = vcombine.high %v2600_v33, %v2604_v34  ;;  %v5221_v50 = vcombine.high %v2601_v41, %v2605_v47  ;;  %v5693_v33 = vld [vmem:[#allocation13 + $0x514] ss:$8 sps:$4 sm:$0xff]   ;;  %v5688_v34 = vld [vmem:[#allocation13 + $0x410] ss:$8 sps:$4 sm:$0xff]   ;;  %v5696_v47 = vld [vmem:[#allocation13 + $0x404] ss:$8 sps:$4 sm:$0xff]  }
 0x305   :  { %3427 = vmatprep.subr.bf16.mxu0 %v5139_v54  ;;  %3470 = vmatprep.subr.bf16.mxu1 %v5141_v17  ;;  %v2592_v54 = vld [vmem:[#allocation11 + $0x650] sm:$0xff] }
 0x306   :  { %v2596_v17 = vld [vmem:[#allocation11 + $0x670] sm:$0xff] }
 0x307   :  { %v5210_v3 = vcombine.low %v2592_v54, %v2596_v17  ;;  %v5691_v41 = vld [vmem:[#allocation13 + $0x510] ss:$8 sps:$4 sm:$0xff]  }
 0x308   :  { %3428 = vmatpush1.bf16.msra.mxu0 %v5138_v21  ;;  %3471 = vmatpush1.bf16.msra.mxu1 %v5140_v63  ;;  %v5211_v21 = vcombine.high %v2592_v54, %v2596_v17  ;;  %v5213_v63 = vcombine.high %v2593_v25, %v2597_v60  ;;  %v5705_v54 = vld [vmem:[#allocation13 + $0x5f4] ss:$8 sps:$4 sm:$0xff]   ;;  %v5700_v17 = vld [vmem:[#allocation13 + $0x4f0] ss:$8 sps:$4 sm:$0xff]   ;;  %v5708_v60 = vld [vmem:[#allocation13 + $0x4e4] ss:$8 sps:$4 sm:$0xff]  }
 0x309   :  { %3429 = vmatprep.subr.bf16.mxu0 %v5259_v0  ;;  %3472 = vmatprep.subr.bf16.mxu1 %v5261_v1  ;;  %v2584_v0 = vld [vmem:[#allocation11 + $0x610] sm:$0xff] }
 0x30a   :  { %v2588_v1 = vld [vmem:[#allocation11 + $0x630] sm:$0xff] }
 0x30b   :  { %v5703_v25 = vld [vmem:[#allocation13 + $0x5f0] ss:$8 sps:$4 sm:$0xff]  }
 0x30c   :  { %3430 = vmatpush2.bf16.msra.mxu0 %v5258_v10  ;;  %3473 = vmatpush2.bf16.msra.mxu1 %v5260_v5  ;;  %v5203_v10 = vcombine.high %v2584_v0, %v2588_v1  ;;  %v5205_v5 = vcombine.high %v2585_v22, %v2589_v2 }
 0x30d   :  { %3431 = vmatprep.subr.bf16.mxu0 %v5251_v42  ;;  %3474 = vmatprep.subr.bf16.mxu1 %v5253_v52  ;;  %v5202_v42 = vcombine.low %v2584_v0, %v2588_v1  ;;  %v5204_v52 = vcombine.low %v2585_v22, %v2589_v2  ;;  %v5717_v0 = vld [vmem:[#allocation13 + $0x5d4] ss:$8 sps:$4 sm:$0xff]   ;;  %v5712_v1 = vld [vmem:[#allocation13 + $0x4d0] ss:$8 sps:$4 sm:$0xff]   ;;  %v5720_v2 = vld [vmem:[#allocation13 + $0x4c4] ss:$8 sps:$4 sm:$0xff]  }
 0x30e   :  { %v5715_v22 = vld [vmem:[#allocation13 + $0x5d0] ss:$8 sps:$4 sm:$0xff]  }
 0x310   :  { %3432 = vmatpush2.bf16.msra.mxu0 %v5250_v6  ;;  %3475 = vmatpush2.bf16.msra.mxu1 %v5252_v7  ;;  %v5660_v6 = vld [vmem:[#allocation13 + $0x464] ss:$8 sps:$4 sm:$0xff]  }
 0x311   :  { %3433 = vmatprep.subr.bf16.mxu0 %v5243_v13  ;;  %3476 = vmatprep.subr.bf16.mxu1 %v5245_v38  ;;  %v5663_v7 = vld [vmem:[#allocation13 + $0x564] ss:$8 sps:$4 sm:$0xff]   ;;  %v5658_v13 = vld [vmem:[#allocation13 + $0x460] ss:$8 sps:$4 sm:$0xff]  }
 0x312   :  { %v5661_v38 = vld [vmem:[#allocation13 + $0x560] ss:$8 sps:$4 sm:$0xff]  }
 0x314   :  { %3434 = vmatpush2.bf16.msra.mxu0 %v5242_v15  ;;  %3477 = vmatpush2.bf16.msra.mxu1 %v5244_v16  ;;  %v5672_v15 = vld [vmem:[#allocation13 + $0x444] ss:$8 sps:$4 sm:$0xff]  }
 0x315   :  { %3435 = vmatprep.subr.bf16.mxu0 %v5235_v18  ;;  %3478 = vmatprep.subr.bf16.mxu1 %v5237_v19  ;;  %v5675_v16 = vld [vmem:[#allocation13 + $0x544] ss:$8 sps:$4 sm:$0xff]   ;;  %v5670_v18 = vld [vmem:[#allocation13 + $0x440] ss:$8 sps:$4 sm:$0xff]   ;;  %v5678_v19 = vld [vmem:[#allocation13 + $0x434] ss:$8 sps:$4 sm:$0xff]  }
 0x318   :  { %3436 = vmatpush2.bf16.msra.mxu0 %v5234_v29  ;;  %3479 = vmatpush2.bf16.msra.mxu1 %v5236_v30  ;;  %v5687_v29 = vld [vmem:[#allocation13 + $0x524] ss:$8 sps:$4 sm:$0xff]   ;;  %v5682_v30 = vld [vmem:[#allocation13 + $0x420] ss:$8 sps:$4 sm:$0xff]  }
 0x319   :  { %3437 = vmatprep.subr.bf16.mxu0 %v5227_v31  ;;  %3480 = vmatprep.subr.bf16.mxu1 %v5229_v32  ;;  %v5685_v31 = vld [vmem:[#allocation13 + $0x520] ss:$8 sps:$4 sm:$0xff]   ;;  %v5690_v32 = vld [vmem:[#allocation13 + $0x414] ss:$8 sps:$4 sm:$0xff]  }
 0x31c   :  { %3438 = vmatpush2.bf16.msra.mxu0 %v5226_v48  ;;  %3481 = vmatpush2.bf16.msra.mxu1 %v5228_v49  ;;  %v5699_v48 = vld [vmem:[#allocation13 + $0x504] ss:$8 sps:$4 sm:$0xff]   ;;  %v5694_v49 = vld [vmem:[#allocation13 + $0x400] ss:$8 sps:$4 sm:$0xff]  }
 0x31d   :  { %3439 = vmatprep.subr.bf16.mxu0 %v5219_v12  ;;  %3482 = vmatprep.subr.bf16.mxu1 %v5221_v50  ;;  %v5697_v12 = vld [vmem:[#allocation13 + $0x500] ss:$8 sps:$4 sm:$0xff]   ;;  %v5702_v50 = vld [vmem:[#allocation13 + $0x4f4] ss:$8 sps:$4 sm:$0xff]  }
 0x320   :  { %3440 = vmatpush2.bf16.msra.mxu0 %v5218_v61  ;;  %3483 = vmatpush2.bf16.msra.mxu1 %v5220_v62  ;;  %v5711_v61 = vld [vmem:[#allocation13 + $0x5e4] ss:$8 sps:$4 sm:$0xff]   ;;  %v5706_v62 = vld [vmem:[#allocation13 + $0x4e0] ss:$8 sps:$4 sm:$0xff]  }
 0x321   :  { %3441 = vmatprep.subr.bf16.mxu0 %v5211_v21  ;;  %3484 = vmatprep.subr.bf16.mxu1 %v5213_v63  ;;  %v5709_v21 = vld [vmem:[#allocation13 + $0x5e0] ss:$8 sps:$4 sm:$0xff]   ;;  %v5714_v63 = vld [vmem:[#allocation13 + $0x4d4] ss:$8 sps:$4 sm:$0xff]  }
 0x324   :  { %3442 = vmatpush2.bf16.msra.mxu0 %v5210_v3  ;;  %3485 = vmatpush2.bf16.msra.mxu1 %v5212_v4  ;;  %v5723_v3 = vld [vmem:[#allocation13 + $0x5c4] ss:$8 sps:$4 sm:$0xff]   ;;  %v5718_v4 = vld [vmem:[#allocation13 + $0x4c0] ss:$8 sps:$4 sm:$0xff]  }
 0x325   :  { %3443 = vmatprep.subr.bf16.mxu0 %v5203_v10  ;;  %3486 = vmatprep.subr.bf16.mxu1 %v5205_v5  ;;  %v5721_v10 = vld [vmem:[#allocation13 + $0x5c0] ss:$8 sps:$4 sm:$0xff]   ;;  %v5726_v5 = vld [vmem:[#allocation13 + $0x4b4] ss:$8 sps:$4 sm:$0xff]  }
 0x328   :  { %3444 = vmatpush2.bf16.msra.mxu0 %v5202_v42  ;;  %3487 = vmatpush2.bf16.msra.mxu1 %v5204_v52  ;;  %v5729_v42 = vld [vmem:[#allocation13 + $0x5b4] ss:$8 sps:$4 sm:$0xff]   ;;  %v5724_v52 = vld [vmem:[#allocation13 + $0x4b0] ss:$8 sps:$4 sm:$0xff]  }
 0x329   :  { %4303 = vmatprep.subr.bf16.mxu0 %v5654_v53  ;;  %4346 = vmatprep.subr.bf16.mxu1 %v5657_v55  ;;  %v5727_v53 = vld [vmem:[#allocation13 + $0x5b0] ss:$8 sps:$4 sm:$0xff]   ;;  %v5732_v55 = vld [vmem:[#allocation13 + $0x4a4] ss:$8 sps:$4 sm:$0xff]  }
 0x32b   :  { %3446 = vmatmul.mubr.bf16.vlgmr.msra.gmra.mxu0 %v6414_v59  ;;  %3489 = vmatmul.mubr.bf16.vlgmr.msra.gmra.mxu1 %v6414_v59  ;;  %v5673_v59 = vld [vmem:[#allocation13 + $0x540] ss:$8 sps:$4 sm:$0xff]  }
 0x32c   :  { %4304 = vmatpush1.bf16.msra.mxu0 %v5652_v56  ;;  %4347 = vmatpush1.bf16.msra.mxu1 %v5655_v57  ;;  %v5735_v56 = vld [vmem:[#allocation13 + $0x5a4] ss:$8 sps:$4 sm:$0xff]   ;;  %v5730_v57 = vld [vmem:[#allocation13 + $0x4a0] ss:$8 sps:$4 sm:$0xff]  }
 0x32d   :  { %4305 = vmatprep.subr.bf16.mxu0 %v5660_v6  ;;  %4348 = vmatprep.subr.bf16.mxu1 %v5663_v7  ;;  %v5733_v6 = vld [vmem:[#allocation13 + $0x5a0] ss:$8 sps:$4 sm:$0xff]   ;;  %v5738_v7 = vld [vmem:[#allocation13 + $0x494] ss:$8 sps:$4 sm:$0xff]  }
 0x330   :  { %4306 = vmatpush1.bf16.msra.mxu0 %v5658_v13  ;;  %4349 = vmatpush1.bf16.msra.mxu1 %v5661_v38  ;;  %v5741_v13 = vld [vmem:[#allocation13 + $0x594] ss:$8 sps:$4 sm:$0xff]   ;;  %v5736_v38 = vld [vmem:[#allocation13 + $0x490] ss:$8 sps:$4 sm:$0xff]  }
 0x331   :  { %4307 = vmatprep.subr.bf16.mxu0 %v5666_v40  ;;  %4350 = vmatprep.subr.bf16.mxu1 %v5669_v14  ;;  %v5739_v40 = vld [vmem:[#allocation13 + $0x590] ss:$8 sps:$4 sm:$0xff]   ;;  %v5744_v14 = vld [vmem:[#allocation13 + $0x484] ss:$8 sps:$4 sm:$0xff]  }
 0x334   :  { %4308 = vmatpush1.bf16.msra.mxu0 %v5664_v44  ;;  %4351 = vmatpush1.bf16.msra.mxu1 %v5667_v11  ;;  %v5747_v44 = vld [vmem:[#allocation13 + $0x584] ss:$8 sps:$4 sm:$0xff]   ;;  %v5742_v11 = vld [vmem:[#allocation13 + $0x480] ss:$8 sps:$4 sm:$0xff]  }
 0x335   :  { %4309 = vmatprep.subr.bf16.mxu0 %v5672_v15  ;;  %4352 = vmatprep.subr.bf16.mxu1 %v5675_v16  ;;  %v5745_v15 = vld [vmem:[#allocation13 + $0x580] ss:$8 sps:$4 sm:$0xff]   ;;  %v5750_v16 = vld [vmem:[#allocation13 + $0x674] ss:$8 sps:$4 sm:$0xff]  }
 0x338   :  { %4310 = vmatpush1.bf16.msra.mxu0 %v5670_v18  ;;  %4353 = vmatpush1.bf16.msra.mxu1 %v5673_v59  ;;  %v5753_v18 = vld [vmem:[#allocation13 + $0x774] ss:$8 sps:$4 sm:$0xff]  }
 0x339   :  { %4311 = vmatprep.subr.bf16.mxu0 %v5678_v19  ;;  %4354 = vmatprep.subr.bf16.mxu1 %v5681_v23  ;;  %v6426_v59 = vld [vmem:[#allocation10 + $0x1] ss:$2 sm:$0xff] }
 0x33c   :  { %4312 = vmatpush1.bf16.msra.mxu0 %v5676_v24  ;;  %4355 = vmatpush1.bf16.msra.mxu1 %v5679_v26  ;;  %v2654_v24 = vrot.slane %v6426_v59, %v6321_v37  ;;  %v2662_v26 = vrot.slane %v6426_v59, %v584_v8 }
 0x33d   :  { %4313 = vmatprep.subr.bf16.mxu0 %v5684_v27  ;;  %4356 = vmatprep.subr.bf16.mxu1 %v5687_v29  ;;  %v2650_v27 = vrot.slane %v6426_v59, %v6324_v45  ;;  %v2658_v29 = vrot.slane %v6426_v59, %v580_v9 }
 0x340   :  { %4314 = vmatpush1.bf16.msra.mxu0 %v5682_v30  ;;  %4357 = vmatpush1.bf16.msra.mxu1 %v5685_v31 }
 0x341   :  { %4315 = vmatprep.subr.bf16.mxu0 %v5690_v32  ;;  %4358 = vmatprep.subr.bf16.mxu1 %v5693_v33 }
 0x344   :  { %4316 = vmatpush1.bf16.msra.mxu0 %v5688_v34  ;;  %4359 = vmatpush1.bf16.msra.mxu1 %v5691_v41 }
 0x345   :  { %4317 = vmatprep.subr.bf16.mxu0 %v5696_v47  ;;  %4360 = vmatprep.subr.bf16.mxu1 %v5699_v48 }
 0x348   :  { %4318 = vmatpush1.bf16.msra.mxu0 %v5694_v49  ;;  %4361 = vmatpush1.bf16.msra.mxu1 %v5697_v12 }
 0x349   :  { %4319 = vmatprep.subr.bf16.mxu0 %v5702_v50  ;;  %4362 = vmatprep.subr.bf16.mxu1 %v5705_v54 }
 0x34c   :  { %4320 = vmatpush2.bf16.msra.mxu0 %v5700_v17  ;;  %4363 = vmatpush2.bf16.msra.mxu1 %v5703_v25 }
 0x34d   :  { %4321 = vmatprep.subr.bf16.mxu0 %v5708_v60  ;;  %4364 = vmatprep.subr.bf16.mxu1 %v5711_v61 }
 0x350   :  { %4322 = vmatpush2.bf16.msra.mxu0 %v5706_v62  ;;  %4365 = vmatpush2.bf16.msra.mxu1 %v5709_v21 }
 0x351   :  { %4323 = vmatprep.subr.bf16.mxu0 %v5714_v63  ;;  %4366 = vmatprep.subr.bf16.mxu1 %v5717_v0 }
 0x354   :  { %4324 = vmatpush2.bf16.msra.mxu0 %v5712_v1  ;;  %4367 = vmatpush2.bf16.msra.mxu1 %v5715_v22 }
 0x355   :  { %4325 = vmatprep.subr.bf16.mxu0 %v5720_v2  ;;  %4368 = vmatprep.subr.bf16.mxu1 %v5723_v3  ;;  %v5748_v2 = vld [vmem:[#allocation13 + $0x670] ss:$8 sps:$4 sm:$0xff]  }
 0x356   :  { %v5751_v3 = vld [vmem:[#allocation13 + $0x770] ss:$8 sps:$4 sm:$0xff]  }
 0x358   :  { %4326 = vmatpush2.bf16.msra.mxu0 %v5718_v4  ;;  %4369 = vmatpush2.bf16.msra.mxu1 %v5721_v10 }
 0x359   :  { %4327 = vmatprep.subr.bf16.mxu0 %v5726_v5  ;;  %4370 = vmatprep.subr.bf16.mxu1 %v5729_v42  ;;  %v5756_v5 = vld [vmem:[#allocation13 + $0x664] ss:$8 sps:$4 sm:$0xff]  }
 0x35a   :  { %v5759_v42 = vld [vmem:[#allocation13 + $0x764] ss:$8 sps:$4 sm:$0xff]  }
 0x35c   :  { %4328 = vmatpush2.bf16.msra.mxu0 %v5724_v52  ;;  %4371 = vmatpush2.bf16.msra.mxu1 %v5727_v53  ;;  %v5754_v52 = vld [vmem:[#allocation13 + $0x660] ss:$8 sps:$4 sm:$0xff]  }
 0x35d   :  { %4329 = vmatprep.subr.bf16.mxu0 %v5732_v55  ;;  %4372 = vmatprep.subr.bf16.mxu1 %v5735_v56  ;;  %v5757_v53 = vld [vmem:[#allocation13 + $0x760] ss:$8 sps:$4 sm:$0xff]   ;;  %v5762_v55 = vld [vmem:[#allocation13 + $0x654] ss:$8 sps:$4 sm:$0xff]  }
 0x35e   :  { %v5765_v56 = vld [vmem:[#allocation13 + $0x754] ss:$8 sps:$4 sm:$0xff]  }
 0x360   :  { %4330 = vmatpush2.bf16.msra.mxu0 %v5730_v57  ;;  %4373 = vmatpush2.bf16.msra.mxu1 %v5733_v6  ;;  %v5760_v57 = vld [vmem:[#allocation13 + $0x650] ss:$8 sps:$4 sm:$0xff]  }
 0x361   :  { %4331 = vmatprep.subr.bf16.mxu0 %v5738_v7  ;;  %4374 = vmatprep.subr.bf16.mxu1 %v5741_v13  ;;  %v5763_v6 = vld [vmem:[#allocation13 + $0x750] ss:$8 sps:$4 sm:$0xff]   ;;  %v5768_v7 = vld [vmem:[#allocation13 + $0x644] ss:$8 sps:$4 sm:$0xff]  }
 0x362   :  { %v5771_v13 = vld [vmem:[#allocation13 + $0x744] ss:$8 sps:$4 sm:$0xff]  }
 0x364   :  { %4332 = vmatpush2.bf16.msra.mxu0 %v5736_v38  ;;  %4375 = vmatpush2.bf16.msra.mxu1 %v5739_v40  ;;  %v5766_v38 = vld [vmem:[#allocation13 + $0x640] ss:$8 sps:$4 sm:$0xff]  }
 0x365   :  { %4333 = vmatprep.subr.bf16.mxu0 %v5744_v14  ;;  %4376 = vmatprep.subr.bf16.mxu1 %v5747_v44  ;;  %v5769_v40 = vld [vmem:[#allocation13 + $0x740] ss:$8 sps:$4 sm:$0xff]   ;;  %v5774_v14 = vld [vmem:[#allocation13 + $0x634] ss:$8 sps:$4 sm:$0xff]  }
 0x366   :  { %v5777_v44 = vld [vmem:[#allocation13 + $0x734] ss:$8 sps:$4 sm:$0xff]  }
 0x368   :  { %4334 = vmatpush2.bf16.msra.mxu0 %v5742_v11  ;;  %4377 = vmatpush2.bf16.msra.mxu1 %v5745_v15  ;;  %v5772_v11 = vld [vmem:[#allocation13 + $0x630] ss:$8 sps:$4 sm:$0xff]  }
 0x369   :  { %4389 = vmatprep.subr.bf16.mxu0 %v5750_v16  ;;  %4432 = vmatprep.subr.bf16.mxu1 %v5753_v18  ;;  %v5775_v15 = vld [vmem:[#allocation13 + $0x730] ss:$8 sps:$4 sm:$0xff]   ;;  %v5780_v16 = vld [vmem:[#allocation13 + $0x624] ss:$8 sps:$4 sm:$0xff]  }
 0x36a   :  { %v5783_v18 = vld [vmem:[#allocation13 + $0x724] ss:$8 sps:$4 sm:$0xff]  }
 0x3ab   :  { %v3361_v19 = vpop.f32.mrf.mxu0  ;;  %v3404_v23 = vpop.f32.mrf.mxu1 }
 0x3ac   :  { %v3362_v49 = vadd.f32 %v3361_v19, %v2650_v27  ;;  %v3405_v12 = vadd.f32 %v3404_v23, %v2658_v29  ;;  %v5778_v19 = vld [vmem:[#allocation13 + $0x620] ss:$8 sps:$4 sm:$0xff]  }
 0x3ad   :  { %v3363_v30 = vpop.f32.mrf.mxu0  ;;  %v3406_v31 = vpop.f32.mrf.mxu1  ;;  %v5781_v23 = vld [vmem:[#allocation13 + $0x720] ss:$8 sps:$4 sm:$0xff]  }
 0x3ae   :  { %v3364_v34 = vadd.f32 %v3363_v30, %v2654_v24  ;;  %v3407_v41 = vadd.f32 %v3406_v31, %v2662_v26  ;;  %v3499_v63 = vmax.f32 %v3362_v49, 0.0  ;;  %v3501_v0 = vmax.f32 %v3405_v12, 0.0  ;;  %v5792_v30 = vld [vmem:[#allocation13 + $0x604] ss:$8 sps:$4 sm:$0xff]  }
 0x3af   :  { %v3365_v32 = vpop.f32.mrf.mxu0  ;;  %v3408_v33 = vpop.f32.mrf.mxu1  ;;  %v5795_v31 = vld [vmem:[#allocation13 + $0x704] ss:$8 sps:$4 sm:$0xff]  }
 0x3b0   :  { %v3366_v47 = vadd.f32 %v3365_v32, %v2650_v27  ;;  %v3409_v48 = vadd.f32 %v3408_v33, %v2658_v29  ;;  %v3500_v61 = vmax.f32 %v3364_v34, 0.0  ;;  %v3502_v62 = vmax.f32 %v3407_v41, 0.0  ;;  %v5784_v27 = vld [vmem:[#allocation13 + $0x610] ss:$8 sps:$4 sm:$0xff]   ;;  %v5790_v32 = vld [vmem:[#allocation13 + $0x600] ss:$8 sps:$4 sm:$0xff]  }
 0x3b1   :  { %v3367_v50 = vpop.f32.mrf.mxu0  ;;  %v3410_v54 = vpop.f32.mrf.mxu1  ;;  %v5787_v29 = vld [vmem:[#allocation13 + $0x710] ss:$8 sps:$4 sm:$0xff]   ;;  %v5793_v33 = vld [vmem:[#allocation13 + $0x700] ss:$8 sps:$4 sm:$0xff]   ;;  %v5798_v34 = vld [vmem:[#allocation13 + $0x6f4] ss:$8 sps:$4 sm:$0xff]  }
 0x3b2   :  { %v3368_v8 = vadd.f32 %v3367_v50, %v2654_v24  ;;  %v3411_v17 = vadd.f32 %v3410_v54, %v2662_v26  ;;  %v3507_v25 = vmax.f32 %v3366_v47, 0.0  ;;  %v3509_v60 = vmax.f32 %v3409_v48, 0.0  ;;  %v5786_v24 = vld [vmem:[#allocation13 + $0x614] ss:$8 sps:$4 sm:$0xff]   ;;  %v5796_v47 = vld [vmem:[#allocation13 + $0x6f0] ss:$8 sps:$4 sm:$0xff]  }
 0x3b3   :  { %v5789_v26 = vld [vmem:[#allocation13 + $0x714] ss:$8 sps:$4 sm:$0xff]   ;;  %v5799_v48 = vld [vmem:[#allocation13 + $0x7f0] ss:$8 sps:$4 sm:$0xff]   ;;  %v5804_v49 = vld [vmem:[#allocation13 + $0x6e4] ss:$8 sps:$4 sm:$0xff]  }
 0x3b4   :  { %v3508_v21 = vmax.f32 %v3368_v8, 0.0  ;;  %v3510_v9 = vmax.f32 %v3411_v17, 0.0  ;;  %v3515_v4 = vpack.c.bf16 %v3507_v25, %v3499_v63  ;;  %v3517_v10 = vpack.c.bf16 %v3509_v60, %v3501_v0  ;;  %v5801_v41 = vld [vmem:[#allocation13 + $0x7f4] ss:$8 sps:$4 sm:$0xff]   ;;  %v5807_v12 = vld [vmem:[#allocation13 + $0x7e4] ss:$8 sps:$4 sm:$0xff]  }
 0x3b5   :  { %v5802_v50 = vld [vmem:[#allocation13 + $0x6e0] ss:$8 sps:$4 sm:$0xff]   ;;  %v5810_v8 = vld [vmem:[#allocation13 + $0x6d4] ss:$8 sps:$4 sm:$0xff]   ;;  %v5808_v25 = vld [vmem:[#allocation13 + $0x6d0] ss:$8 sps:$4 sm:$0xff]  }
 0x3b6   :  { %v3516_v1 = vpack.c.bf16 %v3508_v21, %v3500_v61  ;;  %v3518_v22 = vpack.c.bf16 %v3510_v9, %v3502_v62  ;;  %v5805_v54 = vld [vmem:[#allocation13 + $0x7e0] ss:$8 sps:$4 sm:$0xff]   ;;  %v5813_v17 = vld [vmem:[#allocation13 + $0x7d4] ss:$8 sps:$4 sm:$0xff]   ;;  %v5811_v60 = vld [vmem:[#allocation13 + $0x7d0] ss:$8 sps:$4 sm:$0xff]  }
 0x3b7   :  { %v5816_v61 = vld [vmem:[#allocation13 + $0x6c4] ss:$8 sps:$4 sm:$0xff]   ;;  %v5814_v21 = vld [vmem:[#allocation13 + $0x6c0] ss:$8 sps:$4 sm:$0xff]   ;;  %v5822_v63 = vld [vmem:[#allocation13 + $0x6b4] ss:$8 sps:$4 sm:$0xff]  }
 0x3b8   :  { %4335 = vmatprep.mubr.bf16.mxu0 %v3516_v1  ;;  %4378 = vmatprep.mubr.bf16.mxu1 %v3518_v22  ;;  %v5819_v62 = vld [vmem:[#allocation13 + $0x7c4] ss:$8 sps:$4 sm:$0xff]   ;;  %v5817_v9 = vld [vmem:[#allocation13 + $0x7c0] ss:$8 sps:$4 sm:$0xff]   ;;  %v5825_v0 = vld [vmem:[#allocation13 + $0x7b4] ss:$8 sps:$4 sm:$0xff]  }
 0x3b9   :  { %4336 = vmatmul.mubr.bf16.vlgmr.msra.gmra.mxu0 %v3515_v4  ;;  %4379 = vmatmul.mubr.bf16.vlgmr.msra.gmra.mxu1 %v3517_v10  ;;  %v5820_v1 = vld [vmem:[#allocation13 + $0x6b0] ss:$8 sps:$4 sm:$0xff]   ;;  %v5826_v4 = vld [vmem:[#allocation13 + $0x6a0] ss:$8 sps:$4 sm:$0xff]  }
 0x3ba   :  { %4390 = vmatpush1.bf16.msra.mxu0 %v5748_v2  ;;  %4433 = vmatpush1.bf16.msra.mxu1 %v5751_v3  ;;  %v5823_v22 = vld [vmem:[#allocation13 + $0x7b0] ss:$8 sps:$4 sm:$0xff]   ;;  %v5828_v2 = vld [vmem:[#allocation13 + $0x6a4] ss:$8 sps:$4 sm:$0xff]   ;;  %v5829_v10 = vld [vmem:[#allocation13 + $0x7a0] ss:$8 sps:$4 sm:$0xff]  }
 0x3bb   :  { %4391 = vmatprep.subr.bf16.mxu0 %v5756_v5  ;;  %4434 = vmatprep.subr.bf16.mxu1 %v5759_v42  ;;  %v5831_v3 = vld [vmem:[#allocation13 + $0x7a4] ss:$8 sps:$4 sm:$0xff]  }
 0x3be   :  { %4392 = vmatpush1.bf16.msra.mxu0 %v5754_v52  ;;  %4435 = vmatpush1.bf16.msra.mxu1 %v5757_v53  ;;  %v5834_v52 = vld [vmem:[#allocation13 + $0x694] ss:$8 sps:$4 sm:$0xff]  }
 0x3bf   :  { %4393 = vmatprep.subr.bf16.mxu0 %v5762_v55  ;;  %4436 = vmatprep.subr.bf16.mxu1 %v5765_v56  ;;  %v5837_v53 = vld [vmem:[#allocation13 + $0x794] ss:$8 sps:$4 sm:$0xff]   ;;  %v2670_v55 = vrot.slane %v6426_v59, %v592_v35  ;;  %v2678_v56 = vrot.slane %v6426_v59, %v600_v36  ;;  %v5843_v36 = vld [vmem:[#allocation13 + $0x784] ss:$8 sps:$4 sm:$0xff]  }
 0x3c2   :  { %4394 = vmatpush1.bf16.msra.mxu0 %v5760_v57  ;;  %4437 = vmatpush1.bf16.msra.mxu1 %v5763_v6  ;;  %v2666_v57 = vrot.slane %v6426_v59, %v588_v39  ;;  %v2674_v6 = vrot.slane %v6426_v59, %v596_v43 }
 0x3c3   :  { %4395 = vmatprep.subr.bf16.mxu0 %v5768_v7  ;;  %4438 = vmatprep.subr.bf16.mxu1 %v5771_v13 }
 0x3c6   :  { %4396 = vmatpush1.bf16.msra.mxu0 %v5766_v38  ;;  %4439 = vmatpush1.bf16.msra.mxu1 %v5769_v40  ;;  %v5832_v38 = vld [vmem:[#allocation13 + $0x690] ss:$8 sps:$4 sm:$0xff]  }
 0x3c7   :  { %4397 = vmatprep.subr.bf16.mxu0 %v5774_v14  ;;  %4440 = vmatprep.subr.bf16.mxu1 %v5777_v44  ;;  %v5835_v40 = vld [vmem:[#allocation13 + $0x790] ss:$8 sps:$4 sm:$0xff]   ;;  %v5840_v44 = vld [vmem:[#allocation13 + $0x684] ss:$8 sps:$4 sm:$0xff]  }
 0x3ca   :  { %4398 = vmatpush1.bf16.msra.mxu0 %v5772_v11  ;;  %4441 = vmatpush1.bf16.msra.mxu1 %v5775_v15 }
 0x3cb   :  { %4399 = vmatprep.subr.bf16.mxu0 %v5780_v16  ;;  %4442 = vmatprep.subr.bf16.mxu1 %v5783_v18 }
 0x3ce   :  { %4400 = vmatpush1.bf16.msra.mxu0 %v5778_v19  ;;  %4443 = vmatpush1.bf16.msra.mxu1 %v5781_v23 }
 0x3cf   :  { %4401 = vmatprep.subr.bf16.mxu0 %v5786_v24  ;;  %4444 = vmatprep.subr.bf16.mxu1 %v5789_v26  ;;  %v5838_v24 = vld [vmem:[#allocation13 + $0x680] ss:$8 sps:$4 sm:$0xff]  }
 0x3d0   :  { %v5841_v26 = vld [vmem:[#allocation13 + $0x780] ss:$8 sps:$4 sm:$0xff]  }
 0x3d2   :  { %4402 = vmatpush1.bf16.msra.mxu0 %v5784_v27  ;;  %4445 = vmatpush1.bf16.msra.mxu1 %v5787_v29 }
 0x3d3   :  { %4403 = vmatprep.subr.bf16.mxu0 %v5792_v30  ;;  %4446 = vmatprep.subr.bf16.mxu1 %v5795_v31 }
 0x3d6   :  { %4404 = vmatpush1.bf16.msra.mxu0 %v5790_v32  ;;  %4447 = vmatpush1.bf16.msra.mxu1 %v5793_v33 }
 0x3d7   :  { %4405 = vmatprep.subr.bf16.mxu0 %v5798_v34  ;;  %4448 = vmatprep.subr.bf16.mxu1 %v5801_v41 }
 0x3da   :  { %4406 = vmatpush2.bf16.msra.mxu0 %v5796_v47  ;;  %4449 = vmatpush2.bf16.msra.mxu1 %v5799_v48 }
 0x3db   :  { %4407 = vmatprep.subr.bf16.mxu0 %v5804_v49  ;;  %4450 = vmatprep.subr.bf16.mxu1 %v5807_v12 }
 0x3de   :  { %4408 = vmatpush2.bf16.msra.mxu0 %v5802_v50  ;;  %4451 = vmatpush2.bf16.msra.mxu1 %v5805_v54  ;;  %v5844_v50 = vld [vmem:[#allocation14 + $0x78] sm:$0xff]  }
 0x3df   :  { %4409 = vmatprep.subr.bf16.mxu0 %v5810_v8  ;;  %4452 = vmatprep.subr.bf16.mxu1 %v5813_v17  ;;  %v5845_v54 = vld [vmem:[#allocation14 + $0x38] sm:$0xff]   ;;  %v5846_v8 = vld [vmem:[#allocation14 + $0x70] sm:$0xff]  }
 0x3e0   :  { %v5847_v17 = vld [vmem:[#allocation14 + $0x30] sm:$0xff]  }
 0x3e2   :  { %4410 = vmatpush2.bf16.msra.mxu0 %v5808_v25  ;;  %4453 = vmatpush2.bf16.msra.mxu1 %v5811_v60  ;;  %v5848_v25 = vld [vmem:[#allocation14 + $0x68] sm:$0xff]  }
 0x3e3   :  { %4411 = vmatprep.subr.bf16.mxu0 %v5816_v61  ;;  %4454 = vmatprep.subr.bf16.mxu1 %v5819_v62  ;;  %v5849_v60 = vld [vmem:[#allocation14 + $0x28] sm:$0xff]   ;;  %v5850_v61 = vld [vmem:[#allocation14 + $0x60] sm:$0xff]  }
 0x3e4   :  { %v5851_v62 = vld [vmem:[#allocation14 + $0x20] sm:$0xff]  }
 0x3e6   :  { %4412 = vmatpush2.bf16.msra.mxu0 %v5814_v21  ;;  %4455 = vmatpush2.bf16.msra.mxu1 %v5817_v9  ;;  %v5852_v21 = vld [vmem:[#allocation14 + $0x58] sm:$0xff]  }
 0x3e7   :  { %4413 = vmatprep.subr.bf16.mxu0 %v5822_v63  ;;  %4456 = vmatprep.subr.bf16.mxu1 %v5825_v0  ;;  %v5853_v9 = vld [vmem:[#allocation14 + $0x18] sm:$0xff]   ;;  %v5854_v63 = vld [vmem:[#allocation14 + $0x50] sm:$0xff]  }
 0x3e8   :  { %v5855_v0 = vld [vmem:[#allocation14 + $0x10] sm:$0xff]  }
 0x3ea   :  { %4414 = vmatpush2.bf16.msra.mxu0 %v5820_v1  ;;  %4457 = vmatpush2.bf16.msra.mxu1 %v5823_v22  ;;  %v5856_v1 = vld [vmem:[#allocation14 + $0x48] sm:$0xff]  }
 0x3eb   :  { %v3447_v5 = vpop.f32.mrf.mxu0  ;;  %v3490_v42 = vpop.f32.mrf.mxu1  ;;  %4415 = vmatprep.subr.bf16.mxu0 %v5828_v2  ;;  %4458 = vmatprep.subr.bf16.mxu1 %v5831_v3  ;;  %v5857_v22 = vld [vmem:[#allocation14 + $0x8] sm:$0xff]   ;;  %v5858_v2 = vld [vmem:[#allocation14 + $0x40] sm:$0xff]  }
 0x3ec   :  { %v3448_v18 = vadd.f32 %v3447_v5, %v2666_v57  ;;  %v3491_v51 = vadd.f32 %v3490_v42, %v2674_v6  ;;  %v5859_v3 = vld [vmem:[#allocation14] sm:$0xff]   ;;  %v2516_v5 = vld [vmem:[#allocation10 + $0x11] ss:$2 sm:$0x3] }
 0x3ed   :  { %v3449_v7 = vpop.f32.mrf.mxu0  ;;  %v3492_v13 = vpop.f32.mrf.mxu1 }
 0x3ee   :  { %4416 = vmatpush2.bf16.msra.mxu0 %v5826_v4  ;;  %4459 = vmatpush2.bf16.msra.mxu1 %v5829_v10  ;;  %v3450_v11 = vadd.f32 %v3449_v7, %v2670_v55  ;;  %v3493_v15 = vadd.f32 %v3492_v13, %v2678_v56  ;;  %v3503_v34 = vmax.f32 %v3448_v18, 0.0  ;;  %v3505_v41 = vmax.f32 %v3491_v51, 0.0 }
 0x3ef   :  { %v3451_v14 = vpop.f32.mrf.mxu0  ;;  %v3494_v35 = vpop.f32.mrf.mxu1  ;;  %4417 = vmatprep.subr.bf16.mxu0 %v5834_v52  ;;  %4460 = vmatprep.subr.bf16.mxu1 %v5837_v53  ;;  %v3656_v53 = vrot.slane %v2516_v5, %v6324_v45 }
 0x3f0   :  { %v3452_v16 = vadd.f32 %v3451_v14, %v2666_v57  ;;  %v3495_v39 = vadd.f32 %v3494_v35, %v2674_v6  ;;  %v3504_v30 = vmax.f32 %v3450_v11, 0.0  ;;  %v3506_v31 = vmax.f32 %v3493_v15, 0.0 }
 0x3f1   :  { %v3453_v19 = vpop.f32.mrf.mxu0  ;;  %v3496_v43 = vpop.f32.mrf.mxu1 }
 0x3f2   :  { %v3454_v59 = vadd.f32 %v3453_v19, %v2670_v55  ;;  %v3497_v23 = vadd.f32 %v3496_v43, %v2678_v56  ;;  %4418 = vmatpush2.bf16.msra.mxu0 %v5832_v38  ;;  %4461 = vmatpush2.bf16.msra.mxu1 %v5835_v40  ;;  %v3511_v27 = vmax.f32 %v3452_v16, 0.0  ;;  %v3513_v29 = vmax.f32 %v3495_v39, 0.0 }
 0x3f3   :  { %4419 = vmatprep.subr.bf16.mxu0 %v5840_v44  ;;  %4462 = vmatprep.subr.bf16.mxu1 %v5843_v36  ;;  %v3660_v55 = vrot.slane %v2516_v5, %v6321_v37 }
 0x3f4   :  { %v3512_v32 = vmax.f32 %v3454_v59, 0.0  ;;  %v3514_v33 = vmax.f32 %v3497_v23, 0.0  ;;  %v3519_v49 = vpack.c.bf16 %v3511_v27, %v3503_v34  ;;  %v3521_v12 = vpack.c.bf16 %v3513_v29, %v3505_v41 }
 0x3f6   :  { %v3520_v47 = vpack.c.bf16 %v3512_v32, %v3504_v30  ;;  %v3522_v48 = vpack.c.bf16 %v3514_v33, %v3506_v31  ;;  %4420 = vmatpush2.bf16.msra.mxu0 %v5838_v24  ;;  %4463 = vmatpush2.bf16.msra.mxu1 %v5841_v26 }
 0x3f7   :  { %5422 = vmatprep.subr.bf16.mxu0 %v5844_v50 }
 0x3f8   :  { %4421 = vmatprep.mubr.bf16.mxu0 %v3520_v47  ;;  %4464 = vmatprep.mubr.bf16.mxu1 %v3522_v48 }
 0x3f9   :  { %4422 = vmatmul.mubr.bf16.vlgmr.msra.gmra.mxu0 %v3519_v49  ;;  %4465 = vmatmul.mubr.bf16.vlgmr.msra.gmra.mxu1 %v3521_v12 }
 0x3fa   :  { %5423 = vmatpush3.bf16.msra.mxu0 %v5845_v54 }
 0x3fb   :  { %5424 = vmatprep.subr.bf16.mxu0 %v5846_v8 }
 0x3fe   :  { %5425 = vmatpush3.bf16.msra.mxu0 %v5847_v17 }
 0x3ff   :  { %5426 = vmatprep.subr.bf16.mxu0 %v5848_v25 }
 0x402   :  { %5427 = vmatpush3.bf16.msra.mxu0 %v5849_v60 }
 0x403   :  { %5428 = vmatprep.subr.bf16.mxu0 %v5850_v61 }
 0x406   :  { %5429 = vmatpush3.bf16.msra.mxu0 %v5851_v62 }
 0x407   :  { %5430 = vmatprep.subr.bf16.mxu0 %v5852_v21 }
 0x40a   :  { %5431 = vmatpush3.bf16.msra.mxu0 %v5853_v9 }
 0x40b   :  { %5432 = vmatprep.subr.bf16.mxu0 %v5854_v63 }
 0x40e   :  { %5433 = vmatpush3.bf16.msra.mxu0 %v5855_v0 }
 0x40f   :  { %5434 = vmatprep.subr.bf16.mxu0 %v5856_v1 }
 0x412   :  { %5435 = vmatpush3.bf16.msra.mxu0 %v5857_v22 }
 0x413   :  { %5436 = vmatprep.subr.bf16.mxu0 %v5858_v2 }
 0x416   :  { %5437 = vmatpush3.bf16.msra.mxu0 %v5859_v3 }
 0x479   :  { %v4337_v4 = vpop.f32.mrf.mxu0  ;;  %v4380_v10 = vpop.f32.mrf.mxu1 }
 0x47a   :  { %v4338_v6 = vadd.f32 %v4337_v4, %v3656_v53 }
 0x47b   :  { %v4339_v42 = vpop.f32.mrf.mxu0  ;;  %v4382_v52 = vpop.f32.mrf.mxu1 }
 0x47c   :  { %v4340_v7 = vadd.f32 %v4339_v42, %v3660_v55  ;;  %v4381_v40 = vadd.f32 %v4380_v10, %v4338_v6 }
 0x47d   :  { %v4341_v56 = vpop.f32.mrf.mxu0  ;;  %v4384_v57 = vpop.f32.mrf.mxu1 }
 0x47e   :  { %v4342_v14 = vadd.f32 %v4341_v56, %v3656_v53  ;;  %v4383_v36 = vadd.f32 %v4382_v52, %v4340_v7 }
 0x47f   :  { %v4343_v13 = vpop.f32.mrf.mxu0  ;;  %v4386_v38 = vpop.f32.mrf.mxu1 }
 0x480   :  { %v4344_v11 = vadd.f32 %v4343_v13, %v3660_v55  ;;  %v4385_v18 = vadd.f32 %v4384_v57, %v4342_v14 }
 0x482   :  { %v4387_v23 = vadd.f32 %v4386_v38, %v4344_v11 }
 0x4b9   :  { %v4423_v35 = vpop.f32.mrf.mxu0  ;;  %v4466_v44 = vpop.f32.mrf.mxu1 }
 0x4ba   :  { %v4424_v15 = vadd.f32 %v4423_v35, %v4381_v40 }
 0x4bb   :  { %v4425_v16 = vpop.f32.mrf.mxu0  ;;  %v4468_v39 = vpop.f32.mrf.mxu1 }
 0x4bc   :  { %v4467_v51 = vadd.f32 %v4466_v44, %v4424_v15  ;;  %v4426_v19 = vadd.f32 %v4425_v16, %v4383_v36 }
 0x4bd   :  { %v4427_v43 = vpop.f32.mrf.mxu0  ;;  %v4470_v59 = vpop.f32.mrf.mxu1 }
 0x4be   :  { %v4475_v24 = vadd.f32 %v4467_v51, %v6390_v20  ;;  %v4469_v26 = vadd.f32 %v4468_v39, %v4426_v19  ;;  %v4428_v27 = vadd.f32 %v4427_v43, %v4385_v18 }
 0x4bf   :  { %v4429_v29 = vpop.f32.mrf.mxu0  ;;  %v4472_v34 = vpop.f32.mrf.mxu1 }
 0x4c0   :  { %v4483_v30 = vrot.slane %v4475_v24, 4  ;;  %v4476_v31 = vadd.f32 %v4469_v26, %v6393_v28  ;;  %v4471_v32 = vadd.f32 %v4470_v59, %v4428_v27  ;;  %v4430_v33 = vadd.f32 %v4429_v29, %v4387_v23 }
 0x4c2   :  { %v4484_v41 = vadd.f32 %v4483_v30, %v4475_v24  ;;  %v4489_v47 = vrot.slane %v4476_v31, 4  ;;  %v4477_v48 = vadd.f32 %v4471_v32, %v6397_v46  ;;  %v4473_v49 = vadd.f32 %v4472_v34, %v4430_v33 }
 0x4c4   :  { %v4485_v12 = vrot.slane %v4484_v41, 2  ;;  %v4490_v50 = vadd.f32 %v4489_v47, %v4476_v31  ;;  %v4495_v54 = vrot.slane %v4477_v48, 4  ;;  %v4478_v8 = vadd.f32 %v4473_v49, %v6401_v58 }
 0x4c6   :  { %v4486_v20 = vadd.f32 %v4485_v12, %v4484_v41  ;;  %v4491_v17 = vrot.slane %v4490_v50, 2  ;;  %v4496_v25 = vadd.f32 %v4495_v54, %v4477_v48  ;;  %v4501_v60 = vrot.slane %v4478_v8, 4 }
 0x4c8   :  { %v4487_v61 = vrot.slane %v4486_v20, 1  ;;  %v4492_v62 = vadd.f32 %v4491_v17, %v4490_v50  ;;  %v4497_v28 = vrot.slane %v4496_v25, 2  ;;  %v4502_v21 = vadd.f32 %v4501_v60, %v4478_v8  ;;  %v4480_v17 = vld [vmem:[#allocation8 + $0x4] ss:$8 sm:$0x3] }
 0x4ca   :  { %v4488_v9 = vadd.f32 %v4487_v61, %v4486_v20  ;;  %v4493_v63 = vrot.slane %v4492_v62, 1  ;;  %v4498_v0 = vadd.f32 %v4497_v28, %v4496_v25  ;;  %v4503_v1 = vrot.slane %v4502_v21, 2 }
 0x4cb   :  { %v4567_v61 = vrot.slane %v4480_v17, %v6321_v37 }
 0x4cc   :  { %v4507_v22 = vmul.f32 0.125, %v4488_v9  ;;  %v4494_v46 = vadd.f32 %v4493_v63, %v4492_v62  ;;  %v4499_v2 = vrot.slane %v4498_v0, 1  ;;  %v4504_v3 = vadd.f32 %v4503_v1, %v4502_v21  ;;  %v4482_v63 = vld [vmem:[#allocation8 + $0x5] ss:$8 sm:$0x3] }
 0x4cd   :  { %v4563_v21 = vrot.slane %v4480_v17, %v6324_v45 }
 0x4ce   :  { %v4511_v4 = vsub.f32 %v4475_v24, %v4507_v22  ;;  %v4508_v10 = vmul.f32 0.125, %v4494_v46  ;;  %v4500_v5 = vadd.f32 %v4499_v2, %v4498_v0  ;;  %v4505_v58 = vrot.slane %v4504_v3, 1 }
 0x4cf   :  { %v4582_v2 = vrot.slane %v4482_v63, %v6321_v37 }
 0x4d0   :  { %v4515_v42 = vmul.f32 %v4511_v4, %v4511_v4  ;;  %v4512_v52 = vsub.f32 %v4476_v31, %v4508_v10  ;;  %v4509_v53 = vmul.f32 0.125, %v4500_v5  ;;  %v4506_v55 = vadd.f32 %v4505_v58, %v4504_v3 }
 0x4d1   :  { %v4578_v10 = vrot.slane %v4482_v63, %v6324_v45 }
 0x4d2   :  { %v4519_v56 = vrot.slane %v4515_v42, 4  ;;  %v4516_v57 = vmul.f32 %v4512_v52, %v4512_v52  ;;  %v4513_v6 = vsub.f32 %v4477_v48, %v4509_v53  ;;  %v4510_v7 = vmul.f32 0.125, %v4506_v55 }
 0x4d4   :  { %v4520_v13 = vadd.f32 %v4519_v56, %v4515_v42  ;;  %v4525_v38 = vrot.slane %v4516_v57, 4  ;;  %v4517_v40 = vmul.f32 %v4513_v6, %v4513_v6  ;;  %v4514_v14 = vsub.f32 %v4478_v8, %v4510_v7 }
 0x4d6   :  { %v4521_v35 = vrot.slane %v4520_v13, 2  ;;  %v4526_v44 = vadd.f32 %v4525_v38, %v4516_v57  ;;  %v4531_v36 = vrot.slane %v4517_v40, 4  ;;  %v4518_v11 = vmul.f32 %v4514_v14, %v4514_v14  ;;  %v4589_v57 = vld [vmem:[#allocation8 + $0x6] ss:$0 sm:$0xff] }
 0x4d8   :  { %v4522_v15 = vadd.f32 %v4521_v35, %v4520_v13  ;;  %v4527_v16 = vrot.slane %v4526_v44, 2  ;;  %v4532_v39 = vadd.f32 %v4531_v36, %v4517_v40  ;;  %v4537_v18 = vrot.slane %v4518_v11, 4 }
 0x4da   :  { %v4523_v51 = vrot.slane %v4522_v15, 1  ;;  %v4528_v19 = vadd.f32 %v4527_v16, %v4526_v44  ;;  %v4533_v43 = vrot.slane %v4532_v39, 2  ;;  %v4538_v59 = vadd.f32 %v4537_v18, %v4518_v11 }
 0x4dc   :  { %v4524_v23 = vadd.f32 %v4523_v51, %v4522_v15  ;;  %v4529_v24 = vrot.slane %v4528_v19, 1  ;;  %v4534_v26 = vadd.f32 %v4533_v43, %v4532_v39  ;;  %v4539_v27 = vrot.slane %v4538_v59, 2 }
 0x4de   :  { %v4543_v29 = vmul.f32 0.14285715, %v4524_v23  ;;  %v4530_v30 = vadd.f32 %v4529_v24, %v4528_v19  ;;  %v4535_v31 = vrot.slane %v4534_v26, 1  ;;  %v4540_v32 = vadd.f32 %v4539_v27, %v4538_v59 }
 0x4e0   :  { %v4547_v33 = vadd.f32 1e-05, %v4543_v29  ;;  %v4544_v34 = vmul.f32 0.14285715, %v4530_v30  ;;  %v4536_v41 = vadd.f32 %v4535_v31, %v4534_v26  ;;  %v4541_v47 = vrot.slane %v4540_v32, 1 }
 0x4e2   :  { %v4548_v48 = vadd.f32 1e-05, %v4544_v34  ;;  %v4545_v49 = vmul.f32 0.14285715, %v4536_v41  ;;  %v4542_v12 = vadd.f32 %v4541_v47, %v4540_v32  ;;  %5876 = vrsqrt.f32 %v4547_v33 }
 0x4e4   :  { %5878 = vrsqrt.f32 %v4548_v48  ;;  %v4549_v50 = vadd.f32 1e-05, %v4545_v49  ;;  %v4546_v54 = vmul.f32 0.14285715, %v4542_v12 }
 0x4e6   :  { %5880 = vrsqrt.f32 %v4549_v50  ;;  %v4550_v8 = vadd.f32 1e-05, %v4546_v54 }
 0x4e8   :  { %5882 = vrsqrt.f32 %v4550_v8 }
 0x4ef   :  { %v5877_v20 = vpop.eup %5876 }
 0x4f0   :  { %v4555_v28 = vmul.f32 %v5877_v20, %v4511_v4 }
 0x4f1   :  { %v5879_v25 = vpop.eup %5878 }
 0x4f2   :  { %v4556_v60 = vmul.f32 %v5879_v25, %v4512_v52  ;;  %v4570_v3 = vmul.f32 %v4563_v21, %v4555_v28 }
 0x4f3   :  { %v5881_v62 = vpop.eup %5880 }
 0x4f4   :  { %v4557_v9 = vmul.f32 %v5881_v62, %v4513_v6  ;;  %v4571_v46 = vmul.f32 %v4567_v61, %v4556_v60  ;;  %v4585_v53 = vadd.f32 %v4578_v10, %v4570_v3 }
 0x4f5   :  { %v5883_v0 = vpop.eup %5882 }
 0x4f6   :  { %v4572_v1 = vmul.f32 %v4563_v21, %v4557_v9  ;;  %v4558_v22 = vmul.f32 %v5883_v0, %v4514_v14  ;;  %v4586_v42 = vadd.f32 %v4582_v2, %v4571_v46 }
 0x4f8   :  { %v4573_v5 = vmul.f32 %v4567_v61, %v4558_v22  ;;  %v4587_v58 = vadd.f32 %v4578_v10, %v4572_v1 }
 0x4fa   :  { %v4588_v52 = vadd.f32 %v4582_v2, %v4573_v5  ;;  %v4590_v4 = vpack.c.bf16 %v4587_v58, %v4585_v53 }
 0x4fc   :  { %v4591_v55 = vpack.c.bf16 %v4588_v52, %v4586_v42 }
 0x4fe   :  { %4752 = vmatprep.mubr.bf16.mxu0 %v4591_v55 }
 0x4ff   :  { %4753 = vmatmul.mubr.bf16.vlgmr.msra.gmra.mxu0 %v4590_v4 }
 0x5bf   :  { %v5438_v56 = vpop.f32.mrf.mxu0 }
 0x5c1   :  { %v5439_v6 = vpop.f32.mrf.mxu0 }
 0x5c2   :  { %v5440_v7 = vadd.f32 %v5439_v6, %v5438_v56 }
 0x5c3   :  { %v5441_v13 = vpop.f32.mrf.mxu0 }
 0x5c4   :  { %v4755_v38 = vadd.f32 %v5440_v7, %v4589_v57 }
 0x5c5   :  { %v5442_v40 = vpop.f32.mrf.mxu0 }
 0x5c6   :  { %4761 = vst [vmem:[#allocation16] sm:$0xff] %v4755_v38  ;;  %v5443_v37 = vadd.f32 %v5442_v40, %v5441_v13 }
 0x5c8   :  { %v4758_v45 = vadd.f32 %v5443_v37, %v4589_v57 }
 0x5ca   :  { %4762 = vst [vmem:[#allocation16 + $0x8] sm:$0xff] %v4758_v45 }
 0x5cb   :  { %6031 = shalt.err (!%p6028_p11)
}
 0x5cc   :  { %4774 = dma.vmem_to_hbm [thread:$0]  %s4769_s27, 256, %s6473_s7, [#allocation7], %s6062_s1, %s6062_s1, %s6063_s0  }
 0x5cd   :  { %6050 = dma.done.wait [#allocation7], 256  }
 0x5ce   :  { %6051 = vsyncadd [#allocation7], 4294967040 }
 0x5cf   :  { %4778 = vsyncpa [#allocation6], 1 }
 0x5d0   :  { %4779 = vsyncpa [#allocation9], 1 }
 0x5d1   :  { %4780 = vsyncpa [#allocation12], 1 }
 0x5d2   :  { %4781 = vsyncpa [#allocation15], 1 }
 0x5d3   :  { %4782 = vsyncpa [#allocation7], 1 }

</bundles_post_ra>
